<compile_context>
chip_gen: v6e
topology: v6e:2x2x1
jax: 0.10.0
libtpu: 0.0.40
codegen_flags: <defaults>
</compile_context>

<pallas_src>
import math
import functools

import numpy as np
import jax
import jax.numpy as jnp
from jax.experimental import pallas as pl
from jax.experimental.pallas import tpu as pltpu  # noqa: F401  (TPU backend)


CONFIG = dict(
    feature_dim=8,          # per-modality conv output channels
    seq_len=16,
    use_projection=True,    # only the projection=True path is implemented
    projection_dim=32,      # d_model
    dropout=0.0,            # inference: dropout is identity
    num_heads=4,
    num_layers=2,
    d_ff=64,
    classifier_hidden_dim=32,
    num_classes=4,
)
BATCH = 2


# --------------------------------------------------------------------------- #
# Single fused kernel: 2 inputs (signal slab, weight slab), 1 output (logits)
# --------------------------------------------------------------------------- #
def fused_forward_kernel(sig_ref, slab_ref, out_ref, *, index, batch, seq_len,
                         d_model, num_heads, num_layers):
    B, S, D, H, L = batch, seq_len, d_model, num_heads, num_layers
    dh = D // H

    # Static-offset views into the packed weight slab (no dynamic slicing).
    def mat(name):
        off, r, c = index[name]
        return slab_ref[off:off + r, 0:c]

    def vec(name):
        off, _, c = index[name]
        return slab_ref[off, 0:c]

    # ---- feature embedding ---------------------------------------------- #
    # conv(k=3, pad=1) folded into the projection on the host:
    #   wp[3*m + t] = convw_m[t] @ projw_m            (t: prev / center / next)
    #   posb        = pos + projb + sum_m convb_m @ projw_m
    # The +/-1 time shifts are two [3B,S]@[S,S] matmuls (host-constant shift
    # matrices), shared by all three modalities.
    sig = sig_ref[...]                                              # [3B, S]
    prev = jnp.dot(sig, mat('shift_prev'), preferred_element_type=jnp.float32)
    nxt = jnp.dot(sig, mat('shift_next'), preferred_element_type=jnp.float32)
    wp = mat('wp')                                                  # [9, D]
    taps = (prev, sig, nxt)
    x = None
    for m in range(3):
        for t in range(3):
            term = taps[t][m * B:(m + 1) * B][:, :, None] * wp[3 * m + t]
            x = term if x is None else x + term                     # [B, S, D]
    x = x + mat('posb')[None]                                       # [B, S, D]

    def dense(v, w, b):
        return jnp.einsum('bsd,de->bse', v, w,
                          preferred_element_type=jnp.float32) + b

    def layer_norm(y, g, b):
        mu = jnp.mean(y, axis=-1, keepdims=True)
        var = jnp.mean((y - mu) ** 2, axis=-1, keepdims=True)
        return (y - mu) * jax.lax.rsqrt(var + 1e-5) * g + b

    # ---- transformer encoder (post-LN), fully unrolled -------------------- #
    for l in range(L):
        # Fused Q|K|V projection for all heads: one [B,S,D]@[D,3D] matmul.
        # The 1/sqrt(dh) score scale is folded into the q columns on the host.
        qkv = dense(x, mat(f'wqkv{l}'), vec(f'bqkv{l}'))            # [B, S, 3D]

        # All head score matmuls first ...
        scores, v_parts = [], []
        for h in range(H):
            qh = qkv[:, :, h * dh:(h + 1) * dh]                     # [B, S, dh]
            kh = qkv[:, :, D + h * dh:D + (h + 1) * dh]
            vh = qkv[:, :, 2 * D + h * dh:2 * D + (h + 1) * dh]
            v_parts.append(vh)
            scores.append(jnp.einsum('bqd,bkd->bqk', qh, kh,
                                     preferred_element_type=jnp.float32))

        # ... then ONE softmax batched over B*H ...
        s_all = jnp.concatenate(scores, axis=0)                     # [H*B, S, S]
        s_all = s_all - jnp.max(s_all, axis=-1, keepdims=True)
        p_all = jnp.exp(s_all)
        p_all = p_all * pl.reciprocal(jnp.sum(p_all, axis=-1, keepdims=True),
                                      approx=True)

        # ... then one batched ctx matmul and a single full-width out proj.
        v_all = jnp.concatenate(v_parts, axis=0)                    # [H*B, S, dh]
        ctx_all = jnp.einsum('xqk,xkd->xqd', p_all, v_all,
                             preferred_element_type=jnp.float32)    # [H*B, S, dh]
        ctx = jnp.concatenate([ctx_all[h * B:(h + 1) * B] for h in range(H)],
                              axis=-1)                              # [B, S, D]
        attn = dense(ctx, mat(f'wo{l}'), vec(f'bo{l}'))

        h1 = layer_norm(x + attn, vec(f'ln1g{l}'), vec(f'ln1b{l}'))
        ffn = dense(jnp.maximum(dense(h1, mat(f'w1{l}'), vec(f'b1{l}')), 0.0),
                    mat(f'w2{l}'), vec(f'b2{l}'))
        x = layer_norm(h1 + ffn, vec(f'ln2g{l}'), vec(f'ln2b{l}'))

    # ---- classifier head --------------------------------------------------- #
    pooled = jnp.mean(x, axis=1)                                    # [B, D]
    hid = jnp.maximum(
        jnp.dot(pooled, mat('cls_w1'), preferred_element_type=jnp.float32)
        + vec('cls_b1'), 0.0)
    out_ref[...] = (jnp.dot(hid, mat('cls_w2'),
                            preferred_element_type=jnp.float32) + vec('cls_b2'))


# --------------------------------------------------------------------------- #
# Wrapper: single pallas_call, no grid (whole model in one program).
# --------------------------------------------------------------------------- #
def multimodal_transformer_forward(slab, index, hr, gsr, motion, cfg):
    B, _, S = hr.shape
    C = cfg['num_classes']
    # Stack the three modalities into one [3B, S] slab -> one input DMA, and
    # the shift matmuls inside the kernel run once for all modalities.
    sig = jnp.concatenate([hr[:, 0, :], gsr[:, 0, :], motion[:, 0, :]], axis=0)
    kern = functools.partial(
        fused_forward_kernel, index=index, batch=B, seq_len=S,
        d_model=cfg['projection_dim'], num_heads=cfg['num_heads'],
        num_layers=cfg['num_layers'])
    return pl.pallas_call(
        kern,
        out_shape=jax.ShapeDtypeStruct((B, C), jnp.float32),
    )(sig, slab)


# --------------------------------------------------------------------------- #
# Host-side packing: every parameter (plus host-folded constants) goes into a
# single lane-dense [R, 128] f32 slab; `index` maps name -> (row_off, rows,
# cols) with row offsets 8-aligned.  Pure relayout, done once.
# --------------------------------------------------------------------------- #
def pack_params(params, cfg):
    F, P, S = cfg['feature_dim'], cfg['projection_dim'], cfg['seq_len']
    D, H = P, cfg['num_heads']
    dh = D // H
    scale = 1.0 / math.sqrt(dh)

    blocks = []

    def add(name, arr):
        a = np.asarray(arr, np.float32)
        if a.ndim == 1:
            a = a[None, :]
        assert a.ndim == 2 and a.shape[1] <= 128, (name, a.shape)
        blocks.append((name, a))

    # shift matrices (x @ shift_prev -> x[t-1]; x @ shift_next -> x[t+1])
    r = np.arange(S)[:, None]
    c = np.arange(S)[None, :]
    add('shift_prev', (r == c - 1).astype(np.float32))
    add('shift_next', (r == c + 1).astype(np.float32))

    # conv folded into projection; conv bias + proj bias + pos folded into posb
    projw = np.asarray(params['projw'], np.float32)
    wp = np.zeros((9, P), np.float32)
    embias = np.asarray(params['projb'], np.float32).copy()
    for m, mod in enumerate(('hr', 'gsr', 'motion')):
        pw = projw[m * F:(m + 1) * F]                               # [F, P]
        wp[3 * m:3 * m + 3] = np.asarray(params[f'{mod}_convw'], np.float32) @ pw
        embias = embias + np.asarray(params[f'{mod}_convb'], np.float32) @ pw
    add('wp', wp)
    add('posb', np.asarray(params['pos'], np.float32) + embias[None, :])

    for l, lp in enumerate(params['layers']):
        wq = np.asarray(lp['wq'], np.float32) * scale               # fold 1/sqrt(dh)
        bq = np.asarray(lp['bq'], np.float32) * scale
        add(f'wqkv{l}', np.concatenate(
            [wq, np.asarray(lp['wk'], np.float32),
             np.asarray(lp['wv'], np.float32)], axis=1))            # [D, 3D]
        add(f'bqkv{l}', np.concatenate(
            [bq, np.asarray(lp['bk'], np.float32),
             np.asarray(lp['bv'], np.float32)]))                    # [3D]
        add(f'wo{l}', lp['wo'])
        add(f'bo{l}', lp['bo'])
        add(f'ln1g{l}', lp['ln1g'])
        add(f'ln1b{l}', lp['ln1b'])
        add(f'w1{l}', lp['w1'])
        add(f'b1{l}', lp['b1'])
        add(f'w2{l}', lp['w2'])
        add(f'b2{l}', lp['b2'])
        add(f'ln2g{l}', lp['ln2g'])
        add(f'ln2b{l}', lp['ln2b'])

    add('cls_w1', params['cls_w1'])
    add('cls_b1', params['cls_b1'])
    add('cls_w2', params['cls_w2'])
    add('cls_b2', params['cls_b2'])

    index = {}
    off = 0
    for name, a in blocks:
        index[name] = (int(off), int(a.shape[0]), int(a.shape[1]))
        off += -(-a.shape[0] // 8) * 8                              # 8-row align
    total_rows = max(8, -(-off // 8) * 8)
    slab = np.zeros((total_rows, 128), np.float32)
    for name, a in blocks:
        o = index[name][0]
        slab[o:o + a.shape[0], :a.shape[1]] = a
    return jnp.asarray(slab), index


# --------------------------------------------------------------------------- #
# Deterministic parameter init (synthetic; shapes implied by the module)
# --------------------------------------------------------------------------- #
def init_params(key, cfg):
    F, S, P = cfg['feature_dim'], cfg['seq_len'], cfg['projection_dim']
    D, L, FF = P, cfg['num_layers'], cfg['d_ff']
    CH, C = cfg['classifier_hidden_dim'], cfg['num_classes']

    kit = iter(jax.random.split(key, 128))

    def w(shape, fan_in):
        return jax.random.normal(next(kit), shape, jnp.float32) / math.sqrt(fan_in)

    p = {}
    for m in ('hr', 'gsr', 'motion'):
        p[f'{m}_convw'] = w((3, F), 3.0)                # Conv1d(1, F, k=3) weights
        p[f'{m}_convb'] = jnp.zeros((F,), jnp.float32)
    p['projw'] = w((3 * F, P), 3 * F)
    p['projb'] = jnp.zeros((P,), jnp.float32)

    # sinusoidal positional encoding (interleaved sin/cos)
    pos = jnp.arange(S, dtype=jnp.float32)[:, None]
    div = jnp.exp(jnp.arange(0, P, 2, dtype=jnp.float32) * (-math.log(10000.0) / P))
    p['pos'] = jnp.stack([jnp.sin(pos * div), jnp.cos(pos * div)], axis=-1).reshape(S, P)

    layers = []
    for _ in range(L):
        layers.append(dict(
            wq=w((D, D), D), bq=jnp.zeros((D,), jnp.float32),
            wk=w((D, D), D), bk=jnp.zeros((D,), jnp.float32),
            wv=w((D, D), D), bv=jnp.zeros((D,), jnp.float32),
            wo=w((D, D), D), bo=jnp.zeros((D,), jnp.float32),
            ln1g=jnp.ones((D,), jnp.float32), ln1b=jnp.zeros((D,), jnp.float32),
            w1=w((D, FF), D), b1=jnp.zeros((FF,), jnp.float32),
            w2=w((FF, D), FF), b2=jnp.zeros((D,), jnp.float32),
            ln2g=jnp.ones((D,), jnp.float32), ln2b=jnp.zeros((D,), jnp.float32),
        ))
    p['layers'] = layers

    p['cls_w1'] = w((D, CH), D)
    p['cls_b1'] = jnp.zeros((CH,), jnp.float32)
    p['cls_w2'] = w((CH, C), CH)
    p['cls_b2'] = jnp.zeros((C,), jnp.float32)
    return p


# --------------------------------------------------------------------------- #
# Pure-JAX reference (used only to validate the fused kernel numerically)
# --------------------------------------------------------------------------- #
def reference_forward(params, hr, gsr, motion, cfg):
    H = cfg['num_heads']
    B, _, S = hr.shape

    def conv1d_k3(x, w, b):                        # x [B,S], w [3,F], b [F]
        xp = jnp.pad(x, ((0, 0), (1, 1)))
        return (xp[:, :-2, None] * w[0] + xp[:, 1:-1, None] * w[1]
                + xp[:, 2:, None] * w[2] + b)

    feats = jnp.concatenate(
        [conv1d_k3(hr[:, 0], params['hr_convw'], params['hr_convb']),
         conv1d_k3(gsr[:, 0], params['gsr_convw'], params['gsr_convb']),
         conv1d_k3(motion[:, 0], params['motion_convw'], params['motion_convb'])],
        axis=-1)
    x = jnp.einsum('bsf,fp->bsp', feats, params['projw']) + params['projb']
    x = x + params['pos'][None]

    def layer_norm(y, g, b):
        mu = jnp.mean(y, axis=-1, keepdims=True)
        var = jnp.mean((y - mu) ** 2, axis=-1, keepdims=True)
        return (y - mu) * jax.lax.rsqrt(var + 1e-5) * g + b

    D = x.shape[-1]
    dh = D // H
    for lp in params['layers']:
        q = x @ lp['wq'] + lp['bq']
        k = x @ lp['wk'] + lp['bk']
        v = x @ lp['wv'] + lp['bv']

        def split(t):
            return t.reshape(B, S, H, dh).transpose(0, 2, 1, 3)

        qh, kh, vh = split(q), split(k), split(v)
        s = jnp.einsum('bhqd,bhkd->bhqk', qh, kh) / math.sqrt(dh)
        p = jax.nn.softmax(s, axis=-1)
        ctx = jnp.einsum('bhqk,bhkd->bhqd', p, vh)
        ctx = ctx.transpose(0, 2, 1, 3).reshape(B, S, D)
        attn = ctx @ lp['wo'] + lp['bo']

        h1 = layer_norm(x + attn, lp['ln1g'], lp['ln1b'])
        ffn = jnp.maximum(h1 @ lp['w1'] + lp['b1'], 0.0) @ lp['w2'] + lp['b2']
        x = layer_norm(h1 + ffn, lp['ln2g'], lp['ln2b'])

    pooled = jnp.mean(x, axis=1)
    hid = jnp.maximum(pooled @ params['cls_w1'] + params['cls_b1'], 0.0)
    return hid @ params['cls_w2'] + params['cls_b2']


# --------------------------------------------------------------------------- #
if __name__ == "__main__":
    # TODO(synk): only the use_projection=True embedding branch is implemented.
    key = jax.random.PRNGKey(0)
    k1, k2, k3 = jax.random.split(key, 3)
    B, S = BATCH, CONFIG['seq_len']

    hr = jax.random.normal(k1, (B, 1, S), jnp.float32)      # [batch, 1, seq_len]
    gsr = jax.random.normal(k2, (B, 1, S), jnp.float32)
    motion = jax.random.normal(k3, (B, 1, S), jnp.float32)

    params = init_params(jax.random.PRNGKey(42), CONFIG)
    slab, index = pack_params(params, CONFIG)

    logits = multimodal_transformer_forward(slab, index, hr, gsr, motion, CONFIG)
    logits = jax.block_until_ready(logits)

    assert logits.shape == (B, CONFIG['num_classes'])
    assert bool(jnp.all(jnp.isfinite(logits)))

    ref = reference_forward(params, hr, gsr, motion, CONFIG)
    max_err = float(jnp.max(jnp.abs(logits - ref)))
    assert bool(jnp.allclose(logits, ref, atol=1e-2, rtol=1e-2)), f"max err {max_err}"

    print("KERNEL_OK")
</pallas_src>

<mosaic_0001>
module attributes {stable_mosaic.version = 11 : i64} {
  func.func @fused_forward_kernel(%arg0: memref<6x16xf32, #tpu.memory_space<vmem>>, %arg1: memref<592x128xf32, #tpu.memory_space<vmem>>, %arg2: memref<2x4xf32, #tpu.memory_space<vmem>>) attributes {dimension_semantics = [], scalar_prefetch = 0 : i64, scratch_operands = 0 : i64, tpu.core_type = #tpu.core_type<tc>} {
    %c0 = arith.constant 0 : index
    %c0_0 = arith.constant 0 : index
    %0 = vector.load %arg0[%c0, %c0_0] : memref<6x16xf32, #tpu.memory_space<vmem>>, vector<6x16xf32>
    %c0_1 = arith.constant 0 : index
    %c0_2 = arith.constant 0 : index
    %1 = vector.load %arg1[%c0_1, %c0_2] : memref<592x128xf32, #tpu.memory_space<vmem>>, vector<16x16xf32>
    %cst = arith.constant dense<0.000000e+00> : vector<6x16xf32>
    %2 = tpu.matmul %0, %1, %cst {dimension_numbers = #tpu.dot_dimension_numbers<[1], [0], [0], [1], [0, 0, 1, 1], [], []>} : vector<6x16xf32>, vector<16x16xf32>, vector<6x16xf32> -> vector<6x16xf32>
    %c16 = arith.constant 16 : index
    %c0_3 = arith.constant 0 : index
    %3 = vector.load %arg1[%c16, %c0_3] : memref<592x128xf32, #tpu.memory_space<vmem>>, vector<16x16xf32>
    %cst_4 = arith.constant dense<0.000000e+00> : vector<6x16xf32>
    %4 = tpu.matmul %0, %3, %cst_4 {dimension_numbers = #tpu.dot_dimension_numbers<[1], [0], [0], [1], [0, 0, 1, 1], [], []>} : vector<6x16xf32>, vector<16x16xf32>, vector<6x16xf32> -> vector<6x16xf32>
    %c32 = arith.constant 32 : index
    %c0_5 = arith.constant 0 : index
    %5 = vector.load %arg1[%c32, %c0_5] : memref<592x128xf32, #tpu.memory_space<vmem>>, vector<9x32xf32>
    %6 = vector.extract_strided_slice %2 {offsets = [0, 0], sizes = [2, 16], strides = [1, 1]} : vector<6x16xf32> to vector<2x16xf32>
    %7 = vector.shape_cast %6 : vector<2x16xf32> to vector<2x16x1xf32>
    %8 = vector.extract_strided_slice %5 {offsets = [0, 0], sizes = [1, 32], strides = [1, 1]} : vector<9x32xf32> to vector<1x32xf32>
    %9 = vector.shape_cast %8 : vector<1x32xf32> to vector<32xf32>
    %10 = vector.shape_cast %9 : vector<32xf32> to vector<1x1x32xf32>
    %11 = vector.broadcast %7 : vector<2x16x1xf32> to vector<2x16x32xf32>
    %12 = vector.broadcast %10 : vector<1x1x32xf32> to vector<2x16x32xf32>
    %13 = arith.mulf %11, %12 : vector<2x16x32xf32>
    %14 = vector.extract_strided_slice %0 {offsets = [0, 0], sizes = [2, 16], strides = [1, 1]} : vector<6x16xf32> to vector<2x16xf32>
    %15 = vector.shape_cast %14 : vector<2x16xf32> to vector<2x16x1xf32>
    %16 = vector.extract_strided_slice %5 {offsets = [1, 0], sizes = [1, 32], strides = [1, 1]} : vector<9x32xf32> to vector<1x32xf32>
    %17 = vector.shape_cast %16 : vector<1x32xf32> to vector<32xf32>
    %18 = vector.shape_cast %17 : vector<32xf32> to vector<1x1x32xf32>
    %19 = vector.broadcast %15 : vector<2x16x1xf32> to vector<2x16x32xf32>
    %20 = vector.broadcast %18 : vector<1x1x32xf32> to vector<2x16x32xf32>
    %21 = arith.mulf %19, %20 : vector<2x16x32xf32>
    %22 = arith.addf %13, %21 : vector<2x16x32xf32>
    %23 = vector.extract_strided_slice %4 {offsets = [0, 0], sizes = [2, 16], strides = [1, 1]} : vector<6x16xf32> to vector<2x16xf32>
    %24 = vector.shape_cast %23 : vector<2x16xf32> to vector<2x16x1xf32>
    %25 = vector.extract_strided_slice %5 {offsets = [2, 0], sizes = [1, 32], strides = [1, 1]} : vector<9x32xf32> to vector<1x32xf32>
    %26 = vector.shape_cast %25 : vector<1x32xf32> to vector<32xf32>
    %27 = vector.shape_cast %26 : vector<32xf32> to vector<1x1x32xf32>
    %28 = vector.broadcast %24 : vector<2x16x1xf32> to vector<2x16x32xf32>
    %29 = vector.broadcast %27 : vector<1x1x32xf32> to vector<2x16x32xf32>
    %30 = arith.mulf %28, %29 : vector<2x16x32xf32>
    %31 = arith.addf %22, %30 : vector<2x16x32xf32>
    %32 = vector.extract_strided_slice %2 {offsets = [2, 0], sizes = [2, 16], strides = [1, 1]} : vector<6x16xf32> to vector<2x16xf32>
    %33 = vector.shape_cast %32 : vector<2x16xf32> to vector<2x16x1xf32>
    %34 = vector.extract_strided_slice %5 {offsets = [3, 0], sizes = [1, 32], strides = [1, 1]} : vector<9x32xf32> to vector<1x32xf32>
    %35 = vector.shape_cast %34 : vector<1x32xf32> to vector<32xf32>
    %36 = vector.shape_cast %35 : vector<32xf32> to vector<1x1x32xf32>
    %37 = vector.broadcast %33 : vector<2x16x1xf32> to vector<2x16x32xf32>
    %38 = vector.broadcast %36 : vector<1x1x32xf32> to vector<2x16x32xf32>
    %39 = arith.mulf %37, %38 : vector<2x16x32xf32>
    %40 = arith.addf %31, %39 : vector<2x16x32xf32>
    %41 = vector.extract_strided_slice %0 {offsets = [2, 0], sizes = [2, 16], strides = [1, 1]} : vector<6x16xf32> to vector<2x16xf32>
    %42 = vector.shape_cast %41 : vector<2x16xf32> to vector<2x16x1xf32>
    %43 = vector.extract_strided_slice %5 {offsets = [4, 0], sizes = [1, 32], strides = [1, 1]} : vector<9x32xf32> to vector<1x32xf32>
    %44 = vector.shape_cast %43 : vector<1x32xf32> to vector<32xf32>
    %45 = vector.shape_cast %44 : vector<32xf32> to vector<1x1x32xf32>
    %46 = vector.broadcast %42 : vector<2x16x1xf32> to vector<2x16x32xf32>
    %47 = vector.broadcast %45 : vector<1x1x32xf32> to vector<2x16x32xf32>
    %48 = arith.mulf %46, %47 : vector<2x16x32xf32>
    %49 = arith.addf %40, %48 : vector<2x16x32xf32>
    %50 = vector.extract_strided_slice %4 {offsets = [2, 0], sizes = [2, 16], strides = [1, 1]} : vector<6x16xf32> to vector<2x16xf32>
    %51 = vector.shape_cast %50 : vector<2x16xf32> to vector<2x16x1xf32>
    %52 = vector.extract_strided_slice %5 {offsets = [5, 0], sizes = [1, 32], strides = [1, 1]} : vector<9x32xf32> to vector<1x32xf32>
    %53 = vector.shape_cast %52 : vector<1x32xf32> to vector<32xf32>
    %54 = vector.shape_cast %53 : vector<32xf32> to vector<1x1x32xf32>
    %55 = vector.broadcast %51 : vector<2x16x1xf32> to vector<2x16x32xf32>
    %56 = vector.broadcast %54 : vector<1x1x32xf32> to vector<2x16x32xf32>
    %57 = arith.mulf %55, %56 : vector<2x16x32xf32>
    %58 = arith.addf %49, %57 : vector<2x16x32xf32>
    %59 = vector.extract_strided_slice %2 {offsets = [4, 0], sizes = [2, 16], strides = [1, 1]} : vector<6x16xf32> to vector<2x16xf32>
    %60 = vector.shape_cast %59 : vector<2x16xf32> to vector<2x16x1xf32>
    %61 = vector.extract_strided_slice %5 {offsets = [6, 0], sizes = [1, 32], strides = [1, 1]} : vector<9x32xf32> to vector<1x32xf32>
    %62 = vector.shape_cast %61 : vector<1x32xf32> to vector<32xf32>
    %63 = vector.shape_cast %62 : vector<32xf32> to vector<1x1x32xf32>
    %64 = vector.broadcast %60 : vector<2x16x1xf32> to vector<2x16x32xf32>
    %65 = vector.broadcast %63 : vector<1x1x32xf32> to vector<2x16x32xf32>
    %66 = arith.mulf %64, %65 : vector<2x16x32xf32>
    %67 = arith.addf %58, %66 : vector<2x16x32xf32>
    %68 = vector.extract_strided_slice %0 {offsets = [4, 0], sizes = [2, 16], strides = [1, 1]} : vector<6x16xf32> to vector<2x16xf32>
    %69 = vector.shape_cast %68 : vector<2x16xf32> to vector<2x16x1xf32>
    %70 = vector.extract_strided_slice %5 {offsets = [7, 0], sizes = [1, 32], strides = [1, 1]} : vector<9x32xf32> to vector<1x32xf32>
    %71 = vector.shape_cast %70 : vector<1x32xf32> to vector<32xf32>
    %72 = vector.shape_cast %71 : vector<32xf32> to vector<1x1x32xf32>
    %73 = vector.broadcast %69 : vector<2x16x1xf32> to vector<2x16x32xf32>
    %74 = vector.broadcast %72 : vector<1x1x32xf32> to vector<2x16x32xf32>
    %75 = arith.mulf %73, %74 : vector<2x16x32xf32>
    %76 = arith.addf %67, %75 : vector<2x16x32xf32>
    %77 = vector.extract_strided_slice %4 {offsets = [4, 0], sizes = [2, 16], strides = [1, 1]} : vector<6x16xf32> to vector<2x16xf32>
    %78 = vector.shape_cast %77 : vector<2x16xf32> to vector<2x16x1xf32>
    %79 = vector.extract_strided_slice %5 {offsets = [8, 0], sizes = [1, 32], strides = [1, 1]} : vector<9x32xf32> to vector<1x32xf32>
    %80 = vector.shape_cast %79 : vector<1x32xf32> to vector<32xf32>
    %81 = vector.shape_cast %80 : vector<32xf32> to vector<1x1x32xf32>
    %82 = vector.broadcast %78 : vector<2x16x1xf32> to vector<2x16x32xf32>
    %83 = vector.broadcast %81 : vector<1x1x32xf32> to vector<2x16x32xf32>
    %84 = arith.mulf %82, %83 : vector<2x16x32xf32>
    %85 = arith.addf %76, %84 : vector<2x16x32xf32>
    %c48 = arith.constant 48 : index
    %c0_6 = arith.constant 0 : index
    %86 = vector.load %arg1[%c48, %c0_6] : memref<592x128xf32, #tpu.memory_space<vmem>>, vector<16x32xf32>
    %87 = vector.shape_cast %86 : vector<16x32xf32> to vector<1x16x32xf32>
    %88 = vector.broadcast %87 : vector<1x16x32xf32> to vector<2x16x32xf32>
    %89 = arith.addf %85, %88 : vector<2x16x32xf32>
    %c64 = arith.constant 64 : index
    %c0_7 = arith.constant 0 : index
    %90 = vector.load %arg1[%c64, %c0_7] : memref<592x128xf32, #tpu.memory_space<vmem>>, vector<32x96xf32>
    %c96 = arith.constant 96 : index
    %c0_8 = arith.constant 0 : index
    %91 = vector.load %arg1[%c96, %c0_8] : memref<592x128xf32, #tpu.memory_space<vmem>>, vector<1x96xf32>
    %92 = vector.shape_cast %91 : vector<1x96xf32> to vector<96xf32>
    "tpu.trace_start"() <{level = 10 : i32, message = "bsd,de->bse"}> : () -> ()
    %cst_9 = arith.constant dense<0.000000e+00> : vector<2x16x96xf32>
    %93 = tpu.matmul %89, %90, %cst_9 {dimension_numbers = #tpu.dot_dimension_numbers<[2], [0], [0, 1], [1], [0, 0, 0, 1, 1, 1], [], []>} : vector<2x16x32xf32>, vector<32x96xf32>, vector<2x16x96xf32> -> vector<2x16x96xf32>
    "tpu.trace_stop"() : () -> ()
    %94 = vector.shape_cast %92 : vector<96xf32> to vector<1x1x96xf32>
    %95 = vector.broadcast %94 : vector<1x1x96xf32> to vector<2x16x96xf32>
    %96 = arith.addf %93, %95 : vector<2x16x96xf32>
    %97 = vector.extract_strided_slice %96 {offsets = [0, 0, 0], sizes = [2, 16, 8], strides = [1, 1, 1]} : vector<2x16x96xf32> to vector<2x16x8xf32>
    %98 = vector.extract_strided_slice %96 {offsets = [0, 0, 32], sizes = [2, 16, 8], strides = [1, 1, 1]} : vector<2x16x96xf32> to vector<2x16x8xf32>
    %99 = vector.extract_strided_slice %96 {offsets = [0, 0, 64], sizes = [2, 16, 8], strides = [1, 1, 1]} : vector<2x16x96xf32> to vector<2x16x8xf32>
    "tpu.trace_start"() <{level = 10 : i32, message = "bqd,bkd->bqk"}> : () -> ()
    %cst_10 = arith.constant dense<0.000000e+00> : vector<2x16x16xf32>
    %100 = tpu.matmul %97, %98, %cst_10 {dimension_numbers = #tpu.dot_dimension_numbers<[2], [2], [1], [1], [0, 0, 0, 1, 1, 1], [0], [0]>} : vector<2x16x8xf32>, vector<2x16x8xf32>, vector<2x16x16xf32> -> vector<2x16x16xf32>
    "tpu.trace_stop"() : () -> ()
    %101 = vector.extract_strided_slice %96 {offsets = [0, 0, 8], sizes = [2, 16, 8], strides = [1, 1, 1]} : vector<2x16x96xf32> to vector<2x16x8xf32>
    %102 = vector.extract_strided_slice %96 {offsets = [0, 0, 40], sizes = [2, 16, 8], strides = [1, 1, 1]} : vector<2x16x96xf32> to vector<2x16x8xf32>
    %103 = vector.extract_strided_slice %96 {offsets = [0, 0, 72], sizes = [2, 16, 8], strides = [1, 1, 1]} : vector<2x16x96xf32> to vector<2x16x8xf32>
    "tpu.trace_start"() <{level = 10 : i32, message = "bqd,bkd->bqk"}> : () -> ()
    %cst_11 = arith.constant dense<0.000000e+00> : vector<2x16x16xf32>
    %104 = tpu.matmul %101, %102, %cst_11 {dimension_numbers = #tpu.dot_dimension_numbers<[2], [2], [1], [1], [0, 0, 0, 1, 1, 1], [0], [0]>} : vector<2x16x8xf32>, vector<2x16x8xf32>, vector<2x16x16xf32> -> vector<2x16x16xf32>
    "tpu.trace_stop"() : () -> ()
    %105 = vector.extract_strided_slice %96 {offsets = [0, 0, 16], sizes = [2, 16, 8], strides = [1, 1, 1]} : vector<2x16x96xf32> to vector<2x16x8xf32>
    %106 = vector.extract_strided_slice %96 {offsets = [0, 0, 48], sizes = [2, 16, 8], strides = [1, 1, 1]} : vector<2x16x96xf32> to vector<2x16x8xf32>
    %107 = vector.extract_strided_slice %96 {offsets = [0, 0, 80], sizes = [2, 16, 8], strides = [1, 1, 1]} : vector<2x16x96xf32> to vector<2x16x8xf32>
    "tpu.trace_start"() <{level = 10 : i32, message = "bqd,bkd->bqk"}> : () -> ()
    %cst_12 = arith.constant dense<0.000000e+00> : vector<2x16x16xf32>
    %108 = tpu.matmul %105, %106, %cst_12 {dimension_numbers = #tpu.dot_dimension_numbers<[2], [2], [1], [1], [0, 0, 0, 1, 1, 1], [0], [0]>} : vector<2x16x8xf32>, vector<2x16x8xf32>, vector<2x16x16xf32> -> vector<2x16x16xf32>
    "tpu.trace_stop"() : () -> ()
    %109 = vector.extract_strided_slice %96 {offsets = [0, 0, 24], sizes = [2, 16, 8], strides = [1, 1, 1]} : vector<2x16x96xf32> to vector<2x16x8xf32>
    %110 = vector.extract_strided_slice %96 {offsets = [0, 0, 56], sizes = [2, 16, 8], strides = [1, 1, 1]} : vector<2x16x96xf32> to vector<2x16x8xf32>
    %111 = vector.extract_strided_slice %96 {offsets = [0, 0, 88], sizes = [2, 16, 8], strides = [1, 1, 1]} : vector<2x16x96xf32> to vector<2x16x8xf32>
    "tpu.trace_start"() <{level = 10 : i32, message = "bqd,bkd->bqk"}> : () -> ()
    %cst_13 = arith.constant dense<0.000000e+00> : vector<2x16x16xf32>
    %112 = tpu.matmul %109, %110, %cst_13 {dimension_numbers = #tpu.dot_dimension_numbers<[2], [2], [1], [1], [0, 0, 0, 1, 1, 1], [0], [0]>} : vector<2x16x8xf32>, vector<2x16x8xf32>, vector<2x16x16xf32> -> vector<2x16x16xf32>
    "tpu.trace_stop"() : () -> ()
    %113 = tpu.concatenate %100, %104, %108, %112 in 0 : vector<2x16x16xf32>, vector<2x16x16xf32>, vector<2x16x16xf32>, vector<2x16x16xf32> -> vector<8x16x16xf32>
    %cst_14 = arith.constant dense<0xFF800000> : vector<8x16xf32>
    %114 = vector.multi_reduction <maximumf>, %113, %cst_14 [2] : vector<8x16x16xf32> to vector<8x16xf32>
    %115 = vector.shape_cast %114 : vector<8x16xf32> to vector<8x16x1xf32>
    %116 = vector.broadcast %115 : vector<8x16x1xf32> to vector<8x16x16xf32>
    %117 = arith.subf %113, %116 : vector<8x16x16xf32>
    %118 = math.exp %117 : vector<8x16x16xf32>
    %cst_15 = arith.constant dense<0.000000e+00> : vector<8x16xf32>
    %119 = vector.multi_reduction <add>, %118, %cst_15 [2] : vector<8x16x16xf32> to vector<8x16xf32>
    %120 = vector.shape_cast %119 : vector<8x16xf32> to vector<8x16x1xf32>
    %121 = tpu.reciprocal %120 {approx = true} : vector<8x16x1xf32> -> vector<8x16x1xf32>
    %122 = vector.broadcast %121 : vector<8x16x1xf32> to vector<8x16x16xf32>
    %123 = arith.mulf %118, %122 : vector<8x16x16xf32>
    %124 = tpu.concatenate %99, %103, %107, %111 in 0 : vector<2x16x8xf32>, vector<2x16x8xf32>, vector<2x16x8xf32>, vector<2x16x8xf32> -> vector<8x16x8xf32>
    "tpu.trace_start"() <{level = 10 : i32, message = "xqk,xkd->xqd"}> : () -> ()
    %cst_16 = arith.constant dense<0.000000e+00> : vector<8x16x8xf32>
    %125 = tpu.matmul %123, %124, %cst_16 {dimension_numbers = #tpu.dot_dimension_numbers<[2], [1], [1], [2], [0, 0, 0, 1, 1, 2], [0], [0]>} : vector<8x16x16xf32>, vector<8x16x8xf32>, vector<8x16x8xf32> -> vector<8x16x8xf32>
    "tpu.trace_stop"() : () -> ()
    %126 = vector.extract_strided_slice %125 {offsets = [0, 0, 0], sizes = [2, 16, 8], strides = [1, 1, 1]} : vector<8x16x8xf32> to vector<2x16x8xf32>
    %127 = vector.extract_strided_slice %125 {offsets = [2, 0, 0], sizes = [2, 16, 8], strides = [1, 1, 1]} : vector<8x16x8xf32> to vector<2x16x8xf32>
    %128 = vector.extract_strided_slice %125 {offsets = [4, 0, 0], sizes = [2, 16, 8], strides = [1, 1, 1]} : vector<8x16x8xf32> to vector<2x16x8xf32>
    %129 = vector.extract_strided_slice %125 {offsets = [6, 0, 0], sizes = [2, 16, 8], strides = [1, 1, 1]} : vector<8x16x8xf32> to vector<2x16x8xf32>
    %130 = tpu.concatenate %126, %127, %128, %129 in 2 : vector<2x16x8xf32>, vector<2x16x8xf32>, vector<2x16x8xf32>, vector<2x16x8xf32> -> vector<2x16x32xf32>
    %c104 = arith.constant 104 : index
    %c0_17 = arith.constant 0 : index
    %131 = vector.load %arg1[%c104, %c0_17] : memref<592x128xf32, #tpu.memory_space<vmem>>, vector<32x32xf32>
    %c136 = arith.constant 136 : index
    %c0_18 = arith.constant 0 : index
    %132 = vector.load %arg1[%c136, %c0_18] : memref<592x128xf32, #tpu.memory_space<vmem>>, vector<1x32xf32>
    %133 = vector.shape_cast %132 : vector<1x32xf32> to vector<32xf32>
    "tpu.trace_start"() <{level = 10 : i32, message = "bsd,de->bse"}> : () -> ()
    %cst_19 = arith.constant dense<0.000000e+00> : vector<2x16x32xf32>
    %134 = tpu.matmul %130, %131, %cst_19 {dimension_numbers = #tpu.dot_dimension_numbers<[2], [0], [0, 1], [1], [0, 0, 0, 1, 1, 1], [], []>} : vector<2x16x32xf32>, vector<32x32xf32>, vector<2x16x32xf32> -> vector<2x16x32xf32>
    "tpu.trace_stop"() : () -> ()
    %135 = vector.shape_cast %133 : vector<32xf32> to vector<1x1x32xf32>
    %136 = vector.broadcast %135 : vector<1x1x32xf32> to vector<2x16x32xf32>
    %137 = arith.addf %134, %136 : vector<2x16x32xf32>
    %138 = arith.addf %89, %137 : vector<2x16x32xf32>
    %c144 = arith.constant 144 : index
    %c0_20 = arith.constant 0 : index
    %139 = vector.load %arg1[%c144, %c0_20] : memref<592x128xf32, #tpu.memory_space<vmem>>, vector<1x32xf32>
    %140 = vector.shape_cast %139 : vector<1x32xf32> to vector<32xf32>
    %c152 = arith.constant 152 : index
    %c0_21 = arith.constant 0 : index
    %141 = vector.load %arg1[%c152, %c0_21] : memref<592x128xf32, #tpu.memory_space<vmem>>, vector<1x32xf32>
    %142 = vector.shape_cast %141 : vector<1x32xf32> to vector<32xf32>
    %cst_22 = arith.constant dense<0.000000e+00> : vector<2x16xf32>
    %143 = vector.multi_reduction <add>, %138, %cst_22 [2] : vector<2x16x32xf32> to vector<2x16xf32>
    %144 = vector.shape_cast %143 : vector<2x16xf32> to vector<2x16x1xf32>
    %cst_23 = arith.constant 3.200000e+01 : f32
    %145 = vector.broadcast %cst_23 : f32 to vector<2x16x1xf32>
    %146 = arith.divf %144, %145 : vector<2x16x1xf32>
    %147 = vector.broadcast %146 : vector<2x16x1xf32> to vector<2x16x32xf32>
    %148 = arith.subf %138, %147 : vector<2x16x32xf32>
    %149 = arith.mulf %148, %148 : vector<2x16x32xf32>
    %cst_24 = arith.constant dense<0.000000e+00> : vector<2x16xf32>
    %150 = vector.multi_reduction <add>, %149, %cst_24 [2] : vector<2x16x32xf32> to vector<2x16xf32>
    %151 = vector.shape_cast %150 : vector<2x16xf32> to vector<2x16x1xf32>
    %cst_25 = arith.constant 3.200000e+01 : f32
    %152 = vector.broadcast %cst_25 : f32 to vector<2x16x1xf32>
    %153 = arith.divf %151, %152 : vector<2x16x1xf32>
    %154 = vector.broadcast %146 : vector<2x16x1xf32> to vector<2x16x32xf32>
    %155 = arith.subf %138, %154 : vector<2x16x32xf32>
    %cst_26 = arith.constant 9.99999974E-6 : f32
    %156 = vector.broadcast %cst_26 : f32 to vector<2x16x1xf32>
    %157 = arith.addf %153, %156 : vector<2x16x1xf32>
    %158 = math.rsqrt %157 : vector<2x16x1xf32>
    %159 = vector.broadcast %158 : vector<2x16x1xf32> to vector<2x16x32xf32>
    %160 = arith.mulf %155, %159 : vector<2x16x32xf32>
    %161 = vector.shape_cast %140 : vector<32xf32> to vector<1x1x32xf32>
    %162 = vector.broadcast %161 : vector<1x1x32xf32> to vector<2x16x32xf32>
    %163 = arith.mulf %160, %162 : vector<2x16x32xf32>
    %164 = vector.shape_cast %142 : vector<32xf32> to vector<1x1x32xf32>
    %165 = vector.broadcast %164 : vector<1x1x32xf32> to vector<2x16x32xf32>
    %166 = arith.addf %163, %165 : vector<2x16x32xf32>
    %c160 = arith.constant 160 : index
    %c0_27 = arith.constant 0 : index
    %167 = vector.load %arg1[%c160, %c0_27] : memref<592x128xf32, #tpu.memory_space<vmem>>, vector<32x64xf32>
    %c192 = arith.constant 192 : index
    %c0_28 = arith.constant 0 : index
    %168 = vector.load %arg1[%c192, %c0_28] : memref<592x128xf32, #tpu.memory_space<vmem>>, vector<1x64xf32>
    %169 = vector.shape_cast %168 : vector<1x64xf32> to vector<64xf32>
    "tpu.trace_start"() <{level = 10 : i32, message = "bsd,de->bse"}> : () -> ()
    %cst_29 = arith.constant dense<0.000000e+00> : vector<2x16x64xf32>
    %170 = tpu.matmul %166, %167, %cst_29 {dimension_numbers = #tpu.dot_dimension_numbers<[2], [0], [0, 1], [1], [0, 0, 0, 1, 1, 1], [], []>} : vector<2x16x32xf32>, vector<32x64xf32>, vector<2x16x64xf32> -> vector<2x16x64xf32>
    "tpu.trace_stop"() : () -> ()
    %171 = vector.shape_cast %169 : vector<64xf32> to vector<1x1x64xf32>
    %172 = vector.broadcast %171 : vector<1x1x64xf32> to vector<2x16x64xf32>
    %173 = arith.addf %170, %172 : vector<2x16x64xf32>
    %cst_30 = arith.constant 0.000000e+00 : f32
    %174 = vector.broadcast %cst_30 : f32 to vector<2x16x64xf32>
    %175 = arith.maximumf %173, %174 : vector<2x16x64xf32>
    %c200 = arith.constant 200 : index
    %c0_31 = arith.constant 0 : index
    %176 = vector.load %arg1[%c200, %c0_31] : memref<592x128xf32, #tpu.memory_space<vmem>>, vector<64x32xf32>
    %c264 = arith.constant 264 : index
    %c0_32 = arith.constant 0 : index
    %177 = vector.load %arg1[%c264, %c0_32] : memref<592x128xf32, #tpu.memory_space<vmem>>, vector<1x32xf32>
    %178 = vector.shape_cast %177 : vector<1x32xf32> to vector<32xf32>
    "tpu.trace_start"() <{level = 10 : i32, message = "bsd,de->bse"}> : () -> ()
    %cst_33 = arith.constant dense<0.000000e+00> : vector<2x16x32xf32>
    %179 = tpu.matmul %175, %176, %cst_33 {dimension_numbers = #tpu.dot_dimension_numbers<[2], [0], [0, 1], [1], [0, 0, 0, 1, 1, 1], [], []>} : vector<2x16x64xf32>, vector<64x32xf32>, vector<2x16x32xf32> -> vector<2x16x32xf32>
    "tpu.trace_stop"() : () -> ()
    %180 = vector.shape_cast %178 : vector<32xf32> to vector<1x1x32xf32>
    %181 = vector.broadcast %180 : vector<1x1x32xf32> to vector<2x16x32xf32>
    %182 = arith.addf %179, %181 : vector<2x16x32xf32>
    %183 = arith.addf %166, %182 : vector<2x16x32xf32>
    %c272 = arith.constant 272 : index
    %c0_34 = arith.constant 0 : index
    %184 = vector.load %arg1[%c272, %c0_34] : memref<592x128xf32, #tpu.memory_space<vmem>>, vector<1x32xf32>
    %185 = vector.shape_cast %184 : vector<1x32xf32> to vector<32xf32>
    %c280 = arith.constant 280 : index
    %c0_35 = arith.constant 0 : index
    %186 = vector.load %arg1[%c280, %c0_35] : memref<592x128xf32, #tpu.memory_space<vmem>>, vector<1x32xf32>
    %187 = vector.shape_cast %186 : vector<1x32xf32> to vector<32xf32>
    %cst_36 = arith.constant dense<0.000000e+00> : vector<2x16xf32>
    %188 = vector.multi_reduction <add>, %183, %cst_36 [2] : vector<2x16x32xf32> to vector<2x16xf32>
    %189 = vector.shape_cast %188 : vector<2x16xf32> to vector<2x16x1xf32>
    %cst_37 = arith.constant 3.200000e+01 : f32
    %190 = vector.broadcast %cst_37 : f32 to vector<2x16x1xf32>
    %191 = arith.divf %189, %190 : vector<2x16x1xf32>
    %192 = vector.broadcast %191 : vector<2x16x1xf32> to vector<2x16x32xf32>
    %193 = arith.subf %183, %192 : vector<2x16x32xf32>
    %194 = arith.mulf %193, %193 : vector<2x16x32xf32>
    %cst_38 = arith.constant dense<0.000000e+00> : vector<2x16xf32>
    %195 = vector.multi_reduction <add>, %194, %cst_38 [2] : vector<2x16x32xf32> to vector<2x16xf32>
    %196 = vector.shape_cast %195 : vector<2x16xf32> to vector<2x16x1xf32>
    %cst_39 = arith.constant 3.200000e+01 : f32
    %197 = vector.broadcast %cst_39 : f32 to vector<2x16x1xf32>
    %198 = arith.divf %196, %197 : vector<2x16x1xf32>
    %199 = vector.broadcast %191 : vector<2x16x1xf32> to vector<2x16x32xf32>
    %200 = arith.subf %183, %199 : vector<2x16x32xf32>
    %cst_40 = arith.constant 9.99999974E-6 : f32
    %201 = vector.broadcast %cst_40 : f32 to vector<2x16x1xf32>
    %202 = arith.addf %198, %201 : vector<2x16x1xf32>
    %203 = math.rsqrt %202 : vector<2x16x1xf32>
    %204 = vector.broadcast %203 : vector<2x16x1xf32> to vector<2x16x32xf32>
    %205 = arith.mulf %200, %204 : vector<2x16x32xf32>
    %206 = vector.shape_cast %185 : vector<32xf32> to vector<1x1x32xf32>
    %207 = vector.broadcast %206 : vector<1x1x32xf32> to vector<2x16x32xf32>
    %208 = arith.mulf %205, %207 : vector<2x16x32xf32>
    %209 = vector.shape_cast %187 : vector<32xf32> to vector<1x1x32xf32>
    %210 = vector.broadcast %209 : vector<1x1x32xf32> to vector<2x16x32xf32>
    %211 = arith.addf %208, %210 : vector<2x16x32xf32>
    %c288 = arith.constant 288 : index
    %c0_41 = arith.constant 0 : index
    %212 = vector.load %arg1[%c288, %c0_41] : memref<592x128xf32, #tpu.memory_space<vmem>>, vector<32x96xf32>
    %c320 = arith.constant 320 : index
    %c0_42 = arith.constant 0 : index
    %213 = vector.load %arg1[%c320, %c0_42] : memref<592x128xf32, #tpu.memory_space<vmem>>, vector<1x96xf32>
    %214 = vector.shape_cast %213 : vector<1x96xf32> to vector<96xf32>
    "tpu.trace_start"() <{level = 10 : i32, message = "bsd,de->bse"}> : () -> ()
    %cst_43 = arith.constant dense<0.000000e+00> : vector<2x16x96xf32>
    %215 = tpu.matmul %211, %212, %cst_43 {dimension_numbers = #tpu.dot_dimension_numbers<[2], [0], [0, 1], [1], [0, 0, 0, 1, 1, 1], [], []>} : vector<2x16x32xf32>, vector<32x96xf32>, vector<2x16x96xf32> -> vector<2x16x96xf32>
    "tpu.trace_stop"() : () -> ()
    %216 = vector.shape_cast %214 : vector<96xf32> to vector<1x1x96xf32>
    %217 = vector.broadcast %216 : vector<1x1x96xf32> to vector<2x16x96xf32>
    %218 = arith.addf %215, %217 : vector<2x16x96xf32>
    %219 = vector.extract_strided_slice %218 {offsets = [0, 0, 0], sizes = [2, 16, 8], strides = [1, 1, 1]} : vector<2x16x96xf32> to vector<2x16x8xf32>
    %220 = vector.extract_strided_slice %218 {offsets = [0, 0, 32], sizes = [2, 16, 8], strides = [1, 1, 1]} : vector<2x16x96xf32> to vector<2x16x8xf32>
    %221 = vector.extract_strided_slice %218 {offsets = [0, 0, 64], sizes = [2, 16, 8], strides = [1, 1, 1]} : vector<2x16x96xf32> to vector<2x16x8xf32>
    "tpu.trace_start"() <{level = 10 : i32, message = "bqd,bkd->bqk"}> : () -> ()
    %cst_44 = arith.constant dense<0.000000e+00> : vector<2x16x16xf32>
    %222 = tpu.matmul %219, %220, %cst_44 {dimension_numbers = #tpu.dot_dimension_numbers<[2], [2], [1], [1], [0, 0, 0, 1, 1, 1], [0], [0]>} : vector<2x16x8xf32>, vector<2x16x8xf32>, vector<2x16x16xf32> -> vector<2x16x16xf32>
    "tpu.trace_stop"() : () -> ()
    %223 = vector.extract_strided_slice %218 {offsets = [0, 0, 8], sizes = [2, 16, 8], strides = [1, 1, 1]} : vector<2x16x96xf32> to vector<2x16x8xf32>
    %224 = vector.extract_strided_slice %218 {offsets = [0, 0, 40], sizes = [2, 16, 8], strides = [1, 1, 1]} : vector<2x16x96xf32> to vector<2x16x8xf32>
    %225 = vector.extract_strided_slice %218 {offsets = [0, 0, 72], sizes = [2, 16, 8], strides = [1, 1, 1]} : vector<2x16x96xf32> to vector<2x16x8xf32>
    "tpu.trace_start"() <{level = 10 : i32, message = "bqd,bkd->bqk"}> : () -> ()
    %cst_45 = arith.constant dense<0.000000e+00> : vector<2x16x16xf32>
    %226 = tpu.matmul %223, %224, %cst_45 {dimension_numbers = #tpu.dot_dimension_numbers<[2], [2], [1], [1], [0, 0, 0, 1, 1, 1], [0], [0]>} : vector<2x16x8xf32>, vector<2x16x8xf32>, vector<2x16x16xf32> -> vector<2x16x16xf32>
    "tpu.trace_stop"() : () -> ()
    %227 = vector.extract_strided_slice %218 {offsets = [0, 0, 16], sizes = [2, 16, 8], strides = [1, 1, 1]} : vector<2x16x96xf32> to vector<2x16x8xf32>
    %228 = vector.extract_strided_slice %218 {offsets = [0, 0, 48], sizes = [2, 16, 8], strides = [1, 1, 1]} : vector<2x16x96xf32> to vector<2x16x8xf32>
    %229 = vector.extract_strided_slice %218 {offsets = [0, 0, 80], sizes = [2, 16, 8], strides = [1, 1, 1]} : vector<2x16x96xf32> to vector<2x16x8xf32>
    "tpu.trace_start"() <{level = 10 : i32, message = "bqd,bkd->bqk"}> : () -> ()
    %cst_46 = arith.constant dense<0.000000e+00> : vector<2x16x16xf32>
    %230 = tpu.matmul %227, %228, %cst_46 {dimension_numbers = #tpu.dot_dimension_numbers<[2], [2], [1], [1], [0, 0, 0, 1, 1, 1], [0], [0]>} : vector<2x16x8xf32>, vector<2x16x8xf32>, vector<2x16x16xf32> -> vector<2x16x16xf32>
    "tpu.trace_stop"() : () -> ()
    %231 = vector.extract_strided_slice %218 {offsets = [0, 0, 24], sizes = [2, 16, 8], strides = [1, 1, 1]} : vector<2x16x96xf32> to vector<2x16x8xf32>
    %232 = vector.extract_strided_slice %218 {offsets = [0, 0, 56], sizes = [2, 16, 8], strides = [1, 1, 1]} : vector<2x16x96xf32> to vector<2x16x8xf32>
    %233 = vector.extract_strided_slice %218 {offsets = [0, 0, 88], sizes = [2, 16, 8], strides = [1, 1, 1]} : vector<2x16x96xf32> to vector<2x16x8xf32>
    "tpu.trace_start"() <{level = 10 : i32, message = "bqd,bkd->bqk"}> : () -> ()
    %cst_47 = arith.constant dense<0.000000e+00> : vector<2x16x16xf32>
    %234 = tpu.matmul %231, %232, %cst_47 {dimension_numbers = #tpu.dot_dimension_numbers<[2], [2], [1], [1], [0, 0, 0, 1, 1, 1], [0], [0]>} : vector<2x16x8xf32>, vector<2x16x8xf32>, vector<2x16x16xf32> -> vector<2x16x16xf32>
    "tpu.trace_stop"() : () -> ()
    %235 = tpu.concatenate %222, %226, %230, %234 in 0 : vector<2x16x16xf32>, vector<2x16x16xf32>, vector<2x16x16xf32>, vector<2x16x16xf32> -> vector<8x16x16xf32>
    %cst_48 = arith.constant dense<0xFF800000> : vector<8x16xf32>
    %236 = vector.multi_reduction <maximumf>, %235, %cst_48 [2] : vector<8x16x16xf32> to vector<8x16xf32>
    %237 = vector.shape_cast %236 : vector<8x16xf32> to vector<8x16x1xf32>
    %238 = vector.broadcast %237 : vector<8x16x1xf32> to vector<8x16x16xf32>
    %239 = arith.subf %235, %238 : vector<8x16x16xf32>
    %240 = math.exp %239 : vector<8x16x16xf32>
    %cst_49 = arith.constant dense<0.000000e+00> : vector<8x16xf32>
    %241 = vector.multi_reduction <add>, %240, %cst_49 [2] : vector<8x16x16xf32> to vector<8x16xf32>
    %242 = vector.shape_cast %241 : vector<8x16xf32> to vector<8x16x1xf32>
    %243 = tpu.reciprocal %242 {approx = true} : vector<8x16x1xf32> -> vector<8x16x1xf32>
    %244 = vector.broadcast %243 : vector<8x16x1xf32> to vector<8x16x16xf32>
    %245 = arith.mulf %240, %244 : vector<8x16x16xf32>
    %246 = tpu.concatenate %221, %225, %229, %233 in 0 : vector<2x16x8xf32>, vector<2x16x8xf32>, vector<2x16x8xf32>, vector<2x16x8xf32> -> vector<8x16x8xf32>
    "tpu.trace_start"() <{level = 10 : i32, message = "xqk,xkd->xqd"}> : () -> ()
    %cst_50 = arith.constant dense<0.000000e+00> : vector<8x16x8xf32>
    %247 = tpu.matmul %245, %246, %cst_50 {dimension_numbers = #tpu.dot_dimension_numbers<[2], [1], [1], [2], [0, 0, 0, 1, 1, 2], [0], [0]>} : vector<8x16x16xf32>, vector<8x16x8xf32>, vector<8x16x8xf32> -> vector<8x16x8xf32>
    "tpu.trace_stop"() : () -> ()
    %248 = vector.extract_strided_slice %247 {offsets = [0, 0, 0], sizes = [2, 16, 8], strides = [1, 1, 1]} : vector<8x16x8xf32> to vector<2x16x8xf32>
    %249 = vector.extract_strided_slice %247 {offsets = [2, 0, 0], sizes = [2, 16, 8], strides = [1, 1, 1]} : vector<8x16x8xf32> to vector<2x16x8xf32>
    %250 = vector.extract_strided_slice %247 {offsets = [4, 0, 0], sizes = [2, 16, 8], strides = [1, 1, 1]} : vector<8x16x8xf32> to vector<2x16x8xf32>
    %251 = vector.extract_strided_slice %247 {offsets = [6, 0, 0], sizes = [2, 16, 8], strides = [1, 1, 1]} : vector<8x16x8xf32> to vector<2x16x8xf32>
    %252 = tpu.concatenate %248, %249, %250, %251 in 2 : vector<2x16x8xf32>, vector<2x16x8xf32>, vector<2x16x8xf32>, vector<2x16x8xf32> -> vector<2x16x32xf32>
    %c328 = arith.constant 328 : index
    %c0_51 = arith.constant 0 : index
    %253 = vector.load %arg1[%c328, %c0_51] : memref<592x128xf32, #tpu.memory_space<vmem>>, vector<32x32xf32>
    %c360 = arith.constant 360 : index
    %c0_52 = arith.constant 0 : index
    %254 = vector.load %arg1[%c360, %c0_52] : memref<592x128xf32, #tpu.memory_space<vmem>>, vector<1x32xf32>
    %255 = vector.shape_cast %254 : vector<1x32xf32> to vector<32xf32>
    "tpu.trace_start"() <{level = 10 : i32, message = "bsd,de->bse"}> : () -> ()
    %cst_53 = arith.constant dense<0.000000e+00> : vector<2x16x32xf32>
    %256 = tpu.matmul %252, %253, %cst_53 {dimension_numbers = #tpu.dot_dimension_numbers<[2], [0], [0, 1], [1], [0, 0, 0, 1, 1, 1], [], []>} : vector<2x16x32xf32>, vector<32x32xf32>, vector<2x16x32xf32> -> vector<2x16x32xf32>
    "tpu.trace_stop"() : () -> ()
    %257 = vector.shape_cast %255 : vector<32xf32> to vector<1x1x32xf32>
    %258 = vector.broadcast %257 : vector<1x1x32xf32> to vector<2x16x32xf32>
    %259 = arith.addf %256, %258 : vector<2x16x32xf32>
    %260 = arith.addf %211, %259 : vector<2x16x32xf32>
    %c368 = arith.constant 368 : index
    %c0_54 = arith.constant 0 : index
    %261 = vector.load %arg1[%c368, %c0_54] : memref<592x128xf32, #tpu.memory_space<vmem>>, vector<1x32xf32>
    %262 = vector.shape_cast %261 : vector<1x32xf32> to vector<32xf32>
    %c376 = arith.constant 376 : index
    %c0_55 = arith.constant 0 : index
    %263 = vector.load %arg1[%c376, %c0_55] : memref<592x128xf32, #tpu.memory_space<vmem>>, vector<1x32xf32>
    %264 = vector.shape_cast %263 : vector<1x32xf32> to vector<32xf32>
    %cst_56 = arith.constant dense<0.000000e+00> : vector<2x16xf32>
    %265 = vector.multi_reduction <add>, %260, %cst_56 [2] : vector<2x16x32xf32> to vector<2x16xf32>
    %266 = vector.shape_cast %265 : vector<2x16xf32> to vector<2x16x1xf32>
    %cst_57 = arith.constant 3.200000e+01 : f32
    %267 = vector.broadcast %cst_57 : f32 to vector<2x16x1xf32>
    %268 = arith.divf %266, %267 : vector<2x16x1xf32>
    %269 = vector.broadcast %268 : vector<2x16x1xf32> to vector<2x16x32xf32>
    %270 = arith.subf %260, %269 : vector<2x16x32xf32>
    %271 = arith.mulf %270, %270 : vector<2x16x32xf32>
    %cst_58 = arith.constant dense<0.000000e+00> : vector<2x16xf32>
    %272 = vector.multi_reduction <add>, %271, %cst_58 [2] : vector<2x16x32xf32> to vector<2x16xf32>
    %273 = vector.shape_cast %272 : vector<2x16xf32> to vector<2x16x1xf32>
    %cst_59 = arith.constant 3.200000e+01 : f32
    %274 = vector.broadcast %cst_59 : f32 to vector<2x16x1xf32>
    %275 = arith.divf %273, %274 : vector<2x16x1xf32>
    %276 = vector.broadcast %268 : vector<2x16x1xf32> to vector<2x16x32xf32>
    %277 = arith.subf %260, %276 : vector<2x16x32xf32>
    %cst_60 = arith.constant 9.99999974E-6 : f32
    %278 = vector.broadcast %cst_60 : f32 to vector<2x16x1xf32>
    %279 = arith.addf %275, %278 : vector<2x16x1xf32>
    %280 = math.rsqrt %279 : vector<2x16x1xf32>
    %281 = vector.broadcast %280 : vector<2x16x1xf32> to vector<2x16x32xf32>
    %282 = arith.mulf %277, %281 : vector<2x16x32xf32>
    %283 = vector.shape_cast %262 : vector<32xf32> to vector<1x1x32xf32>
    %284 = vector.broadcast %283 : vector<1x1x32xf32> to vector<2x16x32xf32>
    %285 = arith.mulf %282, %284 : vector<2x16x32xf32>
    %286 = vector.shape_cast %264 : vector<32xf32> to vector<1x1x32xf32>
    %287 = vector.broadcast %286 : vector<1x1x32xf32> to vector<2x16x32xf32>
    %288 = arith.addf %285, %287 : vector<2x16x32xf32>
    %c384 = arith.constant 384 : index
    %c0_61 = arith.constant 0 : index
    %289 = vector.load %arg1[%c384, %c0_61] : memref<592x128xf32, #tpu.memory_space<vmem>>, vector<32x64xf32>
    %c416 = arith.constant 416 : index
    %c0_62 = arith.constant 0 : index
    %290 = vector.load %arg1[%c416, %c0_62] : memref<592x128xf32, #tpu.memory_space<vmem>>, vector<1x64xf32>
    %291 = vector.shape_cast %290 : vector<1x64xf32> to vector<64xf32>
    "tpu.trace_start"() <{level = 10 : i32, message = "bsd,de->bse"}> : () -> ()
    %cst_63 = arith.constant dense<0.000000e+00> : vector<2x16x64xf32>
    %292 = tpu.matmul %288, %289, %cst_63 {dimension_numbers = #tpu.dot_dimension_numbers<[2], [0], [0, 1], [1], [0, 0, 0, 1, 1, 1], [], []>} : vector<2x16x32xf32>, vector<32x64xf32>, vector<2x16x64xf32> -> vector<2x16x64xf32>
    "tpu.trace_stop"() : () -> ()
    %293 = vector.shape_cast %291 : vector<64xf32> to vector<1x1x64xf32>
    %294 = vector.broadcast %293 : vector<1x1x64xf32> to vector<2x16x64xf32>
    %295 = arith.addf %292, %294 : vector<2x16x64xf32>
    %cst_64 = arith.constant 0.000000e+00 : f32
    %296 = vector.broadcast %cst_64 : f32 to vector<2x16x64xf32>
    %297 = arith.maximumf %295, %296 : vector<2x16x64xf32>
    %c424 = arith.constant 424 : index
    %c0_65 = arith.constant 0 : index
    %298 = vector.load %arg1[%c424, %c0_65] : memref<592x128xf32, #tpu.memory_space<vmem>>, vector<64x32xf32>
    %c488 = arith.constant 488 : index
    %c0_66 = arith.constant 0 : index
    %299 = vector.load %arg1[%c488, %c0_66] : memref<592x128xf32, #tpu.memory_space<vmem>>, vector<1x32xf32>
    %300 = vector.shape_cast %299 : vector<1x32xf32> to vector<32xf32>
    "tpu.trace_start"() <{level = 10 : i32, message = "bsd,de->bse"}> : () -> ()
    %cst_67 = arith.constant dense<0.000000e+00> : vector<2x16x32xf32>
    %301 = tpu.matmul %297, %298, %cst_67 {dimension_numbers = #tpu.dot_dimension_numbers<[2], [0], [0, 1], [1], [0, 0, 0, 1, 1, 1], [], []>} : vector<2x16x64xf32>, vector<64x32xf32>, vector<2x16x32xf32> -> vector<2x16x32xf32>
    "tpu.trace_stop"() : () -> ()
    %302 = vector.shape_cast %300 : vector<32xf32> to vector<1x1x32xf32>
    %303 = vector.broadcast %302 : vector<1x1x32xf32> to vector<2x16x32xf32>
    %304 = arith.addf %301, %303 : vector<2x16x32xf32>
    %305 = arith.addf %288, %304 : vector<2x16x32xf32>
    %c496 = arith.constant 496 : index
    %c0_68 = arith.constant 0 : index
    %306 = vector.load %arg1[%c496, %c0_68] : memref<592x128xf32, #tpu.memory_space<vmem>>, vector<1x32xf32>
    %307 = vector.shape_cast %306 : vector<1x32xf32> to vector<32xf32>
    %c504 = arith.constant 504 : index
    %c0_69 = arith.constant 0 : index
    %308 = vector.load %arg1[%c504, %c0_69] : memref<592x128xf32, #tpu.memory_space<vmem>>, vector<1x32xf32>
    %309 = vector.shape_cast %308 : vector<1x32xf32> to vector<32xf32>
    %cst_70 = arith.constant dense<0.000000e+00> : vector<2x16xf32>
    %310 = vector.multi_reduction <add>, %305, %cst_70 [2] : vector<2x16x32xf32> to vector<2x16xf32>
    %311 = vector.shape_cast %310 : vector<2x16xf32> to vector<2x16x1xf32>
    %cst_71 = arith.constant 3.200000e+01 : f32
    %312 = vector.broadcast %cst_71 : f32 to vector<2x16x1xf32>
    %313 = arith.divf %311, %312 : vector<2x16x1xf32>
    %314 = vector.broadcast %313 : vector<2x16x1xf32> to vector<2x16x32xf32>
    %315 = arith.subf %305, %314 : vector<2x16x32xf32>
    %316 = arith.mulf %315, %315 : vector<2x16x32xf32>
    %cst_72 = arith.constant dense<0.000000e+00> : vector<2x16xf32>
    %317 = vector.multi_reduction <add>, %316, %cst_72 [2] : vector<2x16x32xf32> to vector<2x16xf32>
    %318 = vector.shape_cast %317 : vector<2x16xf32> to vector<2x16x1xf32>
    %cst_73 = arith.constant 3.200000e+01 : f32
    %319 = vector.broadcast %cst_73 : f32 to vector<2x16x1xf32>
    %320 = arith.divf %318, %319 : vector<2x16x1xf32>
    %321 = vector.broadcast %313 : vector<2x16x1xf32> to vector<2x16x32xf32>
    %322 = arith.subf %305, %321 : vector<2x16x32xf32>
    %cst_74 = arith.constant 9.99999974E-6 : f32
    %323 = vector.broadcast %cst_74 : f32 to vector<2x16x1xf32>
    %324 = arith.addf %320, %323 : vector<2x16x1xf32>
    %325 = math.rsqrt %324 : vector<2x16x1xf32>
    %326 = vector.broadcast %325 : vector<2x16x1xf32> to vector<2x16x32xf32>
    %327 = arith.mulf %322, %326 : vector<2x16x32xf32>
    %328 = vector.shape_cast %307 : vector<32xf32> to vector<1x1x32xf32>
    %329 = vector.broadcast %328 : vector<1x1x32xf32> to vector<2x16x32xf32>
    %330 = arith.mulf %327, %329 : vector<2x16x32xf32>
    %331 = vector.shape_cast %309 : vector<32xf32> to vector<1x1x32xf32>
    %332 = vector.broadcast %331 : vector<1x1x32xf32> to vector<2x16x32xf32>
    %333 = arith.addf %330, %332 : vector<2x16x32xf32>
    %cst_75 = arith.constant dense<0.000000e+00> : vector<2x32xf32>
    %334 = vector.multi_reduction <add>, %333, %cst_75 [1] : vector<2x16x32xf32> to vector<2x32xf32>
    %cst_76 = arith.constant 1.600000e+01 : f32
    %335 = vector.broadcast %cst_76 : f32 to vector<2x32xf32>
    %336 = arith.divf %334, %335 : vector<2x32xf32>
    %c512 = arith.constant 512 : index
    %c0_77 = arith.constant 0 : index
    %337 = vector.load %arg1[%c512, %c0_77] : memref<592x128xf32, #tpu.memory_space<vmem>>, vector<32x32xf32>
    %cst_78 = arith.constant dense<0.000000e+00> : vector<2x32xf32>
    %338 = tpu.matmul %336, %337, %cst_78 {dimension_numbers = #tpu.dot_dimension_numbers<[1], [0], [0], [1], [0, 0, 1, 1], [], []>} : vector<2x32xf32>, vector<32x32xf32>, vector<2x32xf32> -> vector<2x32xf32>
    %c544 = arith.constant 544 : index
    %c0_79 = arith.constant 0 : index
    %339 = vector.load %arg1[%c544, %c0_79] : memref<592x128xf32, #tpu.memory_space<vmem>>, vector<1x32xf32>
    %340 = vector.shape_cast %339 : vector<1x32xf32> to vector<32xf32>
    %341 = vector.shape_cast %340 : vector<32xf32> to vector<1x32xf32>
    %342 = vector.broadcast %341 : vector<1x32xf32> to vector<2x32xf32>
    %343 = arith.addf %338, %342 : vector<2x32xf32>
    %cst_80 = arith.constant 0.000000e+00 : f32
    %344 = vector.broadcast %cst_80 : f32 to vector<2x32xf32>
    %345 = arith.maximumf %343, %344 : vector<2x32xf32>
    %c552 = arith.constant 552 : index
    %c0_81 = arith.constant 0 : index
    %346 = vector.load %arg1[%c552, %c0_81] : memref<592x128xf32, #tpu.memory_space<vmem>>, vector<32x4xf32>
    %cst_82 = arith.constant dense<0.000000e+00> : vector<2x4xf32>
    %347 = tpu.matmul %345, %346, %cst_82 {dimension_numbers = #tpu.dot_dimension_numbers<[1], [0], [0], [1], [0, 0, 1, 1], [], []>} : vector<2x32xf32>, vector<32x4xf32>, vector<2x4xf32> -> vector<2x4xf32>
    %c584 = arith.constant 584 : index
    %c0_83 = arith.constant 0 : index
    %348 = vector.load %arg1[%c584, %c0_83] : memref<592x128xf32, #tpu.memory_space<vmem>>, vector<1x4xf32>
    %349 = vector.shape_cast %348 : vector<1x4xf32> to vector<4xf32>
    %350 = vector.shape_cast %349 : vector<4xf32> to vector<1x4xf32>
    %351 = vector.broadcast %350 : vector<1x4xf32> to vector<2x4xf32>
    %352 = arith.addf %347, %351 : vector<2x4xf32>
    %c0_84 = arith.constant 0 : index
    %c0_85 = arith.constant 0 : index
    %353 = vector.load %arg2[%c0_84, %c0_85] : memref<2x4xf32, #tpu.memory_space<vmem>>, vector<2x4xf32>
    tpu.vector_store %arg2[%c0_84, %c0_85], %352 {strides = array<i32>} : memref<2x4xf32, #tpu.memory_space<vmem>>, vector<2x4xf32>,
    return
  }
}

</mosaic_0001>

<bundles_post_ra>
// kernel: tpu_custom_call.1
= control target key start
LH: loop header
LB: loop body
LE: loop exit
PB: predicated region body
PF: predicated region fallthrough
CT: control target
= control target key end

     0   :  { %7 = vsyncpa [#allocation3], 0  ;;  %s7148_s0 = inlined_call_operand.hbm [shape: f32[6,16], index: 0, kind: input, shape index: {}]   ;;  %s7149_s1 = inlined_call_operand.hbm [shape: f32[592,128], index: 1, kind: input, shape index: {}]   ;;  %s7150_s2 = inlined_call_operand.hbm [shape: f32[2,4], index: 2, kind: output, shape index: {}]  }
   0x1   :  { %8 = vsyncpa [#allocation6], 0 }
   0x2   :  { %9 = vsyncpa [#allocation4], 0  ;;  %s6179_s9 = smov [#allocation2]   ;;  %s6180_s11 = smov [#allocation5]  }
   0x3   :  { %s16_s10 = sshll.u32 %s6179_s9, 4  ;;  %s25_s12 = sshll.u32 %s6180_s11, 4  ;;  %s17_s10 = int_to_ptr.vmem [resolvable:$true] %s16_s10  ;;  %s26_s12 = int_to_ptr.vmem [resolvable:$true] %s25_s12 }
   0x4   :  { %s6121_s13 = scalar_lea.vmem %s17_s10, 128  ;;  %p6126_p1 = scmp.lt.s32.totalorder %s17_s10, %s17_s10 }
   0x5   :  { %p6122_p0 = scmp.ne.s32.totalorder %s17_s10, %s6121_s13  ;;  %p6127_p2 = scmp.lt.s32.totalorder %s6121_s13, %s6121_s13 }
   0x7   :  { %p6128_p3 = por %p6127_p2, %p6126_p1 }
   0x9   :  { %p6129_p4 = pnand %p6128_p3, %p6122_p0 }
   0xb   :  { %6132 = shalt.err (!%p6129_p4)
}
   0xc   :  { %19 = dma.hbm_to_vmem [thread:$0]  %s7148_s0, 128, %s17_s10, [#allocation3]  }
   0xd   :  { %s6141_s16 = scalar_lea.vmem %s26_s12, 9472  ;;  %p6146_p6 = scmp.lt.s32.totalorder %s26_s12, %s26_s12 }
   0xe   :  { %p6142_p5 = scmp.ne.s32.totalorder %s26_s12, %s6141_s16  ;;  %p6147_p7 = scmp.lt.s32.totalorder %s6141_s16, %s6141_s16 }
  0x10   :  { %p6148_p8 = por %p6147_p7, %p6146_p6 }
  0x12   :  { %p6149_p9 = pnand %p6148_p8, %p6142_p5 }
  0x14   :  { %6152 = shalt.err (!%p6149_p9)
}
  0x15   :  { %s6181_s17 = smov 128   ;;  %s6182_s18 = smov 8  }
  0x16   :  { %31 = dma.hbm_to_vmem [thread:$0]  %s7149_s1, 9472, %s26_s12, [#allocation6], %s6181_s17, %s6181_s17, %s6182_s18  }
  0x17   :  { %6173 = dma.done.wait [#allocation3], 128  }
  0x18   :  { %6174 = vsyncadd [#allocation3], 4294967168 }
  0x19   :  { %6175 = dma.done.wait [#allocation6], 9472  }
  0x1a   :  { %6176 = vsyncadd [#allocation6], 4294957824  ;;  %v189_v0 = vlaneseq  ;;  %v6183_v1 = vmov 0.0   ;;  %vm6184_vm0 = vmmov 0   ;;  %v40_v4 = vld [vmem:[#allocation5 + $0x8] sm:$0xff]  ;;  %v39_v5 = vld [vmem:[#allocation5] sm:$0xff] }
  0x1b   :  { %5548 = vmatprep.subr.mxu0 %v6183_v1  ;;  %5555 = vmatprep.subr.mxu1 %v6183_v1  ;;  %v116_v6 = vld [vmem:[#allocation5 + $0x18] sm:$0xff]  ;;  %vm41_vm1 = vcmask 130048   ;;  %v115_v8 = vld [vmem:[#allocation5 + $0x10] sm:$0xff]  ;;  %v498_v34 = vld [vmem:[#allocation5 + $0x48] sm:$0xff]  ;;  %vm506_vm2 = vcmask 261120   ;;  %vm610_vm3 = vcmask 64512  }
  0x1c   :  { %5552 = vmatprep.mubr.msk.f32.mxu0 %vm6184_vm0, %v6183_v1  ;;  %5559 = vmatprep.mubr.msk.f32.mxu1 %vm6184_vm0, %v6183_v1  ;;  %v6224_v2 = vshrl.u32 %v189_v0, 7  ;;  %v38_v7 = vld [vmem:[#allocation2] sm:$0x3f]  ;;  %v499_v33 = vld [vmem:[#allocation5 + $0x50] sm:$0xff]  ;;  %v497_v37 = vld [vmem:[#allocation5 + $0x40] sm:$0xff]  ;;  %s6185_s0 = smov 80  }
  0x1d   :  { %5549 = vmatpush3.msra.mxu0 %v40_v4  ;;  %5556 = vmatpush3.msra.mxu1 %v116_v6  ;;  %v500_v32 = vld [vmem:[#allocation5 + $0x58] sm:$0xff]  ;;  %v187_v56 = vld [vmem:[#allocation5 + $0x20] sm:$0xff]  ;;  %s6186_s1 = smov 96   ;;  %s6187_s21 = smov 88   ;;  %vm2257_vm4 = vcmask 195584   ;;  %vm2566_vm5 = vcmask 523264  }
  0x1e   :  { %v6227_v3 = vsub.s32 0, %v6224_v2  ;;  %v6230_v9 = vsub.s32 1, %v6224_v2  ;;  %5550 = vmatprep.subr.mxu0 %v6183_v1  ;;  %5557 = vmatprep.subr.mxu1 %v6183_v1  ;;  %v6239_v12 = vsub.s32 2, %v6224_v2  ;;  %v6242_v13 = vsub.s32 3, %v6224_v2  ;;  %s6188_s22 = smov 120   ;;  %s6189_s23 = smov 112  }
  0x1f   :  { %5551 = vmatpush3.msra.mxu0 %v39_v5  ;;  %5558 = vmatpush3.msra.mxu1 %v115_v8  ;;  %v6247_v16 = vsub.s32 4, %v6224_v2  ;;  %v6250_v17 = vsub.s32 5, %v6224_v2  ;;  %s6190_s24 = smov 72   ;;  %s6191_s25 = smov 104   ;;  %vm5006_vm6 = vcmask 1041409   ;;  %vm5163_vm7 = vcmask 25600  }
  0x20   :  { %v222_v10 = vrot.slane %v38_v7, %v6227_v3  ;;  %5553 = vmatmul.mubr.msk.f32.vlgmr.msra.gmra.mxu0 %vm41_vm1, %v38_v7  ;;  %5560 = vmatmul.mubr.msk.f32.vlgmr.msra.gmra.mxu1 %vm41_vm1, %v38_v7  ;;  %v233_v11 = vrot.slane %v38_v7, %v6230_v9  ;;  %v324_v14 = vrot.slane %v38_v7, %v6239_v12  ;;  %s6192_s26 = smov 64   ;;  %s6193_s27 = smov 16  }
  0x21   :  { %v335_v15 = vrot.slane %v38_v7, %v6242_v13  ;;  %v426_v18 = vrot.slane %v38_v7, %v6247_v16  ;;  %v437_v19 = vrot.slane %v38_v7, %v6250_v17  ;;  %5562 = vmatprep.subr.mxu0 %v500_v32  ;;  %v214_v57 = vrot.slane %v187_v56, %v6227_v3  ;;  %s6194_s28 = smov 24   ;;  %s6195_s29 = smov [#allocation7]  }
  0x22   :  { %228 = vbcast.lane.b32.xlu1 %v222_v10, 264  ;;  %224 = vbcast.lane.b32.xlu0 %v222_v10, 256  ;;  %v278_v60 = vrot.slane %v187_v56, %v6239_v12  ;;  %v244_v61 = vrot.slane %v187_v56, %v6230_v9  ;;  %v312_v63 = vrot.slane %v187_v56, %v6242_v13  ;;  %s5171_s30 = sshll.u32 %s6195_s29, 4  ;;  %s5172_s30 = int_to_ptr.vmem [resolvable:$true] %s5171_s30 }
  0x23   :  { %5563 = vmatpush3.msra.mxu0 %v500_v32  ;;  %s6153_s3 = scalar_lea.vmem %s5172_s30, 32  ;;  %p6158_p11 = scmp.lt.s32.totalorder %s5172_s30, %s5172_s30 }
  0x24   :  { %5564 = vmatprep.subr.mxu0 %v499_v33  ;;  %p6154_p10 = scmp.ne.s32.totalorder %s5172_s30, %s6153_s3  ;;  %p6159_p12 = scmp.lt.s32.totalorder %s6153_s3, %s6153_s3 }
  0x25   :  { %5565 = vmatpush3.msra.mxu0 %v499_v33 }
  0x26   :  { %235 = vbcast.lane.b32.xlu1 %v233_v11, 256  ;;  %239 = vbcast.lane.b32.xlu0 %v233_v11, 264  ;;  %p6160_p13 = por %p6159_p12, %p6158_p11 }
  0x27   :  { %5566 = vmatprep.subr.mxu0 %v498_v34 }
  0x28   :  { %5567 = vmatpush3.msra.mxu0 %v498_v34  ;;  %p6161_p0 = pnand %p6160_p13, %p6154_p10 }
  0x29   :  { %5568 = vmatprep.subr.mxu0 %v497_v37 }
  0x2a   :  { %326 = vbcast.lane.b32.xlu1 %v324_v14, 256  ;;  %337 = vbcast.lane.b32.xlu0 %v335_v15, 256 }
  0x2b   :  { %5569 = vmatpush3.msra.mxu0 %v497_v37 }
  0x2e   :  { %330 = vbcast.lane.b32.xlu1 %v324_v14, 264  ;;  %341 = vbcast.lane.b32.xlu0 %v335_v15, 264  ;;  %v6285_v14 = vrot.slane %v187_v56, %v6247_v16 }
  0x32   :  { %428 = vbcast.lane.b32.xlu1 %v426_v18, 256  ;;  %439 = vbcast.lane.b32.xlu0 %v437_v19, 256 }
  0x36   :  { %432 = vbcast.lane.b32.xlu1 %v426_v18, 264 }
  0x3a   :  { %443 = vbcast.lane.b32.xlu1 %v437_v19, 264 }
  0x94   :  { %v229_v40 = vpop.permute.xlu1 %228  ;;  %v225_v43 = vpop.permute.xlu0 %224 }
  0x95   :  { %v245_v5 = vmul.f32 %v244_v61, %v225_v43  ;;  %v246_v18 = vmul.f32 %v244_v61, %v229_v40 }
  0x98   :  { %v6266_v41 = vpop.permute.xlu1 %235  ;;  %v6268_v45 = vpop.permute.xlu0 %239 }
  0x9c   :  { %v327_v42 = vpop.permute.xlu1 %326  ;;  %v6270_v47 = vpop.permute.xlu0 %337 }
  0xa0   :  { %v331_v44 = vpop.permute.xlu1 %330  ;;  %v6274_v49 = vpop.permute.xlu0 %341 }
  0xa1   :  { %v348_v32 = vmul.f32 %v6285_v14, %v331_v44  ;;  %v248_v44 = vmul.f32 %v244_v61, %v6268_v45 }
  0xa4   :  { %v429_v46 = vpop.permute.xlu1 %428  ;;  %v6278_v51 = vpop.permute.xlu0 %439 }
  0xa8   :  { %v6272_v48 = vpop.permute.xlu1 %432 }
  0xac   :  { %v6276_v50 = vpop.permute.xlu1 %443 }
  0xe0   :  { %v111_v20 = vpop.f32.mrf.mxu0  ;;  %v183_v21 = vpop.f32.mrf.mxu1 }
  0xe1   :  { %v192_v22 = vrot.slane %v111_v20, %v6227_v3  ;;  %v256_v25 = vrot.slane %v183_v21, %v6227_v3  ;;  %v203_v26 = vrot.slane %v111_v20, %v6230_v9  ;;  %v290_v27 = vrot.slane %v111_v20, %v6239_v12 }
  0xe2   :  { %v5554_v23 = vpop.f32.mrf.mxu0  ;;  %v5561_v24 = vpop.f32.mrf.mxu1  ;;  %v358_v28 = vrot.slane %v183_v21, %v6239_v12  ;;  %v267_v29 = vrot.slane %v183_v21, %v6230_v9  ;;  %v392_v30 = vrot.slane %v111_v20, %v6247_v16  ;;  %v301_v31 = vrot.slane %v111_v20, %v6242_v13 }
  0xe3   :  { %198 = vbcast.lane.b32.xlu1 %v192_v22, 264  ;;  %194 = vbcast.lane.b32.xlu0 %v192_v22, 256  ;;  %v460_v35 = vrot.slane %v183_v21, %v6247_v16  ;;  %v369_v36 = vrot.slane %v183_v21, %v6242_v13  ;;  %v471_v38 = vrot.slane %v183_v21, %v6250_v17  ;;  %v413_v12 = vsub.s32 6, %v6224_v2 }
  0xe4   :  { %v403_v39 = vrot.slane %v111_v20, %v6250_v17  ;;  %v6289_v13 = vrot.slane %v187_v56, %v6250_v17  ;;  %v347_v22 = vmul.f32 %v6285_v14, %v327_v42  ;;  %v447_v16 = vsub.s32 7, %v6224_v2 }
  0xe5   :  { %v247_v42 = vmul.f32 %v244_v61, %v6266_v41 }
  0xe6   :  { %v448_v33 = vrot.slane %v187_v56, %v447_v16 }
  0xe7   :  { %262 = vbcast.lane.b32.xlu1 %v256_v25, 264  ;;  %258 = vbcast.lane.b32.xlu0 %v256_v25, 256  ;;  %v6292_v25 = vrot.slane %v187_v56, %v413_v12 }
  0xeb   :  { %209 = vbcast.lane.b32.xlu1 %v203_v26, 264  ;;  %205 = vbcast.lane.b32.xlu0 %v203_v26, 256 }
  0xef   :  { %296 = vbcast.lane.b32.xlu1 %v290_v27, 264  ;;  %292 = vbcast.lane.b32.xlu0 %v290_v27, 256 }
  0xf3   :  { %360 = vbcast.lane.b32.xlu1 %v358_v28, 256  ;;  %269 = vbcast.lane.b32.xlu0 %v267_v29, 256 }
  0xf7   :  { %364 = vbcast.lane.b32.xlu1 %v358_v28, 264  ;;  %273 = vbcast.lane.b32.xlu0 %v267_v29, 264 }
  0xfb   :  { %394 = vbcast.lane.b32.xlu1 %v392_v30, 256  ;;  %303 = vbcast.lane.b32.xlu0 %v301_v31, 256 }
  0xff   :  { %398 = vbcast.lane.b32.xlu1 %v392_v30, 264  ;;  %307 = vbcast.lane.b32.xlu0 %v301_v31, 264 }
 0x103   :  { %462 = vbcast.lane.b32.xlu1 %v460_v35, 256  ;;  %371 = vbcast.lane.b32.xlu0 %v369_v36, 256 }
 0x107   :  { %466 = vbcast.lane.b32.xlu1 %v460_v35, 264  ;;  %375 = vbcast.lane.b32.xlu0 %v369_v36, 264 }
 0x10b   :  { %477 = vbcast.lane.b32.xlu1 %v471_v38, 264  ;;  %405 = vbcast.lane.b32.xlu0 %v403_v39, 256 }
 0x10f   :  { %409 = vbcast.lane.b32.xlu0 %v403_v39, 264 }
 0x113   :  { %473 = vbcast.lane.b32.xlu0 %v471_v38, 256 }
 0x155   :  { %v199_v52 = vpop.permute.xlu1 %198  ;;  %v195_v53 = vpop.permute.xlu0 %194 }
 0x156   :  { %v215_v62 = vmul.f32 %v214_v57, %v195_v53  ;;  %v216_v3 = vmul.f32 %v214_v57, %v199_v52  ;;  %v5183_v52 = vld [vmem:[#allocation5 + $0x28] ss:$0 sm:$0xff]  ;;  %v449_v53 = vmul.f32 %v448_v33, %v429_v46 }
 0x158   :  { %v249_v7 = vadd.f32 %v245_v5, %v215_v62  ;;  %v250_v23 = vadd.f32 %v246_v18, %v216_v3  ;;  %v450_v3 = vmul.f32 %v448_v33, %v6272_v48  ;;  %v492_v18 = vld [vmem:[#allocation5 + $0x38] sm:$0xff] }
 0x159   :  { %v263_v54 = vpop.permute.xlu1 %262  ;;  %v259_v55 = vpop.permute.xlu0 %258 }
 0x15a   :  { %v279_v6 = vmul.f32 %v278_v60, %v259_v55  ;;  %v280_v9 = vmul.f32 %v278_v60, %v263_v54 }
 0x15c   :  { %v283_v15 = vadd.f32 %v279_v6, %v249_v7  ;;  %v284_v26 = vadd.f32 %v280_v9, %v250_v23  ;;  %v349_v9 = vmul.f32 %v6285_v14, %v6270_v47 }
 0x15d   :  { %v210_v58 = vpop.permute.xlu1 %209  ;;  %v206_v59 = vpop.permute.xlu0 %205 }
 0x15e   :  { %v217_v36 = vmul.f32 %v214_v57, %v206_v59  ;;  %v218_v43 = vmul.f32 %v214_v57, %v210_v58 }
 0x160   :  { %v251_v56 = vadd.f32 %v247_v42, %v217_v36 }
 0x161   :  { %v297_v0 = vpop.permute.xlu1 %296  ;;  %v293_v4 = vpop.permute.xlu0 %292 }
 0x162   :  { %v313_v8 = vmul.f32 %v312_v63, %v293_v4  ;;  %v314_v24 = vmul.f32 %v312_v63, %v297_v0 }
 0x164   :  { %v317_v19 = vadd.f32 %v313_v8, %v283_v15  ;;  %v318_v31 = vadd.f32 %v314_v24, %v284_v26  ;;  %v252_v8 = vadd.f32 %v248_v44, %v218_v43 }
 0x165   :  { %v361_v10 = vpop.permute.xlu1 %360  ;;  %v270_v11 = vpop.permute.xlu0 %269 }
 0x166   :  { %v351_v27 = vadd.f32 %v347_v22, %v317_v19  ;;  %v381_v28 = vmul.f32 %v6289_v13, %v361_v10  ;;  %v352_v39 = vadd.f32 %v348_v32, %v318_v31  ;;  %v281_v54 = vmul.f32 %v278_v60, %v270_v11  ;;  %v491_v10 = vld [vmem:[#allocation5 + $0x30] sm:$0xff] }
 0x168   :  { %v385_v34 = vadd.f32 %v381_v28, %v351_v27  ;;  %v285_v41 = vadd.f32 %v281_v54, %v251_v56 }
 0x169   :  { %v365_v20 = vpop.permute.xlu1 %364  ;;  %v274_v21 = vpop.permute.xlu0 %273 }
 0x16a   :  { %v382_v35 = vmul.f32 %v6289_v13, %v365_v20  ;;  %v282_v62 = vmul.f32 %v278_v60, %v274_v21 }
 0x16c   :  { %v386_v55 = vadd.f32 %v382_v35, %v352_v39  ;;  %v286_v46 = vadd.f32 %v282_v62, %v252_v8 }
 0x16d   :  { %v395_v29 = vpop.permute.xlu1 %394  ;;  %v304_v30 = vpop.permute.xlu0 %303 }
 0x16e   :  { %v415_v17 = vmul.f32 %v6292_v25, %v395_v29  ;;  %v315_v59 = vmul.f32 %v312_v63, %v304_v30 }
 0x170   :  { %v419_v2 = vadd.f32 %v415_v17, %v385_v34  ;;  %v319_v45 = vadd.f32 %v315_v59, %v285_v41 }
 0x171   :  { %v399_v37 = vpop.permute.xlu1 %398  ;;  %v308_v38 = vpop.permute.xlu0 %307 }
 0x172   :  { %v416_v40 = vmul.f32 %v6292_v25, %v399_v37  ;;  %v453_v6 = vadd.f32 %v449_v53, %v419_v2  ;;  %v316_v57 = vmul.f32 %v312_v63, %v308_v38  ;;  %v350_v63 = vmul.f32 %v6285_v14, %v6274_v49 }
 0x173   :  { %v353_v22 = vadd.f32 %v349_v9, %v319_v45  ;;  %v452_v49 = vmul.f32 %v448_v33, %v6276_v50  ;;  %v451_v14 = vmul.f32 %v448_v33, %v6278_v51  ;;  %v5184_v50 = vld [vmem:[#allocation5 + $0x60] ss:$0 sm:$0xff] }
 0x174   :  { %v420_v5 = vadd.f32 %v416_v40, %v386_v55  ;;  %v320_v19 = vadd.f32 %v316_v57, %v286_v46 }
 0x175   :  { %v463_v0 = vpop.permute.xlu1 %462  ;;  %v372_v4 = vpop.permute.xlu0 %371 }
 0x176   :  { %v483_v7 = vmul.f32 %v5183_v52, %v463_v0  ;;  %v454_v60 = vadd.f32 %v450_v3, %v420_v5  ;;  %v383_v20 = vmul.f32 %v6289_v13, %v372_v4  ;;  %v354_v47 = vadd.f32 %v350_v63, %v320_v19 }
 0x178   :  { %v487_v58 = vadd.f32 %v483_v7, %v453_v6  ;;  %v387_v26 = vadd.f32 %v383_v20, %v353_v22 }
 0x179   :  { %v467_v11 = vpop.permute.xlu1 %466  ;;  %v376_v15 = vpop.permute.xlu0 %375 }
 0x17a   :  { %v6303_v61 = vadd.f32 %v491_v10, %v487_v58  ;;  %v484_v12 = vmul.f32 %v5183_v52, %v467_v11  ;;  %v384_v24 = vmul.f32 %v6289_v13, %v376_v15 }
 0x17c   :  { %v488_v48 = vadd.f32 %v484_v12, %v454_v60  ;;  %5570 = vmatprep.mubr.msk.f32.mxu0 %vm506_vm2, %v6303_v61  ;;  %v388_v28 = vadd.f32 %v384_v24, %v354_v47 }
 0x17d   :  { %v406_v21 = vpop.permute.xlu0 %405  ;;  %v478_v31 = vpop.permute.xlu1 %477 }
 0x17e   :  { %v6312_v23 = vadd.f32 %v492_v18, %v488_v48  ;;  %v417_v16 = vmul.f32 %v6292_v25, %v406_v21  ;;  %v486_v13 = vmul.f32 %v5183_v52, %v478_v31 }
 0x180   :  { %5571 = vmatmul.mubr.msk.f32.vlgmr.msra.gmra.mxu0 %vm506_vm2, %v6312_v23  ;;  %v421_v29 = vadd.f32 %v417_v16, %v387_v26 }
 0x181   :  { %v410_v27 = vpop.permute.xlu0 %409 }
 0x182   :  { %v418_v30 = vmul.f32 %v6292_v25, %v410_v27  ;;  %v455_v35 = vadd.f32 %v451_v14, %v421_v29 }
 0x184   :  { %v422_v17 = vadd.f32 %v418_v30, %v388_v28 }
 0x185   :  { %v474_v32 = vpop.permute.xlu0 %473 }
 0x186   :  { %v456_v34 = vadd.f32 %v452_v49, %v422_v17  ;;  %v485_v36 = vmul.f32 %v5183_v52, %v474_v32 }
 0x188   :  { %v490_v37 = vadd.f32 %v486_v13, %v456_v34  ;;  %v489_v38 = vadd.f32 %v485_v36, %v455_v35 }
 0x18a   :  { %v6321_v39 = vadd.f32 %v491_v10, %v489_v38  ;;  %v6323_v2 = vadd.f32 %v492_v18, %v490_v37 }
 0x18c   :  { %5573 = vmatprep.mubr.msk.f32.mxu0 %vm506_vm2, %v6321_v39 }
 0x18d   :  { %5574 = vmatmul.mubr.msk.f32.gmra.mxu0 %vm506_vm2, %v6323_v2 }
 0x240   :  { %v5572_v51 = vpop.f32.mrf.mxu0 }
 0x241   :  { %v591_v25 = vadd.f32 %v5572_v51, %v5184_v50 }
 0x242   :  { %v585_v33 = vpop.f32.mrf.mxu0 }
 0x243   :  { %v586_v40 = vadd.f32 %v5184_v50, %v585_v33  ;;  %971 = vrot.lane.b32.xlu1 %v591_v25, %s6185_s0  ;;  %608 = vrot.lane.b32.xlu0 %v591_v25, %s6186_s1 }
 0x245   :  { %5580 = vmatprep.mubr.msk.f32.mxu1 %vm610_vm3, %v586_v40 }
 0x247   :  { %789 = vrot.lane.b32.xlu0 %v591_v25, %s6187_s21  ;;  %606 = vrot.lane.b32.xlu1 %v586_v40, %s6186_s1 }
 0x24b   :  { %785 = vrot.lane.b32.xlu0 %v591_v25, %s6188_s22  ;;  %787 = vrot.lane.b32.xlu1 %v586_v40, %s6187_s21 }
 0x24d   :  { %v5575_v42 = vpop.f32.mrf.mxu0 }
 0x24e   :  { %v6338_v53 = vadd.f32 %v5575_v42, %v5184_v50 }
 0x24f   :  { %v595_v43 = vpop.f32.mrf.mxu0  ;;  %969 = vrot.lane.b32.xlu0 %v586_v40, %s6185_s0  ;;  %783 = vrot.lane.b32.xlu1 %v586_v40, %s6188_s22 }
 0x250   :  { %v596_v52 = vadd.f32 %v5184_v50, %v595_v43 }
 0x252   :  { %5587 = vmatprep.mubr.msk.f32.mxu0 %vm610_vm3, %v596_v52 }
 0x253   :  { %698 = vrot.lane.b32.xlu0 %v6338_v53, %s6186_s1  ;;  %965 = vrot.lane.b32.xlu1 %v586_v40, %s6189_s23 }
 0x257   :  { %880 = vrot.lane.b32.xlu0 %v6338_v53, %s6187_s21  ;;  %1062 = vrot.lane.b32.xlu1 %v6338_v53, %s6185_s0 }
 0x25b   :  { %876 = vrot.lane.b32.xlu0 %v6338_v53, %s6188_s22  ;;  %696 = vrot.lane.b32.xlu1 %v596_v52, %s6186_s1 }
 0x25f   :  { %967 = vrot.lane.b32.xlu0 %v591_v25, %s6189_s23  ;;  %1153 = vrot.lane.b32.xlu1 %v591_v25, %s6190_s24 }
 0x263   :  { %878 = vrot.lane.b32.xlu0 %v596_v52, %s6187_s21  ;;  %1244 = vrot.lane.b32.xlu1 %v6338_v53, %s6190_s24 }
 0x267   :  { %1151 = vrot.lane.b32.xlu0 %v586_v40, %s6190_s24  ;;  %874 = vrot.lane.b32.xlu1 %v596_v52, %s6188_s22 }
 0x26b   :  { %1060 = vrot.lane.b32.xlu0 %v596_v52, %s6185_s0  ;;  %1147 = vrot.lane.b32.xlu1 %v586_v40, %s6191_s25 }
 0x26f   :  { %1058 = vrot.lane.b32.xlu0 %v6338_v53, %s6189_s23  ;;  %1056 = vrot.lane.b32.xlu1 %v596_v52, %s6189_s23 }
 0x273   :  { %1149 = vrot.lane.b32.xlu0 %v591_v25, %s6191_s25  ;;  %1242 = vrot.lane.b32.xlu1 %v596_v52, %s6190_s24 }
 0x277   :  { %1238 = vrot.lane.b32.xlu0 %v596_v52, %s6191_s25  ;;  %1240 = vrot.lane.b32.xlu1 %v6338_v53, %s6191_s25 }
 0x27b   :  { %1505 = vrot.lane.b32.xlu0 %v586_v40, %s6192_s26  ;;  %1507 = vrot.lane.b32.xlu1 %v591_v25, %s6192_s26 }
 0x27f   :  { %1592 = vrot.lane.b32.xlu0 %v596_v52, %s6192_s26  ;;  %1594 = vrot.lane.b32.xlu1 %v6338_v53, %s6192_s26 }
 0x2b5   :  { %v972_v54 = vpop.permute.xlu1 %971  ;;  %v609_v55 = vpop.permute.xlu0 %608 }
 0x2b6   :  { %5576 = vmatprep.subr.msk.mxu1 %vm610_vm3, %v609_v55 }
 0x2b7   :  { %5577 = vmatpush3.xpose.msk.msra.mxu1 %vm610_vm3, %v609_v55 }
 0x2b9   :  { %v790_v44 = vpop.permute.xlu0 %789  ;;  %v607_v56 = vpop.permute.xlu1 %606 }
 0x2ba   :  { %5578 = vmatprep.subr.msk.mxu1 %vm610_vm3, %v607_v56 }
 0x2bb   :  { %5579 = vmatpush3.xpose.msk.msra.mxu1 %vm610_vm3, %v607_v56 }
 0x2bc   :  { %5590 = vmatprep.subr.msk.mxu1 %vm610_vm3, %v790_v44 }
 0x2bd   :  { %v786_v62 = vpop.permute.xlu0 %785  ;;  %v788_v0 = vpop.permute.xlu1 %787 }
 0x2be   :  { %1681 = vrot.lane.b32.xlu1 %v786_v62, %s6192_s26  ;;  %5581 = vmatmul.mubr.msk.f32.vlgmr.msra.gmra.mxu1 %vm610_vm3, %v591_v25 }
 0x2bf   :  { %5591 = vmatpush3.xpose.msk.msra.mxu1 %vm610_vm3, %v790_v44 }
 0x2c0   :  { %5592 = vmatprep.subr.msk.mxu1 %vm610_vm3, %v788_v0 }
 0x2c1   :  { %v970_v4 = vpop.permute.xlu0 %969  ;;  %v784_v59 = vpop.permute.xlu1 %783 }
 0x2c2   :  { %5594 = vmatprep.mubr.msk.f32.mxu1 %vm610_vm3, %v784_v59 }
 0x2c3   :  { %5593 = vmatpush3.xpose.msk.msra.mxu1 %vm610_vm3, %v788_v0 }
 0x2c4   :  { %5604 = vmatprep.subr.msk.mxu1 %vm610_vm3, %v972_v54 }
 0x2c5   :  { %v699_v5 = vpop.permute.xlu0 %698  ;;  %v966_v6 = vpop.permute.xlu1 %965 }
 0x2c6   :  { %5583 = vmatprep.subr.msk.mxu0 %vm610_vm3, %v699_v5  ;;  %5595 = vmatmul.mubr.msk.f32.vlgmr.msra.gmra.mxu1 %vm610_vm3, %v786_v62 }
 0x2c7   :  { %5584 = vmatpush3.xpose.msk.msra.mxu0 %vm610_vm3, %v699_v5  ;;  %5605 = vmatpush3.xpose.msk.msra.mxu1 %vm610_vm3, %v972_v54 }
 0x2c8   :  { %5608 = vmatprep.mubr.msk.f32.mxu1 %vm610_vm3, %v966_v6  ;;  %5606 = vmatprep.subr.msk.mxu1 %vm610_vm3, %v970_v4 }
 0x2c9   :  { %v881_v7 = vpop.permute.xlu0 %880  ;;  %v1063_v8 = vpop.permute.xlu1 %1062 }
 0x2cb   :  { %5607 = vmatpush3.xpose.msk.msra.mxu1 %vm610_vm3, %v970_v4 }
 0x2cd   :  { %v877_v10 = vpop.permute.xlu0 %876  ;;  %v697_v3 = vpop.permute.xlu1 %696 }
 0x2ce   :  { %1768 = vrot.lane.b32.xlu0 %v877_v10, %s6192_s26  ;;  %5585 = vmatprep.subr.msk.mxu0 %vm610_vm3, %v697_v3 }
 0x2cf   :  { %5586 = vmatpush3.xpose.msk.msra.mxu0 %vm610_vm3, %v697_v3 }
 0x2d0   :  { %5597 = vmatprep.subr.msk.mxu0 %vm610_vm3, %v881_v7 }
 0x2d1   :  { %v968_v41 = vpop.permute.xlu0 %967  ;;  %v1154_v57 = vpop.permute.xlu1 %1153 }
 0x2d2   :  { %1855 = vrot.lane.b32.xlu1 %v968_v41, %s6192_s26  ;;  %5588 = vmatmul.mubr.msk.f32.vlgmr.msra.gmra.mxu0 %vm610_vm3, %v6338_v53 }
 0x2d3   :  { %5609 = vmatmul.mubr.msk.f32.vlgmr.msra.gmra.mxu1 %vm610_vm3, %v968_v41  ;;  %5618 = vmatprep.subr.msk.mxu1 %vm610_vm3, %v1154_v57 }
 0x2d4   :  { %5598 = vmatpush3.xpose.msk.msra.mxu0 %vm610_vm3, %v881_v7  ;;  %5619 = vmatpush3.xpose.msk.msra.mxu1 %vm610_vm3, %v1154_v57 }
 0x2d5   :  { %v879_v58 = vpop.permute.xlu0 %878  ;;  %v1245_v46 = vpop.permute.xlu1 %1244 }
 0x2d6   :  { %1679 = vrot.lane.b32.xlu1 %v784_v59, %s6192_s26  ;;  %5599 = vmatprep.subr.msk.mxu0 %vm610_vm3, %v879_v58 }
 0x2d8   :  { %5600 = vmatpush3.xpose.msk.msra.mxu0 %vm610_vm3, %v879_v58 }
 0x2d9   :  { %5611 = vmatprep.subr.msk.mxu0 %vm610_vm3, %v1063_v8  ;;  %v1152_v11 = vpop.permute.xlu0 %1151  ;;  %v875_v15 = vpop.permute.xlu1 %874 }
 0x2da   :  { %1853 = vrot.lane.b32.xlu1 %v966_v6, %s6192_s26  ;;  %5601 = vmatprep.mubr.msk.f32.mxu0 %vm610_vm3, %v875_v15 }
 0x2db   :  { %1766 = vrot.lane.b32.xlu0 %v875_v15, %s6192_s26  ;;  %5620 = vmatprep.subr.msk.mxu1 %vm610_vm3, %v1152_v11 }
 0x2dc   :  { %5602 = vmatmul.mubr.msk.f32.vlgmr.msra.gmra.mxu0 %vm610_vm3, %v877_v10  ;;  %5621 = vmatpush3.xpose.msk.msra.mxu1 %vm610_vm3, %v1152_v11 }
 0x2dd   :  { %5612 = vmatpush3.xpose.msk.msra.mxu0 %vm610_vm3, %v1063_v8  ;;  %v1061_v45 = vpop.permute.xlu0 %1060  ;;  %v6414_v60 = vpop.permute.xlu1 %1147 }
 0x2de   :  { %5613 = vmatprep.subr.msk.mxu0 %vm610_vm3, %v1061_v45  ;;  %5622 = vmatprep.mubr.msk.f32.mxu1 %vm610_vm3, %v6414_v60 }
 0x2e1   :  { %5614 = vmatpush3.xpose.msk.msra.mxu0 %vm610_vm3, %v1061_v45  ;;  %v6420_v12 = vpop.permute.xlu0 %1058  ;;  %v6422_v18 = vpop.permute.xlu1 %1056 }
 0x2e2   :  { %5625 = vmatprep.subr.msk.mxu0 %vm610_vm3, %v1245_v46  ;;  %5615 = vmatprep.mubr.msk.f32.mxu0 %vm610_vm3, %v6422_v18 }
 0x2e4   :  { %5616 = vmatmul.mubr.msk.f32.vlgmr.msra.gmra.mxu0 %vm610_vm3, %v6420_v12 }
 0x2e5   :  { %5626 = vmatpush3.xpose.msk.msra.mxu0 %vm610_vm3, %v1245_v46  ;;  %v6430_v9 = vpop.permute.xlu0 %1149  ;;  %v1243_v19 = vpop.permute.xlu1 %1242 }
 0x2e6   :  { %5623 = vmatmul.mubr.msk.f32.vlgmr.msra.gmra.mxu1 %vm610_vm3, %v6430_v9  ;;  %5627 = vmatprep.subr.msk.mxu0 %vm610_vm3, %v1243_v19 }
 0x2e9   :  { %5628 = vmatpush3.xpose.msk.msra.mxu0 %vm610_vm3, %v1243_v19  ;;  %v6436_v20 = vpop.permute.xlu0 %1238  ;;  %v6438_v48 = vpop.permute.xlu1 %1240 }
 0x2ea   :  { %5629 = vmatprep.mubr.msk.f32.mxu0 %vm610_vm3, %v6436_v20 }
 0x2ec   :  { %5630 = vmatmul.mubr.msk.f32.vlgmr.msra.gmra.mxu0 %vm610_vm3, %v6438_v48 }
 0x2ed   :  { %v1508_v63 = vpop.permute.xlu1 %1507  ;;  %v1506_v21 = vpop.permute.xlu0 %1505 }
 0x2ee   :  { %5632 = vmatprep.subr.mxu1 %v1508_v63 }
 0x2ef   :  { %5633 = vmatpush3.msra.mxu1 %v1508_v63 }
 0x2f0   :  { %5634 = vmatprep.subr.mxu1 %v1506_v21 }
 0x2f1   :  { %v6444_v22 = vpop.permute.xlu1 %1594  ;;  %5635 = vmatpush3.msra.mxu1 %v1506_v21  ;;  %v6516_v59 = vpop.permute.xlu0 %1592 }
 0x2f2   :  { %5639 = vmatprep.subr.mxu1 %v6444_v22 }
 0x330   :  { %v1682_v24 = vpop.permute.xlu1 %1681 }
 0x331   :  { %5646 = vmatprep.subr.mxu0 %v1682_v24 }
 0x332   :  { %5647 = vmatpush3.msra.mxu0 %v1682_v24 }
 0x340   :  { %v6518_v5 = vpop.permute.xlu0 %1768 }
 0x344   :  { %v6447_v16 = vpop.permute.xlu1 %1855 }
 0x348   :  { %v1680_v26 = vpop.permute.xlu1 %1679 }
 0x349   :  { %5648 = vmatprep.subr.mxu0 %v1680_v26 }
 0x34a   :  { %5649 = vmatpush3.msra.mxu0 %v1680_v26 }
 0x34b   :  { %5660 = vmatprep.subr.mxu0 %v6447_v16 }
 0x34c   :  { %v6520_v6 = vpop.permute.xlu1 %1853 }
 0x34d   :  { %v6522_v7 = vpop.permute.xlu0 %1766 }
 0x37e   :  { %v5582_v47 = vpop.f32.mrf.mxu1 }
 0x37f   :  { %v1332_v27 = vsel %vm41_vm1, %v5582_v47, -inf }
 0x380   :  { %1333 = vmax.xlane.f32.xlu1 %v1332_v27  ;;  %v685_v28 = vpop.f32.mrf.mxu1 }
 0x381   :  { %v1329_v29 = vsel %vm41_vm1, %v685_v28, -inf }
 0x382   :  { %1330 = vmax.xlane.f32.xlu0 %v1329_v29 }
 0x386   :  { %v6460_v17 = vpop.f32.mrf.mxu1 }
 0x387   :  { %v1344_v32 = vsel %vm41_vm1, %v6460_v17, -inf }
 0x388   :  { %v6464_v13 = vpop.f32.mrf.mxu1 }
 0x389   :  { %v1341_v36 = vsel %vm41_vm1, %v6464_v13, -inf }
 0x392   :  { %v6452_v30 = vpop.f32.mrf.mxu0 }
 0x393   :  { %v1338_v31 = vsel %vm41_vm1, %v6452_v30, -inf  ;;  %v6472_v37 = vpop.f32.mrf.mxu1 }
 0x394   :  { %v6456_v49 = vpop.f32.mrf.mxu0  ;;  %1339 = vmax.xlane.f32.xlu1 %v1338_v31  ;;  %v1356_v51 = vsel %vm41_vm1, %v6472_v37, -inf }
 0x395   :  { %v1335_v14 = vsel %vm41_vm1, %v6456_v49, -inf  ;;  %v6480_v25 = vpop.f32.mrf.mxu1 }
 0x396   :  { %1336 = vmax.xlane.f32.xlu0 %v1335_v14  ;;  %v1353_v42 = vsel %vm41_vm1, %v6480_v25, -inf }
 0x39a   :  { %1345 = vmax.xlane.f32.xlu0 %v1344_v32 }
 0x39c   :  { %v6466_v34 = vpop.f32.mrf.mxu0 }
 0x39d   :  { %v1350_v35 = vsel %vm41_vm1, %v6466_v34, -inf }
 0x39e   :  { %v6474_v38 = vpop.f32.mrf.mxu0  ;;  %1351 = vmax.xlane.f32.xlu1 %v1350_v35  ;;  %1342 = vmax.xlane.f32.xlu0 %v1341_v36 }
 0x39f   :  { %v1347_v50 = vsel %vm41_vm1, %v6474_v38, -inf }
 0x3a2   :  { %1348 = vmax.xlane.f32.xlu1 %v1347_v50  ;;  %1357 = vmax.xlane.f32.xlu0 %v1356_v51 }
 0x3a4   :  { %v6482_v33 = vpop.f32.mrf.mxu0 }
 0x3a5   :  { %v1362_v40 = vsel %vm41_vm1, %v6482_v33, -inf }
 0x3a6   :  { %v6488_v43 = vpop.f32.mrf.mxu0  ;;  %1363 = vmax.xlane.f32.xlu1 %v1362_v40  ;;  %1354 = vmax.xlane.f32.xlu0 %v1353_v42  ;;  %v6490_v52 = vpop.f32.mrf.mxu1 }
 0x3a7   :  { %v1359_v53 = vsel %vm41_vm1, %v6488_v43, -inf  ;;  %v1368_v54 = vsel %vm41_vm1, %v6490_v52, -inf }
 0x3a8   :  { %v6496_v55 = vpop.f32.mrf.mxu1 }
 0x3a9   :  { %v1365_v44 = vsel %vm41_vm1, %v6496_v55, -inf }
 0x3aa   :  { %1360 = vmax.xlane.f32.xlu1 %v1359_v53  ;;  %1369 = vmax.xlane.f32.xlu0 %v1368_v54 }
 0x3ac   :  { %v6500_v56 = vpop.f32.mrf.mxu0 }
 0x3ad   :  { %v1374_v62 = vsel %vm41_vm1, %v6500_v56, -inf }
 0x3ae   :  { %1366 = vmax.xlane.f32.xlu0 %v1365_v44  ;;  %v6510_v0 = vpop.f32.mrf.mxu0 }
 0x3af   :  { %v1371_v4 = vsel %vm41_vm1, %v6510_v0, -inf }
 0x3b2   :  { %1375 = vmax.xlane.f32.xlu0 %v1374_v62 }
 0x3bb   :  { %2029 = vrot.lane.b32.xlu1 %v6430_v9, %s6192_s26 }
 0x3c8   :  { %1942 = vrot.lane.b32.xlu0 %v6420_v12, %s6192_s26 }
 0x3cc   :  { %1940 = vrot.lane.b32.xlu0 %v6422_v18, %s6192_s26 }
 0x3df   :  { %1372 = vmax.xlane.f32.xlu1 %v1371_v4 }
 0x3f0   :  { %2027 = vrot.lane.b32.xlu1 %v6414_v60, %s6192_s26 }
 0x409   :  { %v1334_v8 = vpop.xlane.xlu1 %1333 }
 0x40a   :  { %v1378_v10 = vsub.f32 %v5582_v47, %v1334_v8 }
 0x40b   :  { %v1331_v3 = vpop.xlane.xlu0 %1330 }
 0x40c   :  { %v1395_v41 = vmul.f32 1.442695, %v1378_v10  ;;  %v1377_v57 = vsub.f32 %v685_v28, %v1331_v3 }
 0x40e   :  { %5953 = vpow2.f32 %v1395_v41  ;;  %v1393_v58 = vmul.f32 1.442695, %v1377_v57 }
 0x410   :  { %5955 = vpow2.f32 %v1393_v58 }
 0x41b   :  { %v6524_v46 = vpop.eup %5953 }
 0x41c   :  { %v1428_v11 = vsel %vm41_vm1, %v6524_v46, 0.0 }
 0x41d   :  { %v6528_v15 = vpop.eup %5955  ;;  %v1340_v45 = vpop.xlane.xlu1 %1339  ;;  %1429 = vadd.xlane.f32.xlu0 %v1428_v11 }
 0x41e   :  { %v1380_v60 = vsub.f32 %v6452_v30, %v1340_v45  ;;  %v1425_v12 = vsel %vm41_vm1, %v6528_v15, 0.0 }
 0x41f   :  { %1426 = vadd.xlane.f32.xlu1 %v1425_v12  ;;  %v1337_v18 = vpop.xlane.xlu0 %1336 }
 0x420   :  { %v1399_v9 = vmul.f32 1.442695, %v1380_v60  ;;  %v1379_v19 = vsub.f32 %v6456_v49, %v1337_v18 }
 0x422   :  { %5957 = vpow2.f32 %v1399_v9  ;;  %v1397_v63 = vmul.f32 1.442695, %v1379_v19 }
 0x423   :  { %v1346_v21 = vpop.xlane.xlu0 %1345 }
 0x424   :  { %5959 = vpow2.f32 %v1397_v63  ;;  %v1382_v24 = vsub.f32 %v6460_v17, %v1346_v21 }
 0x426   :  { %v1403_v26 = vmul.f32 1.442695, %v1382_v24 }
 0x427   :  { %v1352_v47 = vpop.xlane.xlu1 %1351  ;;  %v1343_v27 = vpop.xlane.xlu0 %1342 }
 0x428   :  { %5961 = vpow2.f32 %v1403_v26  ;;  %v1384_v28 = vsub.f32 %v6466_v34, %v1352_v47  ;;  %v1381_v29 = vsub.f32 %v6464_v13, %v1343_v27 }
 0x42a   :  { %v1407_v30 = vmul.f32 1.442695, %v1384_v28  ;;  %v1401_v31 = vmul.f32 1.442695, %v1381_v29 }
 0x42b   :  { %v1349_v14 = vpop.xlane.xlu1 %1348  ;;  %v1358_v32 = vpop.xlane.xlu0 %1357 }
 0x42c   :  { %5963 = vpow2.f32 %v1407_v30  ;;  %v1383_v49 = vsub.f32 %v6474_v38, %v1349_v14  ;;  %v1386_v35 = vsub.f32 %v6472_v37, %v1358_v32 }
 0x42d   :  { %5965 = vpow2.f32 %v1401_v31 }
 0x42e   :  { %v1405_v36 = vmul.f32 1.442695, %v1383_v49  ;;  %v1411_v17 = vmul.f32 1.442695, %v1386_v35 }
 0x42f   :  { %v6539_v50 = vpop.eup %5957  ;;  %v1364_v51 = vpop.xlane.xlu1 %1363 }
 0x430   :  { %v1355_v40 = vpop.xlane.xlu0 %1354  ;;  %5967 = vpow2.f32 %v1405_v36  ;;  %v1388_v34 = vsub.f32 %v6482_v33, %v1364_v51  ;;  %v1434_v42 = vsel %vm41_vm1, %v6539_v50, 0.0 }
 0x431   :  { %v1385_v13 = vsub.f32 %v6480_v25, %v1355_v40  ;;  %v6545_v53 = vpop.eup %5959  ;;  %5969 = vpow2.f32 %v1411_v17  ;;  %1435 = vadd.xlane.f32.xlu1 %v1434_v42 }
 0x432   :  { %v1415_v37 = vmul.f32 1.442695, %v1388_v34  ;;  %v1431_v33 = vsel %vm41_vm1, %v6545_v53, 0.0 }
 0x433   :  { %v1409_v38 = vmul.f32 1.442695, %v1385_v13  ;;  %v1361_v54 = vpop.xlane.xlu1 %1360 }
 0x434   :  { %v1370_v44 = vpop.xlane.xlu0 %1369  ;;  %5971 = vpow2.f32 %v1415_v37  ;;  %v1387_v62 = vsub.f32 %v6488_v43, %v1361_v54 }
 0x435   :  { %v1390_v4 = vsub.f32 %v6490_v52, %v1370_v44  ;;  %v6551_v25 = vpop.eup %5961  ;;  %5973 = vpow2.f32 %v1409_v38  ;;  %1432 = vadd.xlane.f32.xlu1 %v1431_v33 }
 0x436   :  { %v1413_v8 = vmul.f32 1.442695, %v1387_v62  ;;  %v1440_v3 = vsel %vm41_vm1, %v6551_v25, 0.0 }
 0x437   :  { %v1419_v10 = vmul.f32 1.442695, %v1390_v4  ;;  %1441 = vadd.xlane.f32.xlu0 %v1440_v3  ;;  %v6597_v49 = vpop.permute.xlu1 %2029 }
 0x438   :  { %v1367_v41 = vpop.xlane.xlu0 %1366  ;;  %5975 = vpow2.f32 %v1413_v8 }
 0x439   :  { %v1389_v57 = vsub.f32 %v6496_v55, %v1367_v41  ;;  %v6556_v43 = vpop.eup %5963  ;;  %5977 = vpow2.f32 %v1419_v10 }
 0x43a   :  { %v6558_v52 = vpop.eup %5965  ;;  %v1446_v11 = vsel %vm41_vm1, %v6556_v43, 0.0 }
 0x43b   :  { %v1417_v58 = vmul.f32 1.442695, %v1389_v57  ;;  %1447 = vadd.xlane.f32.xlu1 %v1446_v11  ;;  %v1437_v45 = vsel %vm41_vm1, %v6558_v52, 0.0 }
 0x43c   :  { %v1376_v60 = vpop.xlane.xlu0 %1375  ;;  %1438 = vadd.xlane.f32.xlu0 %v1437_v45 }
 0x43d   :  { %5979 = vpow2.f32 %v1417_v58  ;;  %v1392_v12 = vsub.f32 %v6500_v56, %v1376_v60  ;;  %v6565_v18 = vpop.eup %5967 }
 0x43e   :  { %v6567_v55 = vpop.eup %5969  ;;  %v1443_v19 = vsel %vm41_vm1, %v6565_v18, 0.0 }
 0x43f   :  { %v1423_v9 = vmul.f32 1.442695, %v1392_v12  ;;  %1444 = vadd.xlane.f32.xlu1 %v1443_v19  ;;  %v1452_v63 = vsel %vm41_vm1, %v6567_v55, 0.0 }
 0x440   :  { %1453 = vadd.xlane.f32.xlu0 %v1452_v63  ;;  %v6608_v34 = vpop.permute.xlu0 %1942 }
 0x441   :  { %5981 = vpow2.f32 %v1423_v9  ;;  %v6573_v21 = vpop.eup %5971 }
 0x442   :  { %v6575_v24 = vpop.eup %5973  ;;  %v1458_v56 = vsel %vm41_vm1, %v6573_v21, 0.0 }
 0x443   :  { %1459 = vadd.xlane.f32.xlu1 %v1458_v56  ;;  %v1449_v26 = vsel %vm41_vm1, %v6575_v24, 0.0 }
 0x444   :  { %1450 = vadd.xlane.f32.xlu0 %v1449_v26  ;;  %v6610_v13 = vpop.permute.xlu0 %1940 }
 0x445   :  { %v6581_v47 = vpop.eup %5975 }
 0x446   :  { %v6583_v27 = vpop.eup %5977  ;;  %v1455_v28 = vsel %vm41_vm1, %v6581_v47, 0.0 }
 0x447   :  { %1456 = vadd.xlane.f32.xlu1 %v1455_v28  ;;  %v1464_v29 = vsel %vm41_vm1, %v6583_v27, 0.0 }
 0x448   :  { %1465 = vadd.xlane.f32.xlu0 %v1464_v29 }
 0x44a   :  { %v6589_v30 = vpop.eup %5979 }
 0x44b   :  { %v1461_v31 = vsel %vm41_vm1, %v6589_v30, 0.0 }
 0x44c   :  { %1462 = vadd.xlane.f32.xlu0 %v1461_v31 }
 0x44e   :  { %v6593_v14 = vpop.eup %5981 }
 0x44f   :  { %v1470_v32 = vsel %vm41_vm1, %v6593_v14, 0.0 }
 0x450   :  { %1471 = vadd.xlane.f32.xlu0 %v1470_v32 }
 0x466   :  { %2116 = vrot.lane.b32.xlu0 %v6438_v48, %s6192_s26 }
 0x468   :  { %v1373_v35 = vpop.xlane.xlu1 %1372 }
 0x469   :  { %v1391_v36 = vsub.f32 %v6510_v0, %v1373_v35 }
 0x46b   :  { %v1421_v17 = vmul.f32 1.442695, %v1391_v36 }
 0x46c   :  { %v6612_v42 = vpop.permute.xlu1 %2027 }
 0x46d   :  { %5983 = vpow2.f32 %v1421_v17 }
 0x47a   :  { %v6602_v51 = vpop.eup %5983 }
 0x47b   :  { %v1467_v40 = vsel %vm41_vm1, %v6602_v51, 0.0 }
 0x47c   :  { %1468 = vadd.xlane.f32.xlu1 %v1467_v40 }
 0x48d   :  { %2114 = vrot.lane.b32.xlu1 %v6436_v20, %s6192_s26 }
 0x4a6   :  { %v1430_v48 = vpop.xlane.xlu0 %1429 }
 0x4a7   :  { %5985 = vrcp.f32 %v1430_v48  ;;  %v2264_v48 = vld [vmem:[#allocation5 + $0x78] sm:$0xff] }
 0x4a8   :  { %v1427_v0 = vpop.xlane.xlu1 %1426 }
 0x4a9   :  { %5987 = vrcp.f32 %v1427_v0 }
 0x4b4   :  { %v5986_v37 = vpop.eup %5985 }
 0x4b5   :  { %v1490_v44 = vmul.f32 %v5986_v37, %v6524_v46  ;;  %v2262_v37 = vld [vmem:[#allocation5 + $0x68] sm:$0xff] }
 0x4b6   :  { %v5988_v38 = vpop.eup %5987 }
 0x4b7   :  { %v1489_v54 = vmul.f32 %v5988_v38, %v6528_v15 }
 0x4b9   :  { %5636 = vmatprep.mubr.msk.f32.mxu1 %vm41_vm1, %v1489_v54 }
 0x4ba   :  { %v1436_v62 = vpop.xlane.xlu1 %1435  ;;  %5637 = vmatmul.mubr.msk.f32.vlgmr.msra.gmra.mxu1 %vm41_vm1, %v1490_v44 }
 0x4bb   :  { %5640 = vmatpush3.msra.mxu1 %v6444_v22  ;;  %5989 = vrcp.f32 %v1436_v62 }
 0x4bc   :  { %5641 = vmatprep.subr.mxu1 %v6516_v59 }
 0x4bd   :  { %5642 = vmatpush3.msra.mxu1 %v6516_v59 }
 0x4be   :  { %5653 = vmatprep.subr.mxu1 %v6518_v5  ;;  %v1433_v20 = vpop.xlane.xlu1 %1432 }
 0x4bf   :  { %5991 = vrcp.f32 %v1433_v20 }
 0x4c0   :  { %v1442_v4 = vpop.xlane.xlu0 %1441 }
 0x4c1   :  { %5993 = vrcp.f32 %v1442_v4 }
 0x4c4   :  { %v1448_v15 = vpop.xlane.xlu1 %1447 }
 0x4c5   :  { %v1439_v46 = vpop.xlane.xlu0 %1438 }
 0x4c6   :  { %5995 = vrcp.f32 %v1439_v46 }
 0x4c7   :  { %5997 = vrcp.f32 %v1448_v15 }
 0x4c8   :  { %v1445_v33 = vpop.xlane.xlu1 %1444  ;;  %v5990_v10 = vpop.eup %5989 }
 0x4c9   :  { %5999 = vrcp.f32 %v1445_v33  ;;  %v1454_v8 = vpop.xlane.xlu0 %1453  ;;  %v1492_v57 = vmul.f32 %v5990_v10, %v6539_v50 }
 0x4ca   :  { %6001 = vrcp.f32 %v1454_v8 }
 0x4cc   :  { %v5992_v22 = vpop.eup %5991  ;;  %v1460_v3 = vpop.xlane.xlu1 %1459 }
 0x4cd   :  { %v1451_v41 = vpop.xlane.xlu0 %1450  ;;  %v1491_v59 = vmul.f32 %v5992_v22, %v6545_v53 }
 0x4ce   :  { %6003 = vrcp.f32 %v1451_v41  ;;  %v5994_v45 = vpop.eup %5993 }
 0x4cf   :  { %5643 = vmatprep.mubr.msk.f32.mxu1 %vm41_vm1, %v1491_v59  ;;  %6005 = vrcp.f32 %v1460_v3  ;;  %v1494_v9 = vmul.f32 %v5994_v45, %v6551_v25 }
 0x4d0   :  { %v1457_v58 = vpop.xlane.xlu1 %1456  ;;  %5644 = vmatmul.mubr.msk.f32.vlgmr.msra.gmra.mxu1 %vm41_vm1, %v1492_v57 }
 0x4d1   :  { %6007 = vrcp.f32 %v1457_v58  ;;  %5654 = vmatpush3.msra.mxu1 %v6518_v5  ;;  %v1466_v11 = vpop.xlane.xlu0 %1465 }
 0x4d2   :  { %5655 = vmatprep.subr.mxu1 %v6522_v7  ;;  %6009 = vrcp.f32 %v1466_v11 }
 0x4d3   :  { %v5996_v60 = vpop.eup %5995  ;;  %5656 = vmatpush3.msra.mxu1 %v6522_v7 }
 0x4d4   :  { %5667 = vmatprep.subr.mxu1 %v6608_v34  ;;  %v1493_v50 = vmul.f32 %v5996_v60, %v6558_v52  ;;  %v5998_v53 = vpop.eup %5997 }
 0x4d5   :  { %v1463_v12 = vpop.xlane.xlu0 %1462  ;;  %v1496_v7 = vmul.f32 %v5998_v53, %v6556_v43 }
 0x4d6   :  { %v6000_v19 = vpop.eup %5999  ;;  %6011 = vrcp.f32 %v1463_v12  ;;  %5650 = vmatprep.mubr.msk.f32.mxu0 %vm41_vm1, %v1493_v50 }
 0x4d7   :  { %5651 = vmatmul.mubr.msk.f32.vlgmr.msra.gmra.mxu0 %vm41_vm1, %v1494_v9  ;;  %v1495_v5 = vmul.f32 %v6000_v19, %v6565_v18  ;;  %v6002_v63 = vpop.eup %6001 }
 0x4d8   :  { %5661 = vmatpush3.msra.mxu0 %v6447_v16  ;;  %v1498_v56 = vmul.f32 %v6002_v63, %v6567_v55 }
 0x4d9   :  { %5662 = vmatprep.subr.mxu0 %v6520_v6  ;;  %5657 = vmatprep.mubr.msk.f32.mxu1 %vm41_vm1, %v1495_v5  ;;  %v1472_v52 = vpop.xlane.xlu0 %1471 }
 0x4da   :  { %5663 = vmatpush3.msra.mxu0 %v6520_v6  ;;  %5658 = vmatmul.mubr.msk.f32.vlgmr.msra.gmra.mxu1 %vm41_vm1, %v1496_v7  ;;  %6013 = vrcp.f32 %v1472_v52 }
 0x4db   :  { %v6004_v25 = vpop.eup %6003  ;;  %5668 = vmatpush3.msra.mxu1 %v6608_v34  ;;  %5674 = vmatprep.subr.mxu0 %v6597_v49  ;;  %v2265_v34 = vld [vmem:[#allocation5 + $0x80] sm:$0xff] }
 0x4dc   :  { %5669 = vmatprep.subr.mxu1 %v6610_v13  ;;  %v1497_v16 = vmul.f32 %v6004_v25, %v6575_v24  ;;  %v6006_v43 = vpop.eup %6005 }
 0x4dd   :  { %5670 = vmatpush3.msra.mxu1 %v6610_v13  ;;  %v2117_v18 = vpop.permute.xlu0 %2116  ;;  %v1500_v28 = vmul.f32 %v6006_v43, %v6573_v21 }
 0x4de   :  { %v6008_v26 = vpop.eup %6007  ;;  %5664 = vmatprep.mubr.msk.f32.mxu0 %vm41_vm1, %v1497_v16  ;;  %5681 = vmatprep.subr.mxu1 %v2117_v18 }
 0x4df   :  { %5665 = vmatmul.mubr.msk.f32.vlgmr.msra.gmra.mxu0 %vm41_vm1, %v1498_v56  ;;  %v1499_v6 = vmul.f32 %v6008_v26, %v6581_v47  ;;  %v6010_v24 = vpop.eup %6009 }
 0x4e0   :  { %5675 = vmatpush3.msra.mxu0 %v6597_v49  ;;  %v1502_v31 = vmul.f32 %v6010_v24, %v6583_v27 }
 0x4e1   :  { %5676 = vmatprep.subr.mxu0 %v6612_v42  ;;  %5671 = vmatprep.mubr.msk.f32.mxu1 %vm41_vm1, %v1499_v6 }
 0x4e2   :  { %5677 = vmatpush3.msra.mxu0 %v6612_v42  ;;  %5672 = vmatmul.mubr.msk.f32.vlgmr.msra.gmra.mxu1 %vm41_vm1, %v1500_v28 }
 0x4e3   :  { %v6012_v55 = vpop.eup %6011  ;;  %5682 = vmatpush3.msra.mxu1 %v2117_v18  ;;  %5688 = vmatprep.subr.mxu0 %v2265_v34  ;;  %v5237_v18 = vld [vmem:[#allocation5 + $0x88] ss:$0 sm:$0xff] }
 0x4e4   :  { %v1501_v29 = vmul.f32 %v6012_v55, %v6589_v30 }
 0x4e6   :  { %5678 = vmatprep.mubr.msk.f32.mxu0 %vm41_vm1, %v1501_v29 }
 0x4e7   :  { %5679 = vmatmul.mubr.msk.f32.vlgmr.msra.gmra.mxu0 %vm41_vm1, %v1502_v31  ;;  %v6014_v32 = vpop.eup %6013 }
 0x4e8   :  { %v1504_v36 = vmul.f32 %v6014_v32, %v6593_v14  ;;  %5689 = vmatpush3.msra.mxu0 %v2265_v34  ;;  %v2263_v14 = vld [vmem:[#allocation5 + $0x70] sm:$0xff] }
 0x4e9   :  { %5690 = vmatprep.subr.mxu0 %v2264_v48 }
 0x4ea   :  { %5691 = vmatpush3.msra.mxu0 %v2264_v48 }
 0x4eb   :  { %5692 = vmatprep.subr.mxu0 %v2263_v14 }
 0x4ec   :  { %5693 = vmatpush3.msra.mxu0 %v2263_v14  ;;  %v2445_v14 = vld [vmem:[#allocation5 + $0xb0] sm:$0xff] }
 0x4ed   :  { %5694 = vmatprep.subr.mxu0 %v2262_v37 }
 0x4ee   :  { %5695 = vmatpush3.msra.mxu0 %v2262_v37  ;;  %v2443_v37 = vld [vmem:[#allocation5 + $0xa0] sm:$0xff] }
 0x505   :  { %v1469_v21 = vpop.xlane.xlu1 %1468 }
 0x506   :  { %6015 = vrcp.f32 %v1469_v21 }
 0x509   :  { %v2115_v47 = vpop.permute.xlu1 %2114 }
 0x50a   :  { %5683 = vmatprep.subr.mxu1 %v2115_v47 }
 0x50b   :  { %5684 = vmatpush3.msra.mxu1 %v2115_v47 }
 0x513   :  { %v6016_v49 = vpop.eup %6015 }
 0x514   :  { %v1503_v35 = vmul.f32 %v6016_v49, %v6602_v51 }
 0x516   :  { %5685 = vmatprep.mubr.msk.f32.mxu1 %vm41_vm1, %v1503_v35 }
 0x517   :  { %5686 = vmatmul.mubr.msk.f32.vlgmr.msra.gmra.mxu1 %vm41_vm1, %v1504_v36 }
 0x57a   :  { %v5638_v27 = vpop.f32.mrf.mxu1 }
 0x57c   :  { %v1583_v30 = vpop.f32.mrf.mxu1 }
 0x590   :  { %v5645_v17 = vpop.f32.mrf.mxu1 }
 0x592   :  { %v1670_v13 = vpop.f32.mrf.mxu1 }
 0x597   :  { %v5652_v40 = vpop.f32.mrf.mxu0 }
 0x598   :  { %2207 = vrot.lane.b32.xlu1 %v5652_v40, %s6182_s18 }
 0x599   :  { %v1757_v42 = vpop.f32.mrf.mxu0 }
 0x59a   :  { %v5659_v0 = vpop.f32.mrf.mxu1  ;;  %2205 = vrot.lane.b32.xlu0 %v1757_v42, %s6182_s18 }
 0x59c   :  { %v1844_v51 = vpop.f32.mrf.mxu1  ;;  %2211 = vrot.lane.b32.xlu1 %v5659_v0, %s6182_s18 }
 0x59e   :  { %2209 = vrot.lane.b32.xlu0 %v1844_v51, %s6182_s18  ;;  %v2444_v51 = vld [vmem:[#allocation5 + $0xa8] sm:$0xff] }
 0x59f   :  { %v5666_v38 = vpop.f32.mrf.mxu0 }
 0x5a0   :  { %2223 = vrot.lane.b32.xlu1 %v5666_v38, %s6193_s27 }
 0x5a1   :  { %v1931_v54 = vpop.f32.mrf.mxu0 }
 0x5a2   :  { %v5673_v44 = vpop.f32.mrf.mxu1  ;;  %2221 = vrot.lane.b32.xlu0 %v1931_v54, %s6193_s27 }
 0x5a4   :  { %v2018_v62 = vpop.f32.mrf.mxu1  ;;  %2227 = vrot.lane.b32.xlu1 %v5673_v44, %s6193_s27 }
 0x5a6   :  { %2225 = vrot.lane.b32.xlu0 %v2018_v62, %s6193_s27 }
 0x5a7   :  { %v5680_v20 = vpop.f32.mrf.mxu0 }
 0x5a8   :  { %2239 = vrot.lane.b32.xlu1 %v5680_v20, %s6194_s28 }
 0x5a9   :  { %v2105_v4 = vpop.f32.mrf.mxu0 }
 0x5aa   :  { %2237 = vrot.lane.b32.xlu0 %v2105_v4, %s6194_s28 }
 0x5d7   :  { %v5687_v15 = vpop.f32.mrf.mxu1 }
 0x5d8   :  { %2243 = vrot.lane.b32.xlu1 %v5687_v15, %s6194_s28 }
 0x5d9   :  { %v2192_v46 = vpop.f32.mrf.mxu1 }
 0x5da   :  { %2241 = vrot.lane.b32.xlu0 %v2192_v46, %s6194_s28 }
 0x60a   :  { %v2208_v33 = vpop.permute.xlu1 %2207 }
 0x60b   :  { %v2250_v45 = vsel %vm610_vm3, %v5638_v27, %v2208_v33 }
 0x60c   :  { %v2206_v8 = vpop.permute.xlu0 %2205 }
 0x60d   :  { %v2249_v58 = vsel %vm610_vm3, %v1583_v30, %v2206_v8 }
 0x60e   :  { %v2212_v10 = vpop.permute.xlu1 %2211 }
 0x60f   :  { %v2252_v7 = vsel %vm610_vm3, %v5645_v17, %v2212_v10  ;;  %v2560_v10 = vld [vmem:[#allocation5 + $0x100] sm:$0xff] }
 0x610   :  { %v2210_v22 = vpop.permute.xlu0 %2209  ;;  %5716 = vmatprep.subr.mxu0 %v2560_v10 }
 0x611   :  { %v2251_v19 = vsel %vm610_vm3, %v1670_v13, %v2210_v22  ;;  %v2559_v22 = vld [vmem:[#allocation5 + $0xf8] sm:$0xff] }
 0x612   :  { %v2224_v3 = vpop.permute.xlu1 %2223 }
 0x613   :  { %v2254_v53 = vsel %vm41_vm1, %v2250_v45, %v2224_v3  ;;  %v2558_v3 = vld [vmem:[#allocation5 + $0xf0] sm:$0xff] }
 0x614   :  { %v2222_v41 = vpop.permute.xlu0 %2221 }
 0x615   :  { %v2253_v60 = vsel %vm41_vm1, %v2249_v58, %v2222_v41  ;;  %v2557_v41 = vld [vmem:[#allocation5 + $0xe8] sm:$0xff] }
 0x616   :  { %v2228_v59 = vpop.permute.xlu1 %2227 }
 0x617   :  { %v2256_v25 = vsel %vm41_vm1, %v2252_v7, %v2228_v59  ;;  %v5243_v7 = vld [vmem:[#allocation5 + $0x98] ss:$0 sm:$0xff] }
 0x618   :  { %v2226_v57 = vpop.permute.xlu0 %2225 }
 0x619   :  { %v2255_v52 = vsel %vm41_vm1, %v2251_v19, %v2226_v57 }
 0x61a   :  { %v2240_v11 = vpop.permute.xlu1 %2239 }
 0x61b   :  { %v2259_v9 = vsel %vm2257_vm4, %v2254_v53, %v2240_v11  ;;  %v5242_v53 = vld [vmem:[#allocation5 + $0x90] ss:$0 sm:$0xff] }
 0x61c   :  { %v2238_v50 = vpop.permute.xlu0 %2237 }
 0x61d   :  { %v2258_v12 = vsel %vm2257_vm4, %v2253_v60, %v2238_v50 }
 0x61e   :  { %5696 = vmatprep.mubr.msk.f32.mxu0 %vm506_vm2, %v2258_v12 }
 0x61f   :  { %5697 = vmatmul.mubr.msk.f32.vlgmr.msra.gmra.mxu0 %vm506_vm2, %v2259_v9 }
 0x620   :  { %5717 = vmatpush3.msra.mxu0 %v2560_v10 }
 0x621   :  { %5718 = vmatprep.subr.mxu0 %v2559_v22 }
 0x622   :  { %5719 = vmatpush3.msra.mxu0 %v2559_v22 }
 0x623   :  { %5720 = vmatprep.subr.mxu0 %v2558_v3 }
 0x624   :  { %5721 = vmatpush3.msra.mxu0 %v2558_v3 }
 0x625   :  { %5722 = vmatprep.subr.mxu0 %v2557_v41 }
 0x626   :  { %5723 = vmatpush3.msra.mxu0 %v2557_v41 }
 0x64a   :  { %v2244_v5 = vpop.permute.xlu1 %2243 }
 0x64b   :  { %v2261_v43 = vsel %vm2257_vm4, %v2256_v25, %v2244_v5 }
 0x64c   :  { %v2242_v63 = vpop.permute.xlu0 %2241 }
 0x64d   :  { %v2260_v16 = vsel %vm2257_vm4, %v2255_v52, %v2242_v63 }
 0x64e   :  { %5699 = vmatprep.mubr.msk.f32.mxu0 %vm506_vm2, %v2260_v16 }
 0x64f   :  { %5700 = vmatmul.mubr.msk.f32.gmra.mxu0 %vm506_vm2, %v2261_v43 }
 0x6df   :  { %v5698_v56 = vpop.f32.mrf.mxu0 }
 0x6e0   :  { %v2355_v26 = vadd.f32 %v5698_v56, %v5237_v18 }
 0x6e1   :  { %v2349_v6 = vpop.f32.mrf.mxu0 }
 0x6e2   :  { %v2369_v28 = vadd.f32 %v2355_v26, %v6312_v23  ;;  %v2350_v24 = vadd.f32 %v5237_v18, %v2349_v6 }
 0x6e4   :  { %v2368_v55 = vadd.f32 %v2350_v24, %v6303_v61  ;;  %v2377_v29 = vsel %vm506_vm2, %v2369_v28, 0.0 }
 0x6e5   :  { %2378 = vadd.xlane.f32.xlu1 %v2377_v29 }
 0x6e6   :  { %v2374_v31 = vsel %vm506_vm2, %v2368_v55, 0.0 }
 0x6e7   :  { %2375 = vadd.xlane.f32.xlu0 %v2374_v31 }
 0x70f   :  { %v5701_v21 = vpop.f32.mrf.mxu0 }
 0x710   :  { %v2365_v32 = vadd.f32 %v5701_v21, %v5237_v18 }
 0x711   :  { %v2359_v47 = vpop.f32.mrf.mxu0 }
 0x712   :  { %v2360_v49 = vadd.f32 %v5237_v18, %v2359_v47  ;;  %v2371_v36 = vadd.f32 %v2365_v32, %v6323_v2  ;;  %v2446_v2 = vld [vmem:[#allocation5 + $0xb8] sm:$0xff] }
 0x713   :  { %5702 = vmatprep.subr.mxu1 %v2446_v2 }
 0x714   :  { %v2370_v35 = vadd.f32 %v2360_v49, %v6321_v39  ;;  %v2383_v23 = vsel %vm506_vm2, %v2371_v36, 0.0  ;;  %5703 = vmatpush3.msra.mxu1 %v2446_v2  ;;  %v2556_v49 = vld [vmem:[#allocation5 + $0xe0] sm:$0xff] }
 0x715   :  { %5704 = vmatprep.subr.mxu1 %v2445_v14  ;;  %5724 = vmatprep.subr.mxu0 %v2556_v49 }
 0x716   :  { %v2380_v27 = vsel %vm506_vm2, %v2370_v35, 0.0  ;;  %5705 = vmatpush3.msra.mxu1 %v2445_v14  ;;  %5725 = vmatpush3.msra.mxu0 %v2556_v49 }
 0x717   :  { %2381 = vadd.xlane.f32.xlu0 %v2380_v27  ;;  %5706 = vmatprep.subr.mxu1 %v2444_v51  ;;  %v2553_v27 = vld [vmem:[#allocation5 + $0xc8] sm:$0xff] }
 0x718   :  { %5707 = vmatpush3.msra.mxu1 %v2444_v51  ;;  %v5249_v51 = vld [vmem:[#allocation5 + $0x108] ss:$0 sm:$0xff] }
 0x719   :  { %5708 = vmatprep.subr.mxu1 %v2443_v37 }
 0x71a   :  { %5709 = vmatpush3.msra.mxu1 %v2443_v37 }
 0x71b   :  { %2384 = vadd.xlane.f32.xlu0 %v2383_v23  ;;  %v5244_v23 = vld [vmem:[#allocation5 + $0xc0] ss:$0 sm:$0xff] }
 0x76e   :  { %v2379_v61 = vpop.xlane.xlu1 %2378 }
 0x76f   :  { %v2388_v30 = vmul.f32 0.03125, %v2379_v61 }
 0x770   :  { %v2376_v17 = vpop.xlane.xlu0 %2375 }
 0x771   :  { %v2392_v40 = vsub.f32 %v2369_v28, %v2388_v30  ;;  %v2387_v34 = vmul.f32 0.03125, %v2376_v17 }
 0x773   :  { %v2391_v13 = vsub.f32 %v2368_v55, %v2387_v34  ;;  %v2396_v42 = vmul.f32 %v2392_v40, %v2392_v40 }
 0x775   :  { %v2402_v48 = vsel %vm506_vm2, %v2396_v42, 0.0  ;;  %v2395_v0 = vmul.f32 %v2391_v13, %v2391_v13 }
 0x776   :  { %2403 = vadd.xlane.f32.xlu0 %v2402_v48 }
 0x777   :  { %v2399_v39 = vsel %vm506_vm2, %v2395_v0, 0.0 }
 0x778   :  { %2400 = vadd.xlane.f32.xlu1 %v2399_v39 }
 0x7a0   :  { %v2382_v38 = vpop.xlane.xlu0 %2381 }
 0x7a1   :  { %v2389_v54 = vmul.f32 0.03125, %v2382_v38 }
 0x7a3   :  { %v2393_v44 = vsub.f32 %v2370_v35, %v2389_v54  ;;  %v2555_v35 = vld [vmem:[#allocation5 + $0xd8] sm:$0xff] }
 0x7a4   :  { %v2385_v62 = vpop.xlane.xlu0 %2384  ;;  %5726 = vmatprep.subr.mxu0 %v2555_v35 }
 0x7a5   :  { %v2390_v20 = vmul.f32 0.03125, %v2385_v62  ;;  %v2397_v4 = vmul.f32 %v2393_v44, %v2393_v44  ;;  %5727 = vmatpush3.msra.mxu0 %v2555_v35 }
 0x7a7   :  { %v2394_v15 = vsub.f32 %v2371_v36, %v2390_v20  ;;  %v2405_v46 = vsel %vm506_vm2, %v2397_v4, 0.0  ;;  %v2554_v36 = vld [vmem:[#allocation5 + $0xd0] sm:$0xff] }
 0x7a8   :  { %2406 = vadd.xlane.f32.xlu1 %v2405_v46  ;;  %5728 = vmatprep.subr.mxu0 %v2554_v36 }
 0x7a9   :  { %v2398_v33 = vmul.f32 %v2394_v15, %v2394_v15  ;;  %5729 = vmatpush3.msra.mxu0 %v2554_v36 }
 0x7aa   :  { %5730 = vmatprep.subr.mxu0 %v2553_v27 }
 0x7ab   :  { %v2408_v8 = vsel %vm506_vm2, %v2398_v33, 0.0  ;;  %5731 = vmatpush3.msra.mxu0 %v2553_v27  ;;  %v5254_v27 = vld [vmem:[#allocation5 + $0x110] ss:$0 sm:$0xff] }
 0x7ac   :  { %2409 = vadd.xlane.f32.xlu0 %v2408_v8 }
 0x7ff   :  { %v2404_v59 = vpop.xlane.xlu0 %2403 }
 0x800   :  { %v2412_v57 = vmul.f32 0.03125, %v2404_v59 }
 0x801   :  { %v2401_v58 = vpop.xlane.xlu1 %2400 }
 0x802   :  { %v2416_v11 = vadd.f32 1e-05, %v2412_v57  ;;  %v2411_v45 = vmul.f32 0.03125, %v2401_v58 }
 0x804   :  { %6017 = vrsqrt.f32 %v2416_v11  ;;  %v2415_v60 = vadd.f32 1e-05, %v2411_v45 }
 0x806   :  { %6019 = vrsqrt.f32 %v2415_v60 }
 0x811   :  { %v6018_v50 = vpop.eup %6017 }
 0x812   :  { %v2424_v12 = vmul.f32 %v6018_v50, %v2392_v40 }
 0x813   :  { %v6020_v9 = vpop.eup %6019 }
 0x814   :  { %v2423_v19 = vmul.f32 %v6020_v9, %v2391_v13  ;;  %v2432_v5 = vmul.f32 %v5242_v53, %v2424_v12 }
 0x816   :  { %v2431_v52 = vmul.f32 %v5242_v53, %v2423_v19  ;;  %v2440_v25 = vadd.f32 %v5243_v7, %v2432_v5  ;;  %v2741_v5 = vld [vmem:[#allocation5 + $0x138] sm:$0xff] }
 0x817   :  { %5738 = vmatprep.subr.mxu1 %v2741_v5 }
 0x818   :  { %v2439_v63 = vadd.f32 %v5243_v7, %v2431_v52  ;;  %v2739_v52 = vld [vmem:[#allocation5 + $0x128] sm:$0xff] }
 0x81a   :  { %5710 = vmatprep.mubr.msk.f32.mxu1 %vm506_vm2, %v2439_v63 }
 0x81b   :  { %5711 = vmatmul.mubr.msk.f32.vlgmr.msra.gmra.mxu1 %vm506_vm2, %v2440_v25 }
 0x81c   :  { %5739 = vmatpush3.msra.mxu1 %v2741_v5 }
 0x831   :  { %v2407_v16 = vpop.xlane.xlu1 %2406 }
 0x832   :  { %v2413_v43 = vmul.f32 0.03125, %v2407_v16 }
 0x834   :  { %v2417_v18 = vadd.f32 1e-05, %v2413_v43 }
 0x835   :  { %v2410_v56 = vpop.xlane.xlu0 %2409 }
 0x836   :  { %6021 = vrsqrt.f32 %v2417_v18  ;;  %v2414_v26 = vmul.f32 0.03125, %v2410_v56 }
 0x838   :  { %v2418_v6 = vadd.f32 1e-05, %v2414_v26 }
 0x83a   :  { %6023 = vrsqrt.f32 %v2418_v6 }
 0x843   :  { %v6022_v28 = vpop.eup %6021 }
 0x844   :  { %v2425_v24 = vmul.f32 %v6022_v28, %v2393_v44 }
 0x846   :  { %v2433_v55 = vmul.f32 %v5242_v53, %v2425_v24 }
 0x847   :  { %v6024_v29 = vpop.eup %6023 }
 0x848   :  { %v2441_v31 = vadd.f32 %v5243_v7, %v2433_v55  ;;  %v2426_v21 = vmul.f32 %v6024_v29, %v2394_v15 }
 0x84a   :  { %5713 = vmatprep.mubr.msk.f32.mxu1 %vm506_vm2, %v2441_v31  ;;  %v2434_v47 = vmul.f32 %v5242_v53, %v2426_v21 }
 0x84c   :  { %v2442_v32 = vadd.f32 %v5243_v7, %v2434_v47  ;;  %v2740_v7 = vld [vmem:[#allocation5 + $0x130] sm:$0xff] }
 0x84d   :  { %5740 = vmatprep.subr.mxu1 %v2740_v7 }
 0x84e   :  { %5714 = vmatmul.mubr.msk.f32.gmra.mxu1 %vm506_vm2, %v2442_v32 }
 0x84f   :  { %5741 = vmatpush3.msra.mxu1 %v2740_v7 }
 0x850   :  { %5742 = vmatprep.subr.mxu1 %v2739_v52 }
 0x851   :  { %5743 = vmatpush3.msra.mxu1 %v2739_v52 }
 0x8db   :  { %v5712_v61 = vpop.f32.mrf.mxu1 }
 0x8dc   :  { %v2536_v30 = vadd.f32 %v5712_v61, %v5244_v23 }
 0x8dd   :  { %v2530_v17 = vpop.f32.mrf.mxu1 }
 0x8de   :  { %v2531_v40 = vadd.f32 %v5244_v23, %v2530_v17  ;;  %v2550_v13 = vmax.f32 %v2536_v30, 0.0  ;;  %v5255_v17 = vld [vmem:[#allocation5 + $0x118] ss:$0 sm:$0xff] }
 0x8e0   :  { %v2549_v34 = vmax.f32 %v2531_v40, 0.0 }
 0x8e2   :  { %5732 = vmatprep.mubr.msk.f32.mxu0 %vm2566_vm5, %v2549_v34 }
 0x8e3   :  { %5733 = vmatmul.mubr.msk.f32.vlgmr.msra.gmra.mxu0 %vm2566_vm5, %v2550_v13 }
 0x90e   :  { %v5715_v42 = vpop.f32.mrf.mxu1 }
 0x90f   :  { %v2546_v48 = vadd.f32 %v5715_v42, %v5244_v23 }
 0x910   :  { %v2540_v0 = vpop.f32.mrf.mxu1 }
 0x911   :  { %v2541_v39 = vadd.f32 %v5244_v23, %v2540_v0  ;;  %v2552_v14 = vmax.f32 %v2546_v48, 0.0 }
 0x913   :  { %v2551_v2 = vmax.f32 %v2541_v39, 0.0 }
 0x915   :  { %5735 = vmatprep.mubr.msk.f32.mxu0 %vm2566_vm5, %v2551_v2 }
 0x916   :  { %5736 = vmatmul.mubr.msk.f32.gmra.mxu0 %vm2566_vm5, %v2552_v14 }
 0x9a3   :  { %v5734_v37 = vpop.f32.mrf.mxu0 }
 0x9a4   :  { %v2651_v38 = vadd.f32 %v5734_v37, %v5249_v51 }
 0x9a5   :  { %v2645_v54 = vpop.f32.mrf.mxu0 }
 0x9a6   :  { %v2665_v44 = vadd.f32 %v2651_v38, %v2440_v25  ;;  %v2646_v62 = vadd.f32 %v5249_v51, %v2645_v54 }
 0x9a8   :  { %v2664_v20 = vadd.f32 %v2646_v62, %v2439_v63  ;;  %v2673_v4 = vsel %vm506_vm2, %v2665_v44, 0.0  ;;  %v2738_v63 = vld [vmem:[#allocation5 + $0x120] sm:$0xff] }
 0x9a9   :  { %2674 = vadd.xlane.f32.xlu0 %v2673_v4  ;;  %5744 = vmatprep.subr.mxu1 %v2738_v63 }
 0x9aa   :  { %v2670_v15 = vsel %vm506_vm2, %v2664_v20, 0.0  ;;  %5745 = vmatpush3.msra.mxu1 %v2738_v63 }
 0x9ab   :  { %2671 = vadd.xlane.f32.xlu1 %v2670_v15  ;;  %v5256_v15 = vld [vmem:[#allocation5 + $0x140] ss:$0 sm:$0xff] }
 0x9d6   :  { %v5737_v46 = vpop.f32.mrf.mxu0 }
 0x9d7   :  { %v2661_v33 = vadd.f32 %v5737_v46, %v5249_v51 }
 0x9d8   :  { %v2655_v8 = vpop.f32.mrf.mxu0 }
 0x9d9   :  { %v2667_v10 = vadd.f32 %v2661_v33, %v2442_v32  ;;  %v2656_v22 = vadd.f32 %v5249_v51, %v2655_v8 }
 0x9db   :  { %v2666_v3 = vadd.f32 %v2656_v22, %v2441_v31  ;;  %v2679_v41 = vsel %vm506_vm2, %v2667_v10, 0.0 }
 0x9dc   :  { %2680 = vadd.xlane.f32.xlu0 %v2679_v41 }
 0x9dd   :  { %v2676_v59 = vsel %vm506_vm2, %v2666_v3, 0.0 }
 0x9de   :  { %2677 = vadd.xlane.f32.xlu1 %v2676_v59 }
 0xa32   :  { %v2675_v57 = vpop.xlane.xlu0 %2674 }
 0xa33   :  { %v2683_v58 = vmul.f32 0.03125, %v2675_v57 }
 0xa34   :  { %v2672_v11 = vpop.xlane.xlu1 %2671 }
 0xa35   :  { %v2687_v45 = vsub.f32 %v2665_v44, %v2683_v58  ;;  %v2682_v60 = vmul.f32 0.03125, %v2672_v11 }
 0xa37   :  { %v2686_v50 = vsub.f32 %v2664_v20, %v2682_v60  ;;  %v2691_v53 = vmul.f32 %v2687_v45, %v2687_v45 }
 0xa39   :  { %v2697_v12 = vsel %vm506_vm2, %v2691_v53, 0.0  ;;  %v2690_v9 = vmul.f32 %v2686_v50, %v2686_v50 }
 0xa3a   :  { %2698 = vadd.xlane.f32.xlu0 %v2697_v12 }
 0xa3b   :  { %v2694_v19 = vsel %vm506_vm2, %v2690_v9, 0.0 }
 0xa3c   :  { %2695 = vadd.xlane.f32.xlu1 %v2694_v19 }
 0xa65   :  { %v2681_v25 = vpop.xlane.xlu0 %2680 }
 0xa66   :  { %v2685_v16 = vmul.f32 0.03125, %v2681_v25 }
 0xa67   :  { %v2678_v43 = vpop.xlane.xlu1 %2677 }
 0xa68   :  { %v2689_v18 = vsub.f32 %v2667_v10, %v2685_v16  ;;  %v2684_v56 = vmul.f32 0.03125, %v2678_v43 }
 0xa6a   :  { %v2688_v26 = vsub.f32 %v2666_v3, %v2684_v56  ;;  %v2693_v6 = vmul.f32 %v2689_v18, %v2689_v18 }
 0xa6c   :  { %v2703_v28 = vsel %vm506_vm2, %v2693_v6, 0.0  ;;  %v2692_v24 = vmul.f32 %v2688_v26, %v2688_v26 }
 0xa6d   :  { %2704 = vadd.xlane.f32.xlu0 %v2703_v28 }
 0xa6e   :  { %v2700_v55 = vsel %vm506_vm2, %v2692_v24, 0.0 }
 0xa6f   :  { %2701 = vadd.xlane.f32.xlu1 %v2700_v55 }
 0xac3   :  { %v2699_v29 = vpop.xlane.xlu0 %2698 }
 0xac4   :  { %v2707_v31 = vmul.f32 0.03125, %v2699_v29 }
 0xac5   :  { %v2696_v21 = vpop.xlane.xlu1 %2695 }
 0xac6   :  { %v2711_v47 = vadd.f32 1e-05, %v2707_v31  ;;  %v2706_v32 = vmul.f32 0.03125, %v2696_v21 }
 0xac8   :  { %6025 = vrsqrt.f32 %v2711_v47  ;;  %v2710_v49 = vadd.f32 1e-05, %v2706_v32 }
 0xaca   :  { %6027 = vrsqrt.f32 %v2710_v49 }
 0xad5   :  { %v6026_v35 = vpop.eup %6025 }
 0xad6   :  { %v2719_v36 = vmul.f32 %v6026_v35, %v2687_v45 }
 0xad7   :  { %v6028_v23 = vpop.eup %6027 }
 0xad8   :  { %v2718_v61 = vmul.f32 %v6028_v23, %v2686_v50  ;;  %v2727_v30 = vmul.f32 %v5254_v27, %v2719_v36 }
 0xada   :  { %v2726_v40 = vmul.f32 %v5254_v27, %v2718_v61  ;;  %v6722_v13 = vadd.f32 %v5255_v17, %v2727_v30 }
 0xadc   :  { %v6720_v34 = vadd.f32 %v5255_v17, %v2726_v40 }
 0xade   :  { %5746 = vmatprep.mubr.msk.f32.mxu1 %vm506_vm2, %v6720_v34 }
 0xadf   :  { %5747 = vmatmul.mubr.msk.f32.vlgmr.msra.gmra.mxu1 %vm506_vm2, %v6722_v13 }
 0xaf6   :  { %v2705_v42 = vpop.xlane.xlu0 %2704 }
 0xaf7   :  { %v2709_v48 = vmul.f32 0.03125, %v2705_v42 }
 0xaf8   :  { %v2702_v0 = vpop.xlane.xlu1 %2701 }
 0xaf9   :  { %v2713_v39 = vadd.f32 1e-05, %v2709_v48  ;;  %v2708_v2 = vmul.f32 0.03125, %v2702_v0 }
 0xafb   :  { %6029 = vrsqrt.f32 %v2713_v39  ;;  %v2712_v14 = vadd.f32 1e-05, %v2708_v2 }
 0xafd   :  { %6031 = vrsqrt.f32 %v2712_v14 }
 0xb08   :  { %v6030_v51 = vpop.eup %6029 }
 0xb09   :  { %v2721_v37 = vmul.f32 %v6030_v51, %v2689_v18 }
 0xb0a   :  { %v6032_v38 = vpop.eup %6031 }
 0xb0b   :  { %v2720_v54 = vmul.f32 %v6032_v38, %v2688_v26  ;;  %v2729_v44 = vmul.f32 %v5254_v27, %v2721_v37 }
 0xb0d   :  { %v2728_v62 = vmul.f32 %v5254_v27, %v2720_v54  ;;  %v6730_v4 = vadd.f32 %v5255_v17, %v2729_v44 }
 0xb0f   :  { %v6728_v20 = vadd.f32 %v5255_v17, %v2728_v62 }
 0xb11   :  { %5749 = vmatprep.mubr.msk.f32.mxu1 %vm506_vm2, %v6728_v20 }
 0xb12   :  { %5750 = vmatmul.mubr.msk.f32.gmra.mxu1 %vm506_vm2, %v6730_v4 }
 0xb9f   :  { %v5748_v46 = vpop.f32.mrf.mxu1 }
 0xba0   :  { %v2831_v33 = vadd.f32 %v5748_v46, %v5256_v15 }
 0xba1   :  { %v2825_v8 = vpop.f32.mrf.mxu1 }
 0xba2   :  { %v2826_v10 = vadd.f32 %v5256_v15, %v2825_v8  ;;  %3028 = vrot.lane.b32.xlu0 %v2831_v33, %s6187_s21  ;;  %2848 = vrot.lane.b32.xlu1 %v2831_v33, %s6186_s1 }
 0xba4   :  { %5756 = vmatprep.mubr.msk.f32.mxu1 %vm610_vm3, %v2826_v10 }
 0xba6   :  { %3024 = vrot.lane.b32.xlu0 %v2831_v33, %s6188_s22  ;;  %3210 = vrot.lane.b32.xlu1 %v2831_v33, %s6185_s0 }
 0xbaa   :  { %3026 = vrot.lane.b32.xlu1 %v2826_v10, %s6187_s21  ;;  %2846 = vrot.lane.b32.xlu0 %v2826_v10, %s6186_s1 }
 0xbae   :  { %3022 = vrot.lane.b32.xlu1 %v2826_v10, %s6188_s22  ;;  %3208 = vrot.lane.b32.xlu0 %v2826_v10, %s6185_s0 }
 0xbb2   :  { %3204 = vrot.lane.b32.xlu1 %v2826_v10, %s6189_s23 }
 0xbd2   :  { %v5751_v22 = vpop.f32.mrf.mxu1 }
 0xbd3   :  { %v6746_v3 = vadd.f32 %v5751_v22, %v5256_v15 }
 0xbd4   :  { %v2835_v41 = vpop.f32.mrf.mxu1 }
 0xbd5   :  { %v2836_v59 = vadd.f32 %v5256_v15, %v2835_v41  ;;  %3119 = vrot.lane.b32.xlu0 %v6746_v3, %s6187_s21  ;;  %2937 = vrot.lane.b32.xlu1 %v6746_v3, %s6186_s1 }
 0xbd7   :  { %5763 = vmatprep.mubr.msk.f32.mxu0 %vm610_vm3, %v2836_v59 }
 0xbd9   :  { %3115 = vrot.lane.b32.xlu0 %v6746_v3, %s6188_s22  ;;  %3301 = vrot.lane.b32.xlu1 %v6746_v3, %s6185_s0 }
 0xbdd   :  { %3206 = vrot.lane.b32.xlu0 %v2831_v33, %s6189_s23  ;;  %2935 = vrot.lane.b32.xlu1 %v2836_v59, %s6186_s1 }
 0xbe1   :  { %3117 = vrot.lane.b32.xlu0 %v2836_v59, %s6187_s21  ;;  %3392 = vrot.lane.b32.xlu1 %v2831_v33, %s6190_s24 }
 0xbe5   :  { %3390 = vrot.lane.b32.xlu0 %v2826_v10, %s6190_s24  ;;  %3483 = vrot.lane.b32.xlu1 %v6746_v3, %s6190_s24 }
 0xbe9   :  { %3299 = vrot.lane.b32.xlu0 %v2836_v59, %s6185_s0  ;;  %3113 = vrot.lane.b32.xlu1 %v2836_v59, %s6188_s22 }
 0xbed   :  { %3297 = vrot.lane.b32.xlu0 %v6746_v3, %s6189_s23  ;;  %3386 = vrot.lane.b32.xlu1 %v2826_v10, %s6191_s25 }
 0xbf1   :  { %3388 = vrot.lane.b32.xlu0 %v2831_v33, %s6191_s25  ;;  %3295 = vrot.lane.b32.xlu1 %v2836_v59, %s6189_s23 }
 0xbf5   :  { %3477 = vrot.lane.b32.xlu0 %v2836_v59, %s6191_s25  ;;  %3481 = vrot.lane.b32.xlu1 %v2836_v59, %s6190_s24 }
 0xbf9   :  { %3744 = vrot.lane.b32.xlu0 %v2826_v10, %s6192_s26  ;;  %3479 = vrot.lane.b32.xlu1 %v6746_v3, %s6191_s25 }
 0xbfd   :  { %3831 = vrot.lane.b32.xlu0 %v2836_v59, %s6192_s26  ;;  %3746 = vrot.lane.b32.xlu1 %v2831_v33, %s6192_s26 }
 0xc01   :  { %3833 = vrot.lane.b32.xlu1 %v6746_v3, %s6192_s26 }
 0xc14   :  { %v2849_v57 = vpop.permute.xlu1 %2848  ;;  %v3029_v58 = vpop.permute.xlu0 %3028 }
 0xc15   :  { %5752 = vmatprep.subr.msk.mxu1 %vm610_vm3, %v2849_v57 }
 0xc16   :  { %5753 = vmatpush3.xpose.msk.msra.mxu1 %vm610_vm3, %v2849_v57 }
 0xc18   :  { %v3211_v11 = vpop.permute.xlu1 %3210  ;;  %v3025_v45 = vpop.permute.xlu0 %3024 }
 0xc19   :  { %3920 = vrot.lane.b32.xlu1 %v3025_v45, %s6192_s26 }
 0xc1c   :  { %v3027_v60 = vpop.permute.xlu1 %3026  ;;  %v2847_v50 = vpop.permute.xlu0 %2846 }
 0xc1d   :  { %5754 = vmatprep.subr.msk.mxu1 %vm610_vm3, %v2847_v50 }
 0xc1e   :  { %5755 = vmatpush3.xpose.msk.msra.mxu1 %vm610_vm3, %v2847_v50 }
 0xc1f   :  { %5766 = vmatprep.subr.msk.mxu1 %vm610_vm3, %v3029_v58 }
 0xc20   :  { %v3023_v53 = vpop.permute.xlu1 %3022  ;;  %v3209_v9 = vpop.permute.xlu0 %3208 }
 0xc21   :  { %5757 = vmatmul.mubr.msk.f32.vlgmr.msra.gmra.mxu1 %vm610_vm3, %v2831_v33 }
 0xc22   :  { %5767 = vmatpush3.xpose.msk.msra.mxu1 %vm610_vm3, %v3029_v58  ;;  %5770 = vmatprep.mubr.msk.f32.mxu1 %vm610_vm3, %v3023_v53 }
 0xc23   :  { %5768 = vmatprep.subr.msk.mxu1 %vm610_vm3, %v3027_v60 }
 0xc24   :  { %v3205_v12 = vpop.permute.xlu1 %3204 }
 0xc26   :  { %5769 = vmatpush3.xpose.msk.msra.mxu1 %vm610_vm3, %v3027_v60 }
 0xc27   :  { %5780 = vmatprep.subr.msk.mxu1 %vm610_vm3, %v3211_v11 }
 0xc29   :  { %5771 = vmatmul.mubr.msk.f32.vlgmr.msra.gmra.mxu1 %vm610_vm3, %v3025_v45 }
 0xc2a   :  { %5781 = vmatpush3.xpose.msk.msra.mxu1 %vm610_vm3, %v3211_v11  ;;  %5784 = vmatprep.mubr.msk.f32.mxu1 %vm610_vm3, %v3205_v12 }
 0xc2b   :  { %5782 = vmatprep.subr.msk.mxu1 %vm610_vm3, %v3209_v9 }
 0xc2e   :  { %5783 = vmatpush3.xpose.msk.msra.mxu1 %vm610_vm3, %v3209_v9 }
 0xc47   :  { %v2938_v19 = vpop.permute.xlu1 %2937  ;;  %v3120_v5 = vpop.permute.xlu0 %3119 }
 0xc48   :  { %5759 = vmatprep.subr.msk.mxu0 %vm610_vm3, %v2938_v19 }
 0xc49   :  { %5760 = vmatpush3.xpose.msk.msra.mxu0 %vm610_vm3, %v2938_v19 }
 0xc4b   :  { %v3302_v7 = vpop.permute.xlu1 %3301  ;;  %v3116_v52 = vpop.permute.xlu0 %3115 }
 0xc4c   :  { %4007 = vrot.lane.b32.xlu0 %v3116_v52, %s6192_s26 }
 0xc4f   :  { %v2936_v63 = vpop.permute.xlu1 %2935  ;;  %v3207_v25 = vpop.permute.xlu0 %3206 }
 0xc50   :  { %5761 = vmatprep.subr.msk.mxu0 %vm610_vm3, %v2936_v63  ;;  %5785 = vmatmul.mubr.msk.f32.vlgmr.msra.gmra.mxu1 %vm610_vm3, %v3207_v25 }
 0xc51   :  { %4094 = vrot.lane.b32.xlu1 %v3207_v25, %s6192_s26  ;;  %5762 = vmatpush3.xpose.msk.msra.mxu0 %vm610_vm3, %v2936_v63 }
 0xc52   :  { %5773 = vmatprep.subr.msk.mxu0 %vm610_vm3, %v3120_v5 }
 0xc53   :  { %v3393_v16 = vpop.permute.xlu1 %3392  ;;  %v3118_v43 = vpop.permute.xlu0 %3117 }
 0xc54   :  { %5764 = vmatmul.mubr.msk.f32.vlgmr.msra.gmra.mxu0 %vm610_vm3, %v6746_v3  ;;  %5794 = vmatprep.subr.msk.mxu1 %vm610_vm3, %v3393_v16 }
 0xc55   :  { %3918 = vrot.lane.b32.xlu1 %v3023_v53, %s6192_s26  ;;  %5774 = vmatpush3.xpose.msk.msra.mxu0 %vm610_vm3, %v3120_v5 }
 0xc56   :  { %5795 = vmatpush3.xpose.msk.msra.mxu1 %vm610_vm3, %v3393_v16  ;;  %5775 = vmatprep.subr.msk.mxu0 %vm610_vm3, %v3118_v43 }
 0xc57   :  { %v3484_v18 = vpop.permute.xlu1 %3483  ;;  %v3391_v56 = vpop.permute.xlu0 %3390 }
 0xc58   :  { %5796 = vmatprep.subr.msk.mxu1 %vm610_vm3, %v3391_v56 }
 0xc59   :  { %4092 = vrot.lane.b32.xlu1 %v3205_v12, %s6192_s26  ;;  %5776 = vmatpush3.xpose.msk.msra.mxu0 %vm610_vm3, %v3118_v43 }
 0xc5a   :  { %5797 = vmatpush3.xpose.msk.msra.mxu1 %vm610_vm3, %v3391_v56  ;;  %5787 = vmatprep.subr.msk.mxu0 %vm610_vm3, %v3302_v7 }
 0xc5b   :  { %v3114_v26 = vpop.permute.xlu1 %3113  ;;  %v3300_v6 = vpop.permute.xlu0 %3299 }
 0xc5c   :  { %5777 = vmatprep.mubr.msk.f32.mxu0 %vm610_vm3, %v3114_v26  ;;  %4005 = vrot.lane.b32.xlu0 %v3114_v26, %s6192_s26 }
 0xc5d   :  { %5778 = vmatmul.mubr.msk.f32.vlgmr.msra.gmra.mxu0 %vm610_vm3, %v3116_v52 }
 0xc5e   :  { %5788 = vmatpush3.xpose.msk.msra.mxu0 %vm610_vm3, %v3302_v7 }
 0xc5f   :  { %5789 = vmatprep.subr.msk.mxu0 %vm610_vm3, %v3300_v6  ;;  %v6822_v28 = vpop.permute.xlu1 %3386  ;;  %v6824_v24 = vpop.permute.xlu0 %3297 }
 0xc60   :  { %5798 = vmatprep.mubr.msk.f32.mxu1 %vm610_vm3, %v6822_v28 }
 0xc62   :  { %5790 = vmatpush3.xpose.msk.msra.mxu0 %vm610_vm3, %v3300_v6 }
 0xc63   :  { %5801 = vmatprep.subr.msk.mxu0 %vm610_vm3, %v3484_v18  ;;  %v6830_v55 = vpop.permute.xlu1 %3295  ;;  %v6832_v29 = vpop.permute.xlu0 %3388 }
 0xc64   :  { %5791 = vmatprep.mubr.msk.f32.mxu0 %vm610_vm3, %v6830_v55  ;;  %5799 = vmatmul.mubr.msk.f32.vlgmr.msra.gmra.mxu1 %vm610_vm3, %v6832_v29 }
 0xc65   :  { %5792 = vmatmul.mubr.msk.f32.vlgmr.msra.gmra.mxu0 %vm610_vm3, %v6824_v24 }
 0xc66   :  { %5802 = vmatpush3.xpose.msk.msra.mxu0 %vm610_vm3, %v3484_v18 }
 0xc67   :  { %v3482_v31 = vpop.permute.xlu1 %3481  ;;  %v6841_v21 = vpop.permute.xlu0 %3477 }
 0xc68   :  { %5803 = vmatprep.subr.msk.mxu0 %vm610_vm3, %v3482_v31  ;;  %5805 = vmatprep.mubr.msk.f32.mxu0 %vm610_vm3, %v6841_v21 }
 0xc6a   :  { %5804 = vmatpush3.xpose.msk.msra.mxu0 %vm610_vm3, %v3482_v31 }
 0xc6b   :  { %v6847_v47 = vpop.permute.xlu1 %3479  ;;  %v3745_v49 = vpop.permute.xlu0 %3744 }
 0xc6d   :  { %5806 = vmatmul.mubr.msk.f32.vlgmr.msra.gmra.mxu0 %vm610_vm3, %v6847_v47 }
 0xc6f   :  { %v3747_v32 = vpop.permute.xlu1 %3746  ;;  %v6923_v19 = vpop.permute.xlu0 %3831 }
 0xc70   :  { %5808 = vmatprep.subr.mxu1 %v3747_v32 }
 0xc71   :  { %5809 = vmatpush3.msra.mxu1 %v3747_v32 }
 0xc72   :  { %5810 = vmatprep.subr.mxu1 %v3745_v49 }
 0xc73   :  { %v6851_v35 = vpop.permute.xlu1 %3833  ;;  %5811 = vmatpush3.msra.mxu1 %v3745_v49 }
 0xc74   :  { %5815 = vmatprep.subr.mxu1 %v6851_v35 }
 0xc8b   :  { %v3921_v36 = vpop.permute.xlu1 %3920 }
 0xc8c   :  { %5822 = vmatprep.subr.mxu0 %v3921_v36 }
 0xc8d   :  { %5823 = vmatpush3.msra.mxu0 %v3921_v36 }
 0xcbe   :  { %v6925_v52 = vpop.permute.xlu0 %4007 }
 0xcc3   :  { %v6854_v27 = vpop.permute.xlu1 %4094 }
 0xcc7   :  { %v3919_v23 = vpop.permute.xlu1 %3918 }
 0xcc8   :  { %5824 = vmatprep.subr.mxu0 %v3919_v23 }
 0xcc9   :  { %5825 = vmatpush3.msra.mxu0 %v3919_v23 }
 0xcca   :  { %5836 = vmatprep.subr.mxu0 %v6854_v27 }
 0xccb   :  { %v6921_v12 = vpop.permute.xlu1 %4092 }
 0xcce   :  { %v6929_v63 = vpop.permute.xlu0 %4005 }
 0xce1   :  { %v5758_v61 = vpop.f32.mrf.mxu1 }
 0xce2   :  { %v3571_v30 = vsel %vm41_vm1, %v5758_v61, -inf }
 0xce3   :  { %v2924_v17 = vpop.f32.mrf.mxu1  ;;  %3572 = vmax.xlane.f32.xlu1 %v3571_v30 }
 0xce4   :  { %v3568_v40 = vsel %vm41_vm1, %v2924_v17, -inf }
 0xce5   :  { %3569 = vmax.xlane.f32.xlu0 %v3568_v40 }
 0xce9   :  { %v6867_v2 = vpop.f32.mrf.mxu1 }
 0xcea   :  { %v3583_v14 = vsel %vm41_vm1, %v6867_v2, -inf }
 0xceb   :  { %v6871_v51 = vpop.f32.mrf.mxu1 }
 0xcec   :  { %v3580_v44 = vsel %vm41_vm1, %v6871_v51, -inf }
 0xd10   :  { %v6881_v62 = vpop.f32.mrf.mxu1 }
 0xd11   :  { %v3595_v46 = vsel %vm41_vm1, %v6881_v62, -inf }
 0xd12   :  { %v6887_v33 = vpop.f32.mrf.mxu1 }
 0xd13   :  { %v3592_v3 = vsel %vm41_vm1, %v6887_v33, -inf }
 0xd14   :  { %v6859_v42 = vpop.f32.mrf.mxu0 }
 0xd15   :  { %v3577_v48 = vsel %vm41_vm1, %v6859_v42, -inf }
 0xd16   :  { %v6863_v0 = vpop.f32.mrf.mxu0  ;;  %3578 = vmax.xlane.f32.xlu1 %v3577_v48 }
 0xd17   :  { %v3574_v39 = vsel %vm41_vm1, %v6863_v0, -inf }
 0xd18   :  { %3575 = vmax.xlane.f32.xlu0 %v3574_v39 }
 0xd1c   :  { %3584 = vmax.xlane.f32.xlu0 %v3583_v14 }
 0xd1d   :  { %v6873_v37 = vpop.f32.mrf.mxu0 }
 0xd1e   :  { %v3589_v38 = vsel %vm41_vm1, %v6873_v37, -inf }
 0xd1f   :  { %3590 = vmax.xlane.f32.xlu1 %v3589_v38  ;;  %v6877_v54 = vpop.f32.mrf.mxu0 }
 0xd20   :  { %3581 = vmax.xlane.f32.xlu0 %v3580_v44  ;;  %v3586_v15 = vsel %vm41_vm1, %v6877_v54, -inf }
 0xd23   :  { %3587 = vmax.xlane.f32.xlu1 %v3586_v15 }
 0xd24   :  { %3596 = vmax.xlane.f32.xlu0 %v3595_v46  ;;  %v6897_v41 = vpop.f32.mrf.mxu1 }
 0xd25   :  { %v6889_v8 = vpop.f32.mrf.mxu0  ;;  %v3607_v57 = vsel %vm41_vm1, %v6897_v41, -inf }
 0xd26   :  { %v3601_v10 = vsel %vm41_vm1, %v6889_v8, -inf  ;;  %v6903_v58 = vpop.f32.mrf.mxu1 }
 0xd27   :  { %3602 = vmax.xlane.f32.xlu1 %v3601_v10  ;;  %v6893_v22 = vpop.f32.mrf.mxu0  ;;  %v3604_v11 = vsel %vm41_vm1, %v6903_v58, -inf }
 0xd28   :  { %3593 = vmax.xlane.f32.xlu0 %v3592_v3  ;;  %v3598_v59 = vsel %vm41_vm1, %v6893_v22, -inf }
 0xd2b   :  { %3599 = vmax.xlane.f32.xlu1 %v3598_v59 }
 0xd2c   :  { %3608 = vmax.xlane.f32.xlu0 %v3607_v57 }
 0xd2d   :  { %v6907_v45 = vpop.f32.mrf.mxu0 }
 0xd2e   :  { %v3613_v60 = vsel %vm41_vm1, %v6907_v45, -inf }
 0xd2f   :  { %v6917_v50 = vpop.f32.mrf.mxu0 }
 0xd30   :  { %3605 = vmax.xlane.f32.xlu0 %v3604_v11  ;;  %v3610_v53 = vsel %vm41_vm1, %v6917_v50, -inf }
 0xd34   :  { %3614 = vmax.xlane.f32.xlu0 %v3613_v60 }
 0xd3c   :  { %4268 = vrot.lane.b32.xlu1 %v6832_v29, %s6192_s26 }
 0xd4a   :  { %4181 = vrot.lane.b32.xlu0 %v6824_v24, %s6192_s26 }
 0xd4e   :  { %4179 = vrot.lane.b32.xlu0 %v6830_v55, %s6192_s26 }
 0xd60   :  { %3611 = vmax.xlane.f32.xlu1 %v3610_v53 }
 0xd6c   :  { %v3573_v9 = vpop.xlane.xlu1 %3572 }
 0xd6d   :  { %v3617_v5 = vsub.f32 %v5758_v61, %v3573_v9 }
 0xd6e   :  { %v3570_v25 = vpop.xlane.xlu0 %3569 }
 0xd6f   :  { %v3634_v7 = vmul.f32 1.442695, %v3617_v5  ;;  %v3616_v16 = vsub.f32 %v2924_v17, %v3570_v25 }
 0xd71   :  { %6033 = vpow2.f32 %v3634_v7  ;;  %4266 = vrot.lane.b32.xlu1 %v6822_v28, %s6192_s26  ;;  %v3632_v56 = vmul.f32 1.442695, %v3616_v16 }
 0xd73   :  { %6035 = vpow2.f32 %v3632_v56 }
 0xd7e   :  { %v6931_v43 = vpop.eup %6033 }
 0xd7f   :  { %v3667_v18 = vsel %vm41_vm1, %v6931_v43, 0.0 }
 0xd80   :  { %3668 = vadd.xlane.f32.xlu0 %v3667_v18  ;;  %v6935_v26 = vpop.eup %6035 }
 0xd81   :  { %v3664_v6 = vsel %vm41_vm1, %v6935_v26, 0.0 }
 0xd95   :  { %3665 = vadd.xlane.f32.xlu1 %v3664_v6 }
 0xd9f   :  { %v3579_v24 = vpop.xlane.xlu1 %3578 }
 0xda0   :  { %v3619_v28 = vsub.f32 %v6859_v42, %v3579_v24 }
 0xda1   :  { %v3576_v55 = vpop.xlane.xlu0 %3575 }
 0xda2   :  { %v3638_v29 = vmul.f32 1.442695, %v3619_v28  ;;  %v3618_v31 = vsub.f32 %v6863_v0, %v3576_v55 }
 0xda4   :  { %6037 = vpow2.f32 %v3638_v29  ;;  %v3636_v32 = vmul.f32 1.442695, %v3618_v31 }
 0xda5   :  { %v3585_v49 = vpop.xlane.xlu0 %3584 }
 0xda6   :  { %6039 = vpow2.f32 %v3636_v32  ;;  %v3621_v36 = vsub.f32 %v6867_v2, %v3585_v49 }
 0xda8   :  { %v3642_v23 = vmul.f32 1.442695, %v3621_v36  ;;  %v3591_v61 = vpop.xlane.xlu1 %3590 }
 0xda9   :  { %v3623_v30 = vsub.f32 %v6873_v37, %v3591_v61  ;;  %v3582_v17 = vpop.xlane.xlu0 %3581 }
 0xdaa   :  { %6041 = vpow2.f32 %v3642_v23  ;;  %v3620_v40 = vsub.f32 %v6871_v51, %v3582_v17 }
 0xdab   :  { %v3646_v48 = vmul.f32 1.442695, %v3623_v30 }
 0xdac   :  { %v3640_v42 = vmul.f32 1.442695, %v3620_v40  ;;  %v3588_v39 = vpop.xlane.xlu1 %3587 }
 0xdad   :  { %6043 = vpow2.f32 %v3646_v48  ;;  %v3622_v0 = vsub.f32 %v6877_v54, %v3588_v39  ;;  %v3597_v14 = vpop.xlane.xlu0 %3596 }
 0xdae   :  { %6045 = vpow2.f32 %v3640_v42  ;;  %v3625_v38 = vsub.f32 %v6881_v62, %v3597_v14 }
 0xdaf   :  { %v3644_v44 = vmul.f32 1.442695, %v3622_v0 }
 0xdb0   :  { %v3650_v2 = vmul.f32 1.442695, %v3625_v38  ;;  %v3603_v15 = vpop.xlane.xlu1 %3602 }
 0xdb1   :  { %v6946_v46 = vpop.eup %6037  ;;  %6047 = vpow2.f32 %v3644_v44  ;;  %v3627_v37 = vsub.f32 %v6889_v8, %v3603_v15  ;;  %v3594_v10 = vpop.xlane.xlu0 %3593 }
 0xdb2   :  { %6049 = vpow2.f32 %v3650_v2  ;;  %v3624_v51 = vsub.f32 %v6887_v33, %v3594_v10  ;;  %v3673_v3 = vsel %vm41_vm1, %v6946_v46, 0.0 }
 0xdb3   :  { %v6952_v54 = vpop.eup %6039  ;;  %v3654_v59 = vmul.f32 1.442695, %v3627_v37  ;;  %3674 = vadd.xlane.f32.xlu1 %v3673_v3 }
 0xdb4   :  { %v3648_v62 = vmul.f32 1.442695, %v3624_v51  ;;  %v3600_v57 = vpop.xlane.xlu1 %3599  ;;  %v3670_v53 = vsel %vm41_vm1, %v6952_v54, 0.0 }
 0xdb5   :  { %6051 = vpow2.f32 %v3654_v59  ;;  %v3626_v11 = vsub.f32 %v6893_v22, %v3600_v57  ;;  %v3609_v60 = vpop.xlane.xlu0 %3608 }
 0xdb6   :  { %6053 = vpow2.f32 %v3648_v62  ;;  %v3629_v8 = vsub.f32 %v6897_v41, %v3609_v60 }
 0xdb7   :  { %v6958_v33 = vpop.eup %6041  ;;  %v3652_v9 = vmul.f32 1.442695, %v3626_v11  ;;  %3671 = vadd.xlane.f32.xlu1 %v3670_v53 }
 0xdb8   :  { %v3658_v5 = vmul.f32 1.442695, %v3629_v8  ;;  %v3679_v7 = vsel %vm41_vm1, %v6958_v33, 0.0  ;;  %v7004_v14 = vpop.permute.xlu1 %4268 }
 0xdb9   :  { %6055 = vpow2.f32 %v3652_v9  ;;  %3680 = vadd.xlane.f32.xlu0 %v3679_v7  ;;  %v3606_v25 = vpop.xlane.xlu0 %3605 }
 0xdba   :  { %v6962_v16 = vpop.eup %6043  ;;  %6057 = vpow2.f32 %v3658_v5  ;;  %v3628_v22 = vsub.f32 %v6903_v58, %v3606_v25 }
 0xdbb   :  { %v6965_v41 = vpop.eup %6045  ;;  %v3685_v18 = vsel %vm41_vm1, %v6962_v16, 0.0 }
 0xdbc   :  { %v3656_v56 = vmul.f32 1.442695, %v3628_v22  ;;  %3686 = vadd.xlane.f32.xlu1 %v3685_v18  ;;  %v3676_v6 = vsel %vm41_vm1, %v6965_v41, 0.0 }
 0xdbd   :  { %3677 = vadd.xlane.f32.xlu0 %v3676_v6  ;;  %v3615_v24 = vpop.xlane.xlu0 %3614 }
 0xdbe   :  { %v6971_v28 = vpop.eup %6047  ;;  %6059 = vpow2.f32 %v3656_v56  ;;  %v3631_v55 = vsub.f32 %v6907_v45, %v3615_v24 }
 0xdbf   :  { %v6974_v29 = vpop.eup %6049  ;;  %v3682_v58 = vsel %vm41_vm1, %v6971_v28, 0.0 }
 0xdc0   :  { %v3662_v31 = vmul.f32 1.442695, %v3631_v55  ;;  %3683 = vadd.xlane.f32.xlu1 %v3682_v58  ;;  %v3691_v32 = vsel %vm41_vm1, %v6974_v29, 0.0 }
 0xdc1   :  { %3692 = vadd.xlane.f32.xlu0 %v3691_v32  ;;  %v7015_v10 = vpop.permute.xlu0 %4181 }
 0xdc2   :  { %v6980_v49 = vpop.eup %6051  ;;  %6061 = vpow2.f32 %v3662_v31 }
 0xdc3   :  { %v6982_v36 = vpop.eup %6053  ;;  %v3697_v23 = vsel %vm41_vm1, %v6980_v49, 0.0 }
 0xdc4   :  { %3698 = vadd.xlane.f32.xlu1 %v3697_v23  ;;  %v3688_v45 = vsel %vm41_vm1, %v6982_v36, 0.0 }
 0xdc5   :  { %3689 = vadd.xlane.f32.xlu0 %v3688_v45  ;;  %v7017_v51 = vpop.permute.xlu0 %4179 }
 0xdc6   :  { %v6988_v61 = vpop.eup %6055 }
 0xdc7   :  { %v6990_v30 = vpop.eup %6057  ;;  %v3694_v17 = vsel %vm41_vm1, %v6988_v61, 0.0 }
 0xdc8   :  { %3695 = vadd.xlane.f32.xlu1 %v3694_v17  ;;  %v3703_v40 = vsel %vm41_vm1, %v6990_v30, 0.0 }
 0xdc9   :  { %3704 = vadd.xlane.f32.xlu0 %v3703_v40 }
 0xdcb   :  { %v6996_v48 = vpop.eup %6059 }
 0xdcc   :  { %v3700_v42 = vsel %vm41_vm1, %v6996_v48, 0.0 }
 0xdcd   :  { %3701 = vadd.xlane.f32.xlu0 %v3700_v42 }
 0xdcf   :  { %v7000_v39 = vpop.eup %6061 }
 0xdd0   :  { %v3709_v0 = vsel %vm41_vm1, %v7000_v39, 0.0 }
 0xdd1   :  { %3710 = vadd.xlane.f32.xlu0 %v3709_v0 }
 0xde7   :  { %4355 = vrot.lane.b32.xlu0 %v6847_v47, %s6192_s26 }
 0xde9   :  { %v3612_v38 = vpop.xlane.xlu1 %3611 }
 0xdea   :  { %v3630_v44 = vsub.f32 %v6917_v50, %v3612_v38 }
 0xdec   :  { %v3660_v2 = vmul.f32 1.442695, %v3630_v44 }
 0xded   :  { %v7019_v3 = vpop.permute.xlu1 %4266 }
 0xdee   :  { %6063 = vpow2.f32 %v3660_v2 }
 0xdfb   :  { %v7009_v15 = vpop.eup %6063 }
 0xdfc   :  { %v3706_v37 = vsel %vm41_vm1, %v7009_v15, 0.0 }
 0xdfd   :  { %3707 = vadd.xlane.f32.xlu1 %v3706_v37 }
 0xe09   :  { %v3669_v47 = vpop.xlane.xlu0 %3668 }
 0xe0a   :  { %6065 = vrcp.f32 %v3669_v47  ;;  %v4502_v47 = vld [vmem:[#allocation5 + $0x158] sm:$0xff] }
 0xe0e   :  { %4353 = vrot.lane.b32.xlu1 %v6841_v21, %s6192_s26 }
 0xe17   :  { %v6066_v59 = vpop.eup %6065 }
 0xe18   :  { %v3729_v11 = vmul.f32 %v6066_v59, %v6931_v43  ;;  %v4500_v59 = vld [vmem:[#allocation5 + $0x148] sm:$0xff] }
 0xe1e   :  { %v3666_v50 = vpop.xlane.xlu1 %3665 }
 0xe1f   :  { %6067 = vrcp.f32 %v3666_v50 }
 0xe2c   :  { %v6068_v62 = vpop.eup %6067 }
 0xe2d   :  { %v3728_v57 = vmul.f32 %v6068_v62, %v6935_v26 }
 0xe2f   :  { %5812 = vmatprep.mubr.msk.f32.mxu1 %vm41_vm1, %v3728_v57 }
 0xe30   :  { %5813 = vmatmul.mubr.msk.f32.vlgmr.msra.gmra.mxu1 %vm41_vm1, %v3729_v11 }
 0xe31   :  { %5816 = vmatpush3.msra.mxu1 %v6851_v35 }
 0xe32   :  { %5817 = vmatprep.subr.mxu1 %v6923_v19 }
 0xe33   :  { %5818 = vmatpush3.msra.mxu1 %v6923_v19 }
 0xe34   :  { %5829 = vmatprep.subr.mxu1 %v6925_v52 }
 0xe3c   :  { %v3675_v21 = vpop.xlane.xlu1 %3674 }
 0xe3d   :  { %6069 = vrcp.f32 %v3675_v21 }
 0xe40   :  { %v3672_v60 = vpop.xlane.xlu1 %3671 }
 0xe41   :  { %6071 = vrcp.f32 %v3672_v60 }
 0xe42   :  { %v3681_v8 = vpop.xlane.xlu0 %3680 }
 0xe43   :  { %6073 = vrcp.f32 %v3681_v8 }
 0xe45   :  { %v3687_v26 = vpop.xlane.xlu1 %3686 }
 0xe46   :  { %v3678_v43 = vpop.xlane.xlu0 %3677 }
 0xe47   :  { %6075 = vrcp.f32 %v3678_v43 }
 0xe48   :  { %6077 = vrcp.f32 %v3687_v26 }
 0xe49   :  { %v3684_v53 = vpop.xlane.xlu1 %3683 }
 0xe4a   :  { %6079 = vrcp.f32 %v3684_v53  ;;  %v3693_v9 = vpop.xlane.xlu0 %3692  ;;  %v6070_v35 = vpop.eup %6069 }
 0xe4b   :  { %6081 = vrcp.f32 %v3693_v9  ;;  %v3731_v22 = vmul.f32 %v6070_v35, %v6946_v46 }
 0xe4d   :  { %v3699_v5 = vpop.xlane.xlu1 %3698 }
 0xe4e   :  { %v6072_v7 = vpop.eup %6071  ;;  %v3690_v19 = vpop.xlane.xlu0 %3689 }
 0xe4f   :  { %6083 = vrcp.f32 %v3690_v19  ;;  %v3730_v25 = vmul.f32 %v6072_v7, %v6952_v54 }
 0xe50   :  { %6085 = vrcp.f32 %v3699_v5  ;;  %v6074_v6 = vpop.eup %6073 }
 0xe51   :  { %v3696_v18 = vpop.xlane.xlu1 %3695  ;;  %5819 = vmatprep.mubr.msk.f32.mxu1 %vm41_vm1, %v3730_v25  ;;  %v3733_v58 = vmul.f32 %v6074_v6, %v6958_v33 }
 0xe52   :  { %6087 = vrcp.f32 %v3696_v18  ;;  %5820 = vmatmul.mubr.msk.f32.vlgmr.msra.gmra.mxu1 %vm41_vm1, %v3731_v22  ;;  %v3705_v56 = vpop.xlane.xlu0 %3704 }
 0xe53   :  { %5830 = vmatpush3.msra.mxu1 %v6925_v52  ;;  %6089 = vrcp.f32 %v3705_v56 }
 0xe54   :  { %v6076_v24 = vpop.eup %6075  ;;  %5831 = vmatprep.subr.mxu1 %v6929_v63 }
 0xe55   :  { %5832 = vmatpush3.msra.mxu1 %v6929_v63  ;;  %v3732_v54 = vmul.f32 %v6076_v24, %v6965_v41  ;;  %v6078_v55 = vpop.eup %6077 }
 0xe56   :  { %5843 = vmatprep.subr.mxu1 %v7015_v10  ;;  %v3702_v46 = vpop.xlane.xlu0 %3701  ;;  %v3735_v63 = vmul.f32 %v6078_v55, %v6962_v16 }
 0xe57   :  { %v6080_v31 = vpop.eup %6079  ;;  %6091 = vrcp.f32 %v3702_v46  ;;  %5826 = vmatprep.mubr.msk.f32.mxu0 %vm41_vm1, %v3732_v54 }
 0xe58   :  { %5827 = vmatmul.mubr.msk.f32.vlgmr.msra.gmra.mxu0 %vm41_vm1, %v3733_v58  ;;  %v3734_v52 = vmul.f32 %v6080_v31, %v6971_v28  ;;  %v6082_v32 = vpop.eup %6081 }
 0xe59   :  { %5837 = vmatpush3.msra.mxu0 %v6854_v27  ;;  %v3737_v23 = vmul.f32 %v6082_v32, %v6974_v29 }
 0xe5a   :  { %5838 = vmatprep.subr.mxu0 %v6921_v12  ;;  %5833 = vmatprep.mubr.msk.f32.mxu1 %vm41_vm1, %v3734_v52  ;;  %v3711_v41 = vpop.xlane.xlu0 %3710 }
 0xe5b   :  { %5839 = vmatpush3.msra.mxu0 %v6921_v12  ;;  %5834 = vmatmul.mubr.msk.f32.vlgmr.msra.gmra.mxu1 %vm41_vm1, %v3735_v63  ;;  %6093 = vrcp.f32 %v3711_v41 }
 0xe5c   :  { %v6084_v33 = vpop.eup %6083  ;;  %5844 = vmatpush3.msra.mxu1 %v7015_v10  ;;  %5850 = vmatprep.subr.mxu0 %v7004_v14  ;;  %v4503_v10 = vld [vmem:[#allocation5 + $0x160] sm:$0xff] }
 0xe5d   :  { %5845 = vmatprep.subr.mxu1 %v7017_v51  ;;  %v3736_v27 = vmul.f32 %v6084_v33, %v6982_v36  ;;  %v6086_v16 = vpop.eup %6085 }
 0xe5e   :  { %5846 = vmatpush3.msra.mxu1 %v7017_v51  ;;  %v4356_v28 = vpop.permute.xlu0 %4355  ;;  %v3739_v17 = vmul.f32 %v6086_v16, %v6980_v49 }
 0xe5f   :  { %v6088_v45 = vpop.eup %6087  ;;  %5840 = vmatprep.mubr.msk.f32.mxu0 %vm41_vm1, %v3736_v27  ;;  %5857 = vmatprep.subr.mxu1 %v4356_v28 }
 0xe60   :  { %5841 = vmatmul.mubr.msk.f32.vlgmr.msra.gmra.mxu0 %vm41_vm1, %v3737_v23  ;;  %v3738_v12 = vmul.f32 %v6088_v45, %v6988_v61  ;;  %v6090_v36 = vpop.eup %6089 }
 0xe61   :  { %5851 = vmatpush3.msra.mxu0 %v7004_v14  ;;  %v3741_v42 = vmul.f32 %v6090_v36, %v6990_v30 }
 0xe62   :  { %5852 = vmatprep.subr.mxu0 %v7019_v3  ;;  %5847 = vmatprep.mubr.msk.f32.mxu1 %vm41_vm1, %v3738_v12 }
 0xe63   :  { %5853 = vmatpush3.msra.mxu0 %v7019_v3  ;;  %5848 = vmatmul.mubr.msk.f32.vlgmr.msra.gmra.mxu1 %vm41_vm1, %v3739_v17 }
 0xe64   :  { %v6092_v29 = vpop.eup %6091  ;;  %5858 = vmatpush3.msra.mxu1 %v4356_v28  ;;  %5864 = vmatprep.subr.mxu0 %v4503_v10  ;;  %v5309_v28 = vld [vmem:[#allocation5 + $0x168] ss:$0 sm:$0xff] }
 0xe65   :  { %v3740_v40 = vmul.f32 %v6092_v29, %v6996_v48 }
 0xe67   :  { %5854 = vmatprep.mubr.msk.f32.mxu0 %vm41_vm1, %v3740_v40 }
 0xe68   :  { %5855 = vmatmul.mubr.msk.f32.vlgmr.msra.gmra.mxu0 %vm41_vm1, %v3741_v42  ;;  %v6094_v0 = vpop.eup %6093 }
 0xe69   :  { %v3743_v44 = vmul.f32 %v6094_v0, %v7000_v39  ;;  %5865 = vmatpush3.msra.mxu0 %v4503_v10  ;;  %v4501_v39 = vld [vmem:[#allocation5 + $0x150] sm:$0xff] }
 0xe6a   :  { %5866 = vmatprep.subr.mxu0 %v4502_v47 }
 0xe6b   :  { %5867 = vmatpush3.msra.mxu0 %v4502_v47 }
 0xe6c   :  { %5868 = vmatprep.subr.mxu0 %v4501_v39 }
 0xe6d   :  { %5869 = vmatpush3.msra.mxu0 %v4501_v39  ;;  %v4682_v39 = vld [vmem:[#allocation5 + $0x190] sm:$0xff] }
 0xe6e   :  { %5870 = vmatprep.subr.mxu0 %v4500_v59 }
 0xe6f   :  { %5871 = vmatpush3.msra.mxu0 %v4500_v59  ;;  %v4680_v59 = vld [vmem:[#allocation5 + $0x180] sm:$0xff] }
 0xe86   :  { %v3708_v49 = vpop.xlane.xlu1 %3707 }
 0xe87   :  { %6095 = vrcp.f32 %v3708_v49 }
 0xe8a   :  { %v4354_v61 = vpop.permute.xlu1 %4353 }
 0xe8b   :  { %5859 = vmatprep.subr.mxu1 %v4354_v61 }
 0xe8c   :  { %5860 = vmatpush3.msra.mxu1 %v4354_v61 }
 0xe94   :  { %v6096_v14 = vpop.eup %6095 }
 0xe95   :  { %v3742_v38 = vmul.f32 %v6096_v14, %v7009_v15 }
 0xe97   :  { %5861 = vmatprep.mubr.msk.f32.mxu1 %vm41_vm1, %v3742_v38 }
 0xe98   :  { %5862 = vmatmul.mubr.msk.f32.vlgmr.msra.gmra.mxu1 %vm41_vm1, %v3743_v44 }
 0xef0   :  { %v5814_v30 = vpop.f32.mrf.mxu1 }
 0xef2   :  { %v3822_v48 = vpop.f32.mrf.mxu1 }
 0xf12   :  { %v5821_v2 = vpop.f32.mrf.mxu1 }
 0xf14   :  { %v3909_v51 = vpop.f32.mrf.mxu1 }
 0xf18   :  { %v5828_v37 = vpop.f32.mrf.mxu0 }
 0xf19   :  { %4446 = vrot.lane.b32.xlu1 %v5828_v37, %s6182_s18 }
 0xf1a   :  { %v3996_v3 = vpop.f32.mrf.mxu0 }
 0xf1b   :  { %v5835_v50 = vpop.f32.mrf.mxu1  ;;  %4444 = vrot.lane.b32.xlu0 %v3996_v3, %s6182_s18 }
 0xf1d   :  { %v4083_v15 = vpop.f32.mrf.mxu1  ;;  %4450 = vrot.lane.b32.xlu1 %v5835_v50, %s6182_s18 }
 0xf1f   :  { %4448 = vrot.lane.b32.xlu0 %v4083_v15, %s6182_s18  ;;  %v4681_v15 = vld [vmem:[#allocation5 + $0x188] sm:$0xff] }
 0xf20   :  { %v5842_v62 = vpop.f32.mrf.mxu0 }
 0xf21   :  { %4462 = vrot.lane.b32.xlu1 %v5842_v62, %s6193_s27 }
 0xf22   :  { %v4170_v57 = vpop.f32.mrf.mxu0 }
 0xf23   :  { %v5849_v11 = vpop.f32.mrf.mxu1  ;;  %4460 = vrot.lane.b32.xlu0 %v4170_v57, %s6193_s27 }
 0xf25   :  { %v4257_v21 = vpop.f32.mrf.mxu1  ;;  %4466 = vrot.lane.b32.xlu1 %v5849_v11, %s6193_s27 }
 0xf27   :  { %4464 = vrot.lane.b32.xlu0 %v4257_v21, %s6193_s27 }
 0xf28   :  { %v5856_v60 = vpop.f32.mrf.mxu0 }
 0xf29   :  { %4478 = vrot.lane.b32.xlu1 %v5856_v60, %s6194_s28 }
 0xf2a   :  { %v4344_v8 = vpop.f32.mrf.mxu0 }
 0xf2b   :  { %4476 = vrot.lane.b32.xlu0 %v4344_v8, %s6194_s28 }
 0xf58   :  { %v5863_v26 = vpop.f32.mrf.mxu1 }
 0xf59   :  { %4482 = vrot.lane.b32.xlu1 %v5863_v26, %s6194_s28 }
 0xf5a   :  { %v4431_v43 = vpop.f32.mrf.mxu1 }
 0xf5b   :  { %4480 = vrot.lane.b32.xlu0 %v4431_v43, %s6194_s28 }
 0xf8b   :  { %v4447_v53 = vpop.permute.xlu1 %4446 }
 0xf8c   :  { %v4489_v6 = vsel %vm610_vm3, %v5814_v30, %v4447_v53 }
 0xf8d   :  { %v4445_v9 = vpop.permute.xlu0 %4444 }
 0xf8e   :  { %v4488_v18 = vsel %vm610_vm3, %v3822_v48, %v4445_v9 }
 0xf8f   :  { %v4451_v35 = vpop.permute.xlu1 %4450 }
 0xf90   :  { %v4491_v63 = vsel %vm610_vm3, %v5821_v2, %v4451_v35  ;;  %v4797_v35 = vld [vmem:[#allocation5 + $0x1e0] sm:$0xff] }
 0xf91   :  { %v4449_v5 = vpop.permute.xlu0 %4448  ;;  %5892 = vmatprep.subr.mxu0 %v4797_v35 }
 0xf92   :  { %v4490_v31 = vsel %vm610_vm3, %v3909_v51, %v4449_v5  ;;  %v4796_v5 = vld [vmem:[#allocation5 + $0x1d8] sm:$0xff] }
 0xf93   :  { %v4463_v7 = vpop.permute.xlu1 %4462 }
 0xf94   :  { %v4493_v55 = vsel %vm41_vm1, %v4489_v6, %v4463_v7  ;;  %v4795_v7 = vld [vmem:[#allocation5 + $0x1d0] sm:$0xff] }
 0xf95   :  { %v4461_v19 = vpop.permute.xlu0 %4460 }
 0xf96   :  { %v4492_v24 = vsel %vm41_vm1, %v4488_v18, %v4461_v19  ;;  %v4794_v19 = vld [vmem:[#allocation5 + $0x1c8] sm:$0xff] }
 0xf97   :  { %v4467_v25 = vpop.permute.xlu1 %4466 }
 0xf98   :  { %v4495_v33 = vsel %vm41_vm1, %v4491_v63, %v4467_v25  ;;  %v5315_v63 = vld [vmem:[#allocation5 + $0x178] ss:$0 sm:$0xff] }
 0xf99   :  { %v4465_v22 = vpop.permute.xlu0 %4464 }
 0xf9a   :  { %v4494_v41 = vsel %vm41_vm1, %v4490_v31, %v4465_v22 }
 0xf9b   :  { %v4479_v56 = vpop.permute.xlu1 %4478 }
 0xf9c   :  { %v4497_v58 = vsel %vm2257_vm4, %v4493_v55, %v4479_v56 }
 0xf9d   :  { %v4477_v54 = vpop.permute.xlu0 %4476 }
 0xf9e   :  { %v4496_v46 = vsel %vm2257_vm4, %v4492_v24, %v4477_v54 }
 0xf9f   :  { %5872 = vmatprep.mubr.msk.f32.mxu0 %vm506_vm2, %v4496_v46  ;;  %v5314_v46 = vld [vmem:[#allocation5 + $0x170] ss:$0 sm:$0xff] }
 0xfa0   :  { %5873 = vmatmul.mubr.msk.f32.vlgmr.msra.gmra.mxu0 %vm506_vm2, %v4497_v58 }
 0xfa1   :  { %5893 = vmatpush3.msra.mxu0 %v4797_v35 }
 0xfa2   :  { %5894 = vmatprep.subr.mxu0 %v4796_v5 }
 0xfa3   :  { %5895 = vmatpush3.msra.mxu0 %v4796_v5 }
 0xfa4   :  { %5896 = vmatprep.subr.mxu0 %v4795_v7 }
 0xfa5   :  { %5897 = vmatpush3.msra.mxu0 %v4795_v7 }
 0xfa6   :  { %5898 = vmatprep.subr.mxu0 %v4794_v19 }
 0xfa7   :  { %5899 = vmatpush3.msra.mxu0 %v4794_v19 }
 0xfcb   :  { %v4483_v52 = vpop.permute.xlu1 %4482 }
 0xfcc   :  { %v4499_v16 = vsel %vm2257_vm4, %v4495_v33, %v4483_v52 }
 0xfcd   :  { %v4481_v32 = vpop.permute.xlu0 %4480 }
 0xfce   :  { %v4498_v27 = vsel %vm2257_vm4, %v4494_v41, %v4481_v32 }
 0xfcf   :  { %5875 = vmatprep.mubr.msk.f32.mxu0 %vm506_vm2, %v4498_v27 }
 0xfd0   :  { %5876 = vmatmul.mubr.msk.f32.gmra.mxu0 %vm506_vm2, %v4499_v16 }
0x1060   :  { %v5874_v23 = vpop.f32.mrf.mxu0 }
0x1061   :  { %v4593_v45 = vadd.f32 %v5874_v23, %v5309_v28 }
0x1062   :  { %v4587_v12 = vpop.f32.mrf.mxu0 }
0x1063   :  { %v4607_v17 = vadd.f32 %v4593_v45, %v6722_v13  ;;  %v4588_v36 = vadd.f32 %v5309_v28, %v4587_v12 }
0x1065   :  { %v4606_v29 = vadd.f32 %v4588_v36, %v6720_v34  ;;  %v4615_v40 = vsel %vm506_vm2, %v4607_v17, 0.0 }
0x1066   :  { %4616 = vadd.xlane.f32.xlu1 %v4615_v40 }
0x1067   :  { %v4612_v42 = vsel %vm506_vm2, %v4606_v29, 0.0 }
0x1068   :  { %4613 = vadd.xlane.f32.xlu0 %v4612_v42 }
0x1090   :  { %v5877_v49 = vpop.f32.mrf.mxu0 }
0x1091   :  { %v4603_v0 = vadd.f32 %v5877_v49, %v5309_v28 }
0x1092   :  { %v4597_v61 = vpop.f32.mrf.mxu0 }
0x1093   :  { %v4598_v14 = vadd.f32 %v5309_v28, %v4597_v61  ;;  %v4609_v44 = vadd.f32 %v4603_v0, %v6730_v4  ;;  %v4683_v4 = vld [vmem:[#allocation5 + $0x198] sm:$0xff] }
0x1094   :  { %5878 = vmatprep.subr.mxu1 %v4683_v4 }
0x1095   :  { %v4608_v38 = vadd.f32 %v4598_v14, %v6728_v20  ;;  %v4621_v13 = vsel %vm506_vm2, %v4609_v44, 0.0  ;;  %5879 = vmatpush3.msra.mxu1 %v4683_v4  ;;  %v4793_v14 = vld [vmem:[#allocation5 + $0x1c0] sm:$0xff] }
0x1096   :  { %5880 = vmatprep.subr.mxu1 %v4682_v39  ;;  %5900 = vmatprep.subr.mxu0 %v4793_v14 }
0x1097   :  { %v4618_v30 = vsel %vm506_vm2, %v4608_v38, 0.0  ;;  %5881 = vmatpush3.msra.mxu1 %v4682_v39  ;;  %5901 = vmatpush3.msra.mxu0 %v4793_v14 }
0x1098   :  { %4619 = vadd.xlane.f32.xlu0 %v4618_v30  ;;  %5882 = vmatprep.subr.mxu1 %v4681_v15  ;;  %v4790_v30 = vld [vmem:[#allocation5 + $0x1a8] sm:$0xff] }
0x1099   :  { %5883 = vmatpush3.msra.mxu1 %v4681_v15  ;;  %v5321_v15 = vld [vmem:[#allocation5 + $0x1e8] ss:$0 sm:$0xff] }
0x109a   :  { %5884 = vmatprep.subr.mxu1 %v4680_v59 }
0x109b   :  { %5885 = vmatpush3.msra.mxu1 %v4680_v59 }
0x109c   :  { %4622 = vadd.xlane.f32.xlu0 %v4621_v13  ;;  %5914 = vmatprep.subr.mxu1 %v6183_v1  ;;  %v5316_v13 = vld [vmem:[#allocation5 + $0x1a0] ss:$0 sm:$0xff] }
0x10ef   :  { %v4617_v34 = vpop.xlane.xlu1 %4616 }
0x10f0   :  { %v4625_v48 = vmul.f32 0.03125, %v4617_v34 }
0x10f1   :  { %v4614_v2 = vpop.xlane.xlu0 %4613 }
0x10f2   :  { %v4629_v37 = vsub.f32 %v4607_v17, %v4625_v48  ;;  %v4624_v10 = vmul.f32 0.03125, %v4614_v2 }
0x10f4   :  { %v4628_v51 = vsub.f32 %v4606_v29, %v4624_v10  ;;  %v4633_v3 = vmul.f32 %v4629_v37, %v4629_v37 }
0x10f6   :  { %v4639_v47 = vsel %vm506_vm2, %v4633_v3, 0.0  ;;  %v4632_v50 = vmul.f32 %v4628_v51, %v4628_v51 }
0x10f7   :  { %4640 = vadd.xlane.f32.xlu0 %v4639_v47 }
0x10f8   :  { %v4636_v20 = vsel %vm506_vm2, %v4632_v50, 0.0 }
0x10f9   :  { %4637 = vadd.xlane.f32.xlu1 %v4636_v20 }
0x1121   :  { %v4620_v62 = vpop.xlane.xlu0 %4619 }
0x1122   :  { %v4626_v57 = vmul.f32 0.03125, %v4620_v62 }
0x1124   :  { %v4630_v11 = vsub.f32 %v4608_v38, %v4626_v57  ;;  %v4792_v38 = vld [vmem:[#allocation5 + $0x1b8] sm:$0xff] }
0x1125   :  { %v4623_v21 = vpop.xlane.xlu0 %4622  ;;  %5902 = vmatprep.subr.mxu0 %v4792_v38 }
0x1126   :  { %v4627_v60 = vmul.f32 0.03125, %v4623_v21  ;;  %v4634_v8 = vmul.f32 %v4630_v11, %v4630_v11  ;;  %5903 = vmatpush3.msra.mxu0 %v4792_v38 }
0x1128   :  { %v4631_v26 = vsub.f32 %v4609_v44, %v4627_v60  ;;  %v4642_v43 = vsel %vm506_vm2, %v4634_v8, 0.0  ;;  %v4791_v44 = vld [vmem:[#allocation5 + $0x1b0] sm:$0xff] }
0x1129   :  { %4643 = vadd.xlane.f32.xlu1 %v4642_v43  ;;  %5904 = vmatprep.subr.mxu0 %v4791_v44 }
0x112a   :  { %v4635_v53 = vmul.f32 %v4631_v26, %v4631_v26  ;;  %5905 = vmatpush3.msra.mxu0 %v4791_v44 }
0x112b   :  { %5906 = vmatprep.subr.mxu0 %v4790_v30 }
0x112c   :  { %v4645_v9 = vsel %vm506_vm2, %v4635_v53, 0.0  ;;  %5907 = vmatpush3.msra.mxu0 %v4790_v30 }
0x112d   :  { %4646 = vadd.xlane.f32.xlu0 %v4645_v9 }
0x1180   :  { %v4641_v25 = vpop.xlane.xlu0 %4640 }
0x1181   :  { %v4649_v22 = vmul.f32 0.03125, %v4641_v25 }
0x1182   :  { %v4638_v18 = vpop.xlane.xlu1 %4637 }
0x1183   :  { %v4653_v56 = vadd.f32 1e-05, %v4649_v22  ;;  %v4648_v6 = vmul.f32 0.03125, %v4638_v18 }
0x1185   :  { %6097 = vrsqrt.f32 %v4653_v56  ;;  %v4652_v24 = vadd.f32 1e-05, %v4648_v6 }
0x1187   :  { %6099 = vrsqrt.f32 %v4652_v24 }
0x1192   :  { %v6098_v54 = vpop.eup %6097 }
0x1193   :  { %v4661_v55 = vmul.f32 %v6098_v54, %v4629_v37 }
0x1194   :  { %v6100_v58 = vpop.eup %6099 }
0x1195   :  { %v4660_v31 = vmul.f32 %v6100_v58, %v4628_v51  ;;  %v4669_v52 = vmul.f32 %v5314_v46, %v4661_v55 }
0x1197   :  { %v4668_v41 = vmul.f32 %v5314_v46, %v4660_v31  ;;  %v4677_v33 = vadd.f32 %v5315_v63, %v4669_v52 }
0x1199   :  { %v4676_v32 = vadd.f32 %v5315_v63, %v4668_v41 }
0x119b   :  { %5886 = vmatprep.mubr.msk.f32.mxu1 %vm506_vm2, %v4676_v32 }
0x119c   :  { %5887 = vmatmul.mubr.msk.f32.vlgmr.msra.gmra.mxu1 %vm506_vm2, %v4677_v33 }
0x11b2   :  { %v4644_v27 = vpop.xlane.xlu1 %4643 }
0x11b3   :  { %v4650_v16 = vmul.f32 0.03125, %v4644_v27 }
0x11b5   :  { %v4654_v28 = vadd.f32 1e-05, %v4650_v16 }
0x11b6   :  { %v4647_v23 = vpop.xlane.xlu0 %4646 }
0x11b7   :  { %6101 = vrsqrt.f32 %v4654_v28  ;;  %v4651_v45 = vmul.f32 0.03125, %v4647_v23 }
0x11b9   :  { %v4655_v12 = vadd.f32 1e-05, %v4651_v45 }
0x11bb   :  { %6103 = vrsqrt.f32 %v4655_v12  ;;  %v4998_v12 = vld [vmem:[#allocation5 + $0x218] sm:$0xff] }
0x11bc   :  { %5915 = vmatpush3.msra.mxu1 %v4998_v12 }
0x11bd   :  { %5916 = vmatprep.subr.mxu1 %v6183_v1 }
0x11c4   :  { %v6102_v17 = vpop.eup %6101 }
0x11c5   :  { %v4662_v36 = vmul.f32 %v6102_v17, %v4630_v11  ;;  %v4997_v17 = vld [vmem:[#allocation5 + $0x210] sm:$0xff] }
0x11c6   :  { %5917 = vmatpush3.msra.mxu1 %v4997_v17  ;;  %v5330_v17 = vld [vmem:[#allocation5 + $0x248] ss:$0 sm:$0xff] }
0x11c7   :  { %v4670_v29 = vmul.f32 %v5314_v46, %v4662_v36  ;;  %v4996_v36 = vld [vmem:[#allocation5 + $0x208] sm:$0xff]  ;;  %5918 = vmatprep.subr.mxu1 %v6183_v1 }
0x11c8   :  { %v6104_v40 = vpop.eup %6103  ;;  %5919 = vmatpush3.msra.mxu1 %v4996_v36 }
0x11c9   :  { %v4678_v42 = vadd.f32 %v5315_v63, %v4670_v29  ;;  %v4663_v49 = vmul.f32 %v6104_v40, %v4631_v26  ;;  %v4995_v29 = vld [vmem:[#allocation5 + $0x200] sm:$0xff]  ;;  %5920 = vmatprep.subr.mxu1 %v6183_v1 }
0x11ca   :  { %5921 = vmatpush3.msra.mxu1 %v4995_v29 }
0x11cb   :  { %5889 = vmatprep.mubr.msk.f32.mxu1 %vm506_vm2, %v4678_v42  ;;  %v4671_v61 = vmul.f32 %v5314_v46, %v4663_v49  ;;  %5925 = vmatprep.subr.mxu1 %v6183_v1 }
0x11cd   :  { %v4679_v0 = vadd.f32 %v5315_v63, %v4671_v61 }
0x11cf   :  { %5890 = vmatmul.mubr.msk.f32.gmra.mxu1 %vm506_vm2, %v4679_v0 }
0x11d0   :  { %5922 = vmatprep.mubr.msk.f32.mxu1 %vm6184_vm0, %v6183_v1 }
0x125c   :  { %v5888_v34 = vpop.f32.mrf.mxu1 }
0x125d   :  { %v4773_v48 = vadd.f32 %v5888_v34, %v5316_v13 }
0x125e   :  { %v4767_v2 = vpop.f32.mrf.mxu1 }
0x125f   :  { %v4768_v37 = vadd.f32 %v5316_v13, %v4767_v2  ;;  %v4787_v51 = vmax.f32 %v4773_v48, 0.0  ;;  %v5326_v2 = vld [vmem:[#allocation5 + $0x1f0] ss:$0 sm:$0xff] }
0x1261   :  { %v4786_v10 = vmax.f32 %v4768_v37, 0.0 }
0x1263   :  { %5908 = vmatprep.mubr.msk.f32.mxu0 %vm2566_vm5, %v4786_v10 }
0x1264   :  { %5909 = vmatmul.mubr.msk.f32.vlgmr.msra.gmra.mxu0 %vm2566_vm5, %v4787_v51 }
0x128f   :  { %v5891_v3 = vpop.f32.mrf.mxu1 }
0x1290   :  { %v4783_v47 = vadd.f32 %v5891_v3, %v5316_v13 }
0x1291   :  { %v4777_v50 = vpop.f32.mrf.mxu1 }
0x1292   :  { %v4778_v20 = vadd.f32 %v5316_v13, %v4777_v50  ;;  %v4789_v39 = vmax.f32 %v4783_v47, 0.0 }
0x1294   :  { %v4788_v4 = vmax.f32 %v4778_v20, 0.0  ;;  %v5327_v20 = vld [vmem:[#allocation5 + $0x1f8] ss:$0 sm:$0xff] }
0x1296   :  { %5911 = vmatprep.mubr.msk.f32.mxu0 %vm2566_vm5, %v4788_v4 }
0x1297   :  { %5912 = vmatmul.mubr.msk.f32.gmra.mxu0 %vm2566_vm5, %v4789_v39 }
0x1324   :  { %v5910_v59 = vpop.f32.mrf.mxu0 }
0x1325   :  { %v4887_v62 = vadd.f32 %v5910_v59, %v5321_v15 }
0x1326   :  { %v4881_v57 = vpop.f32.mrf.mxu0 }
0x1327   :  { %v4901_v11 = vadd.f32 %v4887_v62, %v4677_v33  ;;  %v4882_v21 = vadd.f32 %v5321_v15, %v4881_v57 }
0x1329   :  { %v4900_v60 = vadd.f32 %v4882_v21, %v4676_v32  ;;  %v4909_v8 = vsel %vm506_vm2, %v4901_v11, 0.0 }
0x132a   :  { %4910 = vadd.xlane.f32.xlu0 %v4909_v8 }
0x132b   :  { %v4906_v26 = vsel %vm506_vm2, %v4900_v60, 0.0 }
0x132c   :  { %4907 = vadd.xlane.f32.xlu1 %v4906_v26 }
0x1357   :  { %v5913_v43 = vpop.f32.mrf.mxu0 }
0x1358   :  { %v4897_v53 = vadd.f32 %v5913_v43, %v5321_v15 }
0x1359   :  { %v4891_v9 = vpop.f32.mrf.mxu0 }
0x135a   :  { %v4903_v35 = vadd.f32 %v4897_v53, %v4679_v0  ;;  %v4892_v5 = vadd.f32 %v5321_v15, %v4891_v9 }
0x135c   :  { %v4902_v7 = vadd.f32 %v4892_v5, %v4678_v42  ;;  %v4915_v19 = vsel %vm506_vm2, %v4903_v35, 0.0 }
0x135d   :  { %4916 = vadd.xlane.f32.xlu0 %v4915_v19 }
0x135e   :  { %v4912_v25 = vsel %vm506_vm2, %v4902_v7, 0.0 }
0x135f   :  { %4913 = vadd.xlane.f32.xlu1 %v4912_v25 }
0x13b3   :  { %v4911_v22 = vpop.xlane.xlu0 %4910 }
0x13b4   :  { %v4919_v18 = vmul.f32 0.03125, %v4911_v22 }
0x13b5   :  { %v4908_v56 = vpop.xlane.xlu1 %4907 }
0x13b6   :  { %v4923_v6 = vsub.f32 %v4901_v11, %v4919_v18  ;;  %v4918_v24 = vmul.f32 0.03125, %v4908_v56 }
0x13b8   :  { %v4922_v54 = vsub.f32 %v4900_v60, %v4918_v24  ;;  %v4927_v55 = vmul.f32 %v4923_v6, %v4923_v6 }
0x13ba   :  { %v4933_v46 = vsel %vm506_vm2, %v4927_v55, 0.0  ;;  %v4926_v58 = vmul.f32 %v4922_v54, %v4922_v54 }
0x13bb   :  { %4934 = vadd.xlane.f32.xlu0 %v4933_v46 }
0x13bc   :  { %v4930_v31 = vsel %vm506_vm2, %v4926_v58, 0.0 }
0x13bd   :  { %4931 = vadd.xlane.f32.xlu1 %v4930_v31 }
0x13e6   :  { %v4917_v52 = vpop.xlane.xlu0 %4916 }
0x13e7   :  { %v4921_v63 = vmul.f32 0.03125, %v4917_v52 }
0x13e8   :  { %v4914_v41 = vpop.xlane.xlu1 %4913 }
0x13e9   :  { %v4925_v32 = vsub.f32 %v4903_v35, %v4921_v63  ;;  %v4920_v33 = vmul.f32 0.03125, %v4914_v41  ;;  %v5084_v63 = vld [vmem:[#allocation5 + $0x240] sm:$0xff] }
0x13eb   :  { %v4924_v27 = vsub.f32 %v4902_v7, %v4920_v33  ;;  %v4929_v16 = vmul.f32 %v4925_v32, %v4925_v32  ;;  %v5082_v33 = vld [vmem:[#allocation5 + $0x230] sm:$0xff] }
0x13ed   :  { %v4939_v28 = vsel %vm506_vm2, %v4929_v16, 0.0  ;;  %v4928_v23 = vmul.f32 %v4924_v27, %v4924_v27  ;;  %v5328_v16 = vld [vmem:[#allocation5 + $0x220] ss:$0 sm:$0xff] }
0x13ee   :  { %4940 = vadd.xlane.f32.xlu0 %v4939_v28 }
0x13ef   :  { %v4936_v45 = vsel %vm506_vm2, %v4928_v23, 0.0 }
0x13f0   :  { %4937 = vadd.xlane.f32.xlu1 %v4936_v45 }
0x1444   :  { %v4935_v42 = vpop.xlane.xlu0 %4934 }
0x1445   :  { %v4943_v61 = vmul.f32 0.03125, %v4935_v42 }
0x1446   :  { %v4932_v40 = vpop.xlane.xlu1 %4931 }
0x1447   :  { %v4942_v49 = vmul.f32 0.03125, %v4932_v40  ;;  %v4947_v14 = vadd.f32 1e-05, %v4943_v61 }
0x1449   :  { %v4946_v0 = vadd.f32 1e-05, %v4942_v49 }
0x144b   :  { %6105 = vrsqrt.f32 %v4946_v0 }
0x144c   :  { %6107 = vrsqrt.f32 %v4947_v14 }
0x1458   :  { %v6106_v38 = vpop.eup %6105 }
0x1459   :  { %v6108_v44 = vpop.eup %6107  ;;  %v4954_v30 = vmul.f32 %v6106_v38, %v4922_v54 }
0x145a   :  { %v4955_v34 = vmul.f32 %v6108_v44, %v4923_v6 }
0x145b   :  { %v4962_v10 = vmul.f32 %v5326_v2, %v4954_v30 }
0x145c   :  { %v4963_v47 = vmul.f32 %v5326_v2, %v4955_v34 }
0x145d   :  { %v4970_v4 = vadd.f32 %v5327_v20, %v4962_v10 }
0x145e   :  { %v4971_v39 = vadd.f32 %v5327_v20, %v4963_v47 }
0x145f   :  { %v4974_v15 = vsel %vm506_vm2, %v4970_v4, 0.0 }
0x1460   :  { %v4975_v59 = vsel %vm506_vm2, %v4971_v39, 0.0 }
0x1461   :  { %v4976_v62 = vadd.f32 %v4975_v59, %v4974_v15 }
0x1463   :  { %v4977_v11 = vrot.slane %v4976_v62, 4 }
0x1465   :  { %v4978_v43 = vadd.f32 %v4977_v11, %v4976_v62 }
0x1467   :  { %v4979_v5 = vrot.slane %v4978_v43, 2 }
0x1469   :  { %v4980_v22 = vadd.f32 %v4979_v5, %v4978_v43 }
0x146b   :  { %v4981_v6 = vrot.slane %v4980_v22, 1 }
0x146d   :  { %v4982_v55 = vadd.f32 %v4981_v6, %v4980_v22 }
0x146f   :  { %v4993_v31 = vmul.f32 0.0625, %v4982_v55 }
0x1477   :  { %v4941_v13 = vpop.xlane.xlu0 %4940 }
0x1478   :  { %v4945_v48 = vmul.f32 0.03125, %v4941_v13 }
0x1479   :  { %v4938_v37 = vpop.xlane.xlu1 %4937 }
0x147a   :  { %v4949_v51 = vadd.f32 1e-05, %v4945_v48  ;;  %v4944_v3 = vmul.f32 0.03125, %v4938_v37 }
0x147c   :  { %6109 = vrsqrt.f32 %v4949_v51  ;;  %v4948_v50 = vadd.f32 1e-05, %v4944_v3 }
0x147e   :  { %6111 = vrsqrt.f32 %v4948_v50 }
0x1489   :  { %v6110_v57 = vpop.eup %6109 }
0x148a   :  { %v4957_v21 = vmul.f32 %v6110_v57, %v4925_v32  ;;  %v5083_v32 = vld [vmem:[#allocation5 + $0x238] sm:$0xff] }
0x148b   :  { %v6112_v60 = vpop.eup %6111 }
0x148c   :  { %v4965_v8 = vmul.f32 %v5326_v2, %v4957_v21  ;;  %v4956_v26 = vmul.f32 %v6112_v60, %v4924_v27  ;;  %v5081_v27 = vld [vmem:[#allocation5 + $0x228] sm:$0xff] }
0x148e   :  { %v4973_v53 = vadd.f32 %v5327_v20, %v4965_v8  ;;  %v4964_v9 = vmul.f32 %v5326_v2, %v4956_v26 }
0x1490   :  { %v4972_v35 = vadd.f32 %v5327_v20, %v4964_v9  ;;  %v4984_v19 = vsel %vm506_vm2, %v4973_v53, 0.0 }
0x1492   :  { %v4983_v7 = vsel %vm506_vm2, %v4972_v35, 0.0 }
0x1493   :  { %v4985_v25 = vadd.f32 %v4984_v19, %v4983_v7 }
0x1495   :  { %v4986_v18 = vrot.slane %v4985_v25, 4 }
0x1497   :  { %v4987_v56 = vadd.f32 %v4986_v18, %v4985_v25 }
0x1499   :  { %v4988_v24 = vrot.slane %v4987_v56, 2 }
0x149b   :  { %v4989_v54 = vadd.f32 %v4988_v24, %v4987_v56 }
0x149d   :  { %v4990_v46 = vrot.slane %v4989_v54, 1 }
0x149f   :  { %v4991_v58 = vadd.f32 %v4990_v46, %v4989_v54 }
0x14a1   :  { %v4994_v52 = vmul.f32 0.0625, %v4991_v58 }
0x14a3   :  { %v5007_v41 = vsel %vm5006_vm6, %v4994_v52, %v4993_v31 }
0x14a4   :  { %5923 = vmatmul.mubr.msk.f32.vlgmr.msra.gmra.mxu1 %vm506_vm2, %v5007_v41 }
0x14a5   :  { %5926 = vmatpush3.msra.mxu1 %v5084_v63  ;;  %5933 = vmatprep.mubr.msk.f32.mxu1 %vm6184_vm0, %v6183_v1 }
0x14a6   :  { %5927 = vmatprep.subr.mxu1 %v6183_v1 }
0x14a7   :  { %5928 = vmatpush3.msra.mxu1 %v5083_v32 }
0x14a8   :  { %5929 = vmatprep.subr.mxu1 %v6183_v1 }
0x14a9   :  { %5930 = vmatpush3.msra.mxu1 %v5082_v33 }
0x14aa   :  { %5931 = vmatprep.subr.mxu1 %v6183_v1 }
0x14ab   :  { %5932 = vmatpush3.msra.mxu1 %v5081_v27 }
0x1564   :  { %v5076_v28 = vpop.f32.mrf.mxu1 }
0x1565   :  { %v5077_v23 = vadd.f32 %v5328_v16, %v5076_v28 }
0x1566   :  { %v5924_v45 = vpop.f32.mrf.mxu1 }
0x1567   :  { %v5080_v12 = vmax.f32 %v5077_v23, 0.0 }
0x1569   :  { %5934 = vmatmul.mubr.msk.f32.vlgmr.msra.gmra.mxu1 %vm506_vm2, %v5080_v12 }
0x1629   :  { %v5159_v36 = vpop.f32.mrf.mxu1 }
0x162a   :  { %v5160_v29 = vadd.f32 %v5330_v17, %v5159_v36 }
0x162b   :  { %v5935_v40 = vpop.f32.mrf.mxu1 }
0x162c   :  { %5164 = vst.msk [vmem:[#allocation7] sm:$0x3] %vm5163_vm7, %v5160_v29 }
0x162d   :  { %6164 = shalt.err (!%p6161_p0)
}
0x162e   :  { %5174 = dma.vmem_to_hbm [thread:$0]  %s5172_s30, 32, %s7150_s2, [#allocation4]  }
0x162f   :  { %6177 = dma.done.wait [#allocation4], 32  }
0x1630   :  { %6178 = vsyncadd [#allocation4], 4294967264 }
0x1631   :  { %5178 = vsyncpa [#allocation3], 1 }
0x1632   :  { %5179 = vsyncpa [#allocation6], 1 }
0x1633   :  { %5180 = vsyncpa [#allocation4], 1 }

</bundles_post_ra>
